<compile_context>
chip_gen: v7x
topology: tpu7x:2x2x1
jax: 0.10.0
libtpu: 0.0.40
codegen_flags: <defaults>
</compile_context>

<pallas_src>
import functools

import jax
import jax.numpy as jnp
from jax.experimental import pallas as pl
from jax.experimental.pallas import tpu as pltpu


def _autoencoder_kernel(x_ref,
                        w1_ref, b1_ref,
                        w2_ref, b2_ref,
                        w3_ref, b3_ref,
                        w4_ref, b4_ref,
                        o_ref):
    x = x_ref[...]                                           # (block_b, d_in) bf16

    # Encoder
    h1 = jnp.dot(x, w1_ref[...], preferred_element_type=jnp.float32) + b1_ref[...]
    h1 = jnp.maximum(h1, 0.0).astype(jnp.bfloat16)           # ReLU
    z = jnp.dot(h1, w2_ref[...], preferred_element_type=jnp.float32) + b2_ref[...]
    z = jnp.maximum(z, 0.0).astype(jnp.bfloat16)             # ReLU

    # Decoder
    h2 = jnp.dot(z, w3_ref[...], preferred_element_type=jnp.float32) + b3_ref[...]
    h2 = jnp.maximum(h2, 0.0).astype(jnp.bfloat16)           # ReLU
    logits = jnp.dot(h2, w4_ref[...], preferred_element_type=jnp.float32) + b4_ref[...]

    # Sigmoid on the EUP path: exp + approximate reciprocal.
    sig = pl.reciprocal(1.0 + jnp.exp(-logits), approx=True)
    o_ref[...] = sig.astype(o_ref.dtype)


def _round_up(n, m):
    return ((n + m - 1) // m) * m


def _pad_to(a, target_shape):
    pads = [(0, t - s) for s, t in zip(a.shape, target_shape)]
    return jnp.pad(a, pads)


@functools.partial(jax.jit, static_argnames=("block_b",))
def autoencoder_forward(x, params, *, block_b=256):
    """x: (B, input_dim) float32. params: dict of pre-transposed weights/biases.

    Weights are stored as (in_features, out_features) so the kernel computes
    x @ W + b (identical to torch's y = x @ W.T + b with W pre-transposed).
    """
    B, d_in = x.shape
    d_hid = params["w1"].shape[1]
    d_lat = params["w2"].shape[1]

    # Lane-pad feature dims to 128-multiples, batch to a tile multiple.
    d_in_p = _round_up(d_in, 128)
    d_hid_p = _round_up(d_hid, 128)
    d_lat_p = _round_up(d_lat, 128)
    B_p = _round_up(B, block_b)

    # Zero-padded, bf16 operands (zeros in padded rows/cols leave math intact).
    xp = _pad_to(x, (B_p, d_in_p)).astype(jnp.bfloat16)
    w1 = _pad_to(params["w1"], (d_in_p, d_hid_p)).astype(jnp.bfloat16)
    w2 = _pad_to(params["w2"], (d_hid_p, d_lat_p)).astype(jnp.bfloat16)
    w3 = _pad_to(params["w3"], (d_lat_p, d_hid_p)).astype(jnp.bfloat16)
    w4 = _pad_to(params["w4"], (d_hid_p, d_in_p)).astype(jnp.bfloat16)
    b1 = _pad_to(params["b1"], (1, d_hid_p)).astype(jnp.float32)
    b2 = _pad_to(params["b2"], (1, d_lat_p)).astype(jnp.float32)
    b3 = _pad_to(params["b3"], (1, d_hid_p)).astype(jnp.float32)
    b4 = _pad_to(params["b4"], (1, d_in_p)).astype(jnp.float32)

    grid = (B_p // block_b,)

    # Constant-index params: single-buffered (no useful prefetch, saves VMEM).
    def param_spec(shape):
        return pl.BlockSpec(shape, lambda i: (0, 0), pipeline_mode=pl.Buffered(1))

    flops = 2 * B_p * (d_in_p * d_hid_p + d_hid_p * d_lat_p
                       + d_lat_p * d_hid_p + d_hid_p * d_in_p)
    bytes_accessed = (xp.size * 2 + B_p * d_in_p * 4
                      + (w1.size + w2.size + w3.size + w4.size) * 2
                      + (b1.size + b2.size + b3.size + b4.size) * 4)
    cost = pl.CostEstimate(flops=flops,
                           transcendentals=2 * B_p * d_in_p,
                           bytes_accessed=bytes_accessed)

    out_padded = pl.pallas_call(
        _autoencoder_kernel,
        out_shape=jax.ShapeDtypeStruct((B_p, d_in_p), jnp.float32),
        grid_spec=pltpu.PrefetchScalarGridSpec(
            num_scalar_prefetch=0,
            grid=grid,
            in_specs=[
                pl.BlockSpec((block_b, d_in_p), lambda i: (i, 0)),   # x tile
                param_spec((d_in_p, d_hid_p)), param_spec((1, d_hid_p)),   # L1
                param_spec((d_hid_p, d_lat_p)), param_spec((1, d_lat_p)),  # L2
                param_spec((d_lat_p, d_hid_p)), param_spec((1, d_hid_p)),  # L3
                param_spec((d_hid_p, d_in_p)), param_spec((1, d_in_p)),    # L4
            ],
            out_specs=pl.BlockSpec((block_b, d_in_p), lambda i: (i, 0)),
        ),
        compiler_params=pltpu.CompilerParams(
            dimension_semantics=("parallel",)),
        cost_estimate=cost,
    )(xp, w1, b1, w2, b2, w3, b3, w4, b4)

    # Strip batch / feature padding.
    return out_padded[:B, :d_in]


def init_params(key, input_dim=784, hidden_dim=128, latent_dim=64):
    """Deterministic init mimicking nn.Linear's U(-1/sqrt(fan_in), 1/sqrt(fan_in)).

    Weights are stored as (in_features, out_features); biases as (1, out_features).
    """
    dims = [(input_dim, hidden_dim),
            (hidden_dim, latent_dim),
            (latent_dim, hidden_dim),
            (hidden_dim, input_dim)]
    params = {}
    keys = jax.random.split(key, 2 * len(dims))
    for idx, (fan_in, fan_out) in enumerate(dims):
        bound = 1.0 / jnp.sqrt(jnp.float32(fan_in))
        w = jax.random.uniform(keys[2 * idx], (fan_in, fan_out),
                               minval=-bound, maxval=bound, dtype=jnp.float32)
        b = jax.random.uniform(keys[2 * idx + 1], (1, fan_out),
                               minval=-bound, maxval=bound, dtype=jnp.float32)
        params[f"w{idx + 1}"] = w
        params[f"b{idx + 1}"] = b
    return params


def reference_forward(x, params):
    """Pure-JAX fp32 reference for correctness checking."""
    h = jnp.maximum(x @ params["w1"] + params["b1"], 0.0)
    z = jnp.maximum(h @ params["w2"] + params["b2"], 0.0)
    h = jnp.maximum(z @ params["w3"] + params["b3"], 0.0)
    return jax.nn.sigmoid(h @ params["w4"] + params["b4"])


if __name__ == "__main__":
    key = jax.random.PRNGKey(0)
    k_param, k_x = jax.random.split(key)

    input_dim, hidden_dim, latent_dim = 784, 128, 64
    batch = 8  # small test batch; wrapper pads it up to one 256-row tile

    params = init_params(k_param, input_dim, hidden_dim, latent_dim)
    x = jax.random.uniform(k_x, (batch, input_dim), dtype=jnp.float32)

    out = autoencoder_forward(x, params)
    out = jax.block_until_ready(out)

    ref = reference_forward(x, params)
    assert out.shape == (batch, input_dim)
    # bf16 weights + approx-reciprocal sigmoid vs fp32 reference -> loose tolerance.
    assert jnp.allclose(out, ref, atol=2e-2, rtol=2e-2), "mismatch vs reference"

    print("KERNEL_OK")
</pallas_src>

<mosaic_0001>
module attributes {stable_mosaic.version = 11 : i64} {
  func.func @_autoencoder_kernel(%arg0: i32, %arg1: memref<256x896xbf16, #tpu.memory_space<vmem>>, %arg2: memref<896x128xbf16, #tpu.memory_space<vmem>>, %arg3: memref<1x128xf32, #tpu.memory_space<vmem>>, %arg4: memref<128x128xbf16, #tpu.memory_space<vmem>>, %arg5: memref<1x128xf32, #tpu.memory_space<vmem>>, %arg6: memref<128x128xbf16, #tpu.memory_space<vmem>>, %arg7: memref<1x128xf32, #tpu.memory_space<vmem>>, %arg8: memref<128x896xbf16, #tpu.memory_space<vmem>>, %arg9: memref<1x896xf32, #tpu.memory_space<vmem>>, %arg10: memref<256x896xf32, #tpu.memory_space<vmem>>) attributes {dimension_semantics = [#tpu.dimension_semantics<parallel>], iteration_bounds = array<i64: 1>, scalar_prefetch = 0 : i64, scratch_operands = 0 : i64, tpu.core_type = #tpu.core_type<tc>, window_params = [{transform_indices = @transform_0, window_bounds = array<i64: 256, 896>}, {pipeline_mode = #tpu.pipeline_mode<synchronous>, transform_indices = @transform_1, window_bounds = array<i64: 896, 128>}, {pipeline_mode = #tpu.pipeline_mode<synchronous>, transform_indices = @transform_2, window_bounds = array<i64: 1, 128>}, {pipeline_mode = #tpu.pipeline_mode<synchronous>, transform_indices = @transform_3, window_bounds = array<i64: 128, 128>}, {pipeline_mode = #tpu.pipeline_mode<synchronous>, transform_indices = @transform_4, window_bounds = array<i64: 1, 128>}, {pipeline_mode = #tpu.pipeline_mode<synchronous>, transform_indices = @transform_5, window_bounds = array<i64: 128, 128>}, {pipeline_mode = #tpu.pipeline_mode<synchronous>, transform_indices = @transform_6, window_bounds = array<i64: 1, 128>}, {pipeline_mode = #tpu.pipeline_mode<synchronous>, transform_indices = @transform_7, window_bounds = array<i64: 128, 896>}, {pipeline_mode = #tpu.pipeline_mode<synchronous>, transform_indices = @transform_8, window_bounds = array<i64: 1, 896>}, {transform_indices = @transform_9, window_bounds = array<i64: 256, 896>}]} {
    %c0 = arith.constant 0 : index
    %c0_0 = arith.constant 0 : index
    %0 = vector.load %arg1[%c0, %c0_0] : memref<256x896xbf16, #tpu.memory_space<vmem>>, vector<256x896xbf16>
    %c0_1 = arith.constant 0 : index
    %c0_2 = arith.constant 0 : index
    %1 = vector.load %arg2[%c0_1, %c0_2] : memref<896x128xbf16, #tpu.memory_space<vmem>>, vector<896x128xbf16>
    %cst = arith.constant dense<0.000000e+00> : vector<256x128xf32>
    %2 = tpu.matmul %0, %1, %cst {dimension_numbers = #tpu.dot_dimension_numbers<[1], [0], [0], [1], [0, 0, 1, 1], [], []>} : vector<256x896xbf16>, vector<896x128xbf16>, vector<256x128xf32> -> vector<256x128xf32>
    %c0_3 = arith.constant 0 : index
    %c0_4 = arith.constant 0 : index
    %3 = vector.load %arg3[%c0_3, %c0_4] : memref<1x128xf32, #tpu.memory_space<vmem>>, vector<1x128xf32>
    %4 = vector.broadcast %3 : vector<1x128xf32> to vector<256x128xf32>
    %5 = arith.addf %2, %4 : vector<256x128xf32>
    %cst_5 = arith.constant 0.000000e+00 : f32
    %6 = vector.broadcast %cst_5 : f32 to vector<256x128xf32>
    %7 = arith.maximumf %5, %6 : vector<256x128xf32>
    %8 = arith.truncf %7 : vector<256x128xf32> to vector<256x128xbf16>
    %c0_6 = arith.constant 0 : index
    %c0_7 = arith.constant 0 : index
    %9 = vector.load %arg4[%c0_6, %c0_7] : memref<128x128xbf16, #tpu.memory_space<vmem>>, vector<128x128xbf16>
    %cst_8 = arith.constant dense<0.000000e+00> : vector<256x128xf32>
    %10 = tpu.matmul %8, %9, %cst_8 {dimension_numbers = #tpu.dot_dimension_numbers<[1], [0], [0], [1], [0, 0, 1, 1], [], []>} : vector<256x128xbf16>, vector<128x128xbf16>, vector<256x128xf32> -> vector<256x128xf32>
    %c0_9 = arith.constant 0 : index
    %c0_10 = arith.constant 0 : index
    %11 = vector.load %arg5[%c0_9, %c0_10] : memref<1x128xf32, #tpu.memory_space<vmem>>, vector<1x128xf32>
    %12 = vector.broadcast %11 : vector<1x128xf32> to vector<256x128xf32>
    %13 = arith.addf %10, %12 : vector<256x128xf32>
    %cst_11 = arith.constant 0.000000e+00 : f32
    %14 = vector.broadcast %cst_11 : f32 to vector<256x128xf32>
    %15 = arith.maximumf %13, %14 : vector<256x128xf32>
    %16 = arith.truncf %15 : vector<256x128xf32> to vector<256x128xbf16>
    %c0_12 = arith.constant 0 : index
    %c0_13 = arith.constant 0 : index
    %17 = vector.load %arg6[%c0_12, %c0_13] : memref<128x128xbf16, #tpu.memory_space<vmem>>, vector<128x128xbf16>
    %cst_14 = arith.constant dense<0.000000e+00> : vector<256x128xf32>
    %18 = tpu.matmul %16, %17, %cst_14 {dimension_numbers = #tpu.dot_dimension_numbers<[1], [0], [0], [1], [0, 0, 1, 1], [], []>} : vector<256x128xbf16>, vector<128x128xbf16>, vector<256x128xf32> -> vector<256x128xf32>
    %c0_15 = arith.constant 0 : index
    %c0_16 = arith.constant 0 : index
    %19 = vector.load %arg7[%c0_15, %c0_16] : memref<1x128xf32, #tpu.memory_space<vmem>>, vector<1x128xf32>
    %20 = vector.broadcast %19 : vector<1x128xf32> to vector<256x128xf32>
    %21 = arith.addf %18, %20 : vector<256x128xf32>
    %cst_17 = arith.constant 0.000000e+00 : f32
    %22 = vector.broadcast %cst_17 : f32 to vector<256x128xf32>
    %23 = arith.maximumf %21, %22 : vector<256x128xf32>
    %24 = arith.truncf %23 : vector<256x128xf32> to vector<256x128xbf16>
    %c0_18 = arith.constant 0 : index
    %c0_19 = arith.constant 0 : index
    %25 = vector.load %arg8[%c0_18, %c0_19] : memref<128x896xbf16, #tpu.memory_space<vmem>>, vector<128x896xbf16>
    %cst_20 = arith.constant dense<0.000000e+00> : vector<256x896xf32>
    %26 = tpu.matmul %24, %25, %cst_20 {dimension_numbers = #tpu.dot_dimension_numbers<[1], [0], [0], [1], [0, 0, 1, 1], [], []>} : vector<256x128xbf16>, vector<128x896xbf16>, vector<256x896xf32> -> vector<256x896xf32>
    %c0_21 = arith.constant 0 : index
    %c0_22 = arith.constant 0 : index
    %27 = vector.load %arg9[%c0_21, %c0_22] : memref<1x896xf32, #tpu.memory_space<vmem>>, vector<1x896xf32>
    %28 = vector.broadcast %27 : vector<1x896xf32> to vector<256x896xf32>
    %29 = arith.addf %26, %28 : vector<256x896xf32>
    %cst_23 = arith.constant 0.000000e+00 : f32
    %30 = vector.broadcast %cst_23 : f32 to vector<256x896xf32>
    %31 = arith.subf %30, %29 : vector<256x896xf32>
    %32 = math.exp %31 : vector<256x896xf32>
    %cst_24 = arith.constant 1.000000e+00 : f32
    %33 = vector.broadcast %cst_24 : f32 to vector<256x896xf32>
    %34 = arith.addf %33, %32 : vector<256x896xf32>
    %35 = tpu.reciprocal %34 {approx = true} : vector<256x896xf32> -> vector<256x896xf32>
    %c0_25 = arith.constant 0 : index
    %c0_26 = arith.constant 0 : index
    %36 = vector.load %arg10[%c0_25, %c0_26] : memref<256x896xf32, #tpu.memory_space<vmem>>, vector<256x896xf32>
    tpu.vector_store %arg10[%c0_25, %c0_26], %35 {strides = array<i32>} : memref<256x896xf32, #tpu.memory_space<vmem>>, vector<256x896xf32>,
    return
  }
  func.func @transform_0(%arg0: i32) -> (i32, i32) {
    %c0_i32 = arith.constant 0 : i32
    %c0_i32_0 = arith.constant 0 : i32
    return %arg0, %c0_i32 : i32, i32
  }
  func.func @transform_1(%arg0: i32) -> (i32, i32) {
    %c0_i32 = arith.constant 0 : i32
    %c0_i32_0 = arith.constant 0 : i32
    %c0_i32_1 = arith.constant 0 : i32
    return %c0_i32, %c0_i32_0 : i32, i32
  }
  func.func @transform_2(%arg0: i32) -> (i32, i32) {
    %c0_i32 = arith.constant 0 : i32
    %c0_i32_0 = arith.constant 0 : i32
    %c0_i32_1 = arith.constant 0 : i32
    return %c0_i32, %c0_i32_0 : i32, i32
  }
  func.func @transform_3(%arg0: i32) -> (i32, i32) {
    %c0_i32 = arith.constant 0 : i32
    %c0_i32_0 = arith.constant 0 : i32
    %c0_i32_1 = arith.constant 0 : i32
    return %c0_i32, %c0_i32_0 : i32, i32
  }
  func.func @transform_4(%arg0: i32) -> (i32, i32) {
    %c0_i32 = arith.constant 0 : i32
    %c0_i32_0 = arith.constant 0 : i32
    %c0_i32_1 = arith.constant 0 : i32
    return %c0_i32, %c0_i32_0 : i32, i32
  }
  func.func @transform_5(%arg0: i32) -> (i32, i32) {
    %c0_i32 = arith.constant 0 : i32
    %c0_i32_0 = arith.constant 0 : i32
    %c0_i32_1 = arith.constant 0 : i32
    return %c0_i32, %c0_i32_0 : i32, i32
  }
  func.func @transform_6(%arg0: i32) -> (i32, i32) {
    %c0_i32 = arith.constant 0 : i32
    %c0_i32_0 = arith.constant 0 : i32
    %c0_i32_1 = arith.constant 0 : i32
    return %c0_i32, %c0_i32_0 : i32, i32
  }
  func.func @transform_7(%arg0: i32) -> (i32, i32) {
    %c0_i32 = arith.constant 0 : i32
    %c0_i32_0 = arith.constant 0 : i32
    %c0_i32_1 = arith.constant 0 : i32
    return %c0_i32, %c0_i32_0 : i32, i32
  }
  func.func @transform_8(%arg0: i32) -> (i32, i32) {
    %c0_i32 = arith.constant 0 : i32
    %c0_i32_0 = arith.constant 0 : i32
    %c0_i32_1 = arith.constant 0 : i32
    return %c0_i32, %c0_i32_0 : i32, i32
  }
  func.func @transform_9(%arg0: i32) -> (i32, i32) {
    %c0_i32 = arith.constant 0 : i32
    %c0_i32_0 = arith.constant 0 : i32
    return %arg0, %c0_i32 : i32, i32
  }
}

</mosaic_0001>

<bundles_post_ra>
// kernel: autoencoder_forward.1
= control target key start
LH: loop header
LB: loop body
LE: loop exit
PB: predicated region body
PF: predicated region fallthrough
CT: control target
= control target key end

     0   :  { %s9707_s1 = inlined_call_operand.vmem [shape: bf16[896,128], index: 1, kind: input, shape index: {}]   ;;  %s9708_s0 = inlined_call_operand.vmem [shape: bf16[256,896], index: 0, kind: input, shape index: {}]   ;;  %s9709_s3 = inlined_call_operand.vmem [shape: bf16[128,128], index: 3, kind: input, shape index: {}]   ;;  %s9710_s2 = inlined_call_operand.vmem [shape: f32[1,128], index: 2, kind: input, shape index: {}]   ;;  %s9711_s5 = inlined_call_operand.vmem [shape: bf16[128,128], index: 5, kind: input, shape index: {}]   ;;  %s9712_s4 = inlined_call_operand.vmem [shape: f32[1,128], index: 4, kind: input, shape index: {}]   ;;  %s9713_s7 = inlined_call_operand.vmem [shape: bf16[128,896], index: 7, kind: input, shape index: {}]   ;;  %s9714_s6 = inlined_call_operand.vmem [shape: f32[1,128], index: 6, kind: input, shape index: {}]   ;;  %s9715_s8 = inlined_call_operand.vmem [shape: f32[1,896], index: 8, kind: input, shape index: {}]   ;;  %s9716_s9 = inlined_call_operand.vmem [shape: f32[256,896], index: 9, kind: output, shape index: {}]  }
   0x1   :  { %v5789_v0 = vld [vmem:[%s9707_s1 + $0x40] sm:$0xff]   ;;  %v5793_v4 = vld [vmem:[%s9707_s1 + $0x48] sm:$0xff]   ;;  %v5797_v8 = vld [vmem:[%s9707_s1 + $0x50] sm:$0xff]  }
   0x2   :  { %v5790_v1 = vld [vmem:[%s9707_s1] sm:$0xff]   ;;  %5164 = vmatprep.subr.bf16.mxu0 %v5789_v0  ;;  %v5794_v5 = vld [vmem:[%s9707_s1 + $0x8] sm:$0xff]   ;;  %v5798_v9 = vld [vmem:[%s9707_s1 + $0x10] sm:$0xff]  }
   0x3   :  { %v5791_v2 = vld [vmem:[%s9707_s1 + $0xc0] sm:$0xff]   ;;  %5165 = vmatpush3.bf16.msra.mxu0 %v5790_v1  ;;  %v5795_v6 = vld [vmem:[%s9707_s1 + $0xc8] sm:$0xff]   ;;  %v5799_v10 = vld [vmem:[%s9707_s1 + $0xd0] sm:$0xff]  }
   0x4   :  { %v5792_v3 = vld [vmem:[%s9707_s1 + $0x80] sm:$0xff]   ;;  %5276 = vmatprep.subr.bf16.mxu1 %v5791_v2  ;;  %5166 = vmatprep.subr.bf16.mxu0 %v5793_v4  ;;  %v5796_v7 = vld [vmem:[%s9707_s1 + $0x88] sm:$0xff]   ;;  %v5800_v11 = vld [vmem:[%s9707_s1 + $0x90] sm:$0xff]  }
   0x5   :  { %5277 = vmatpush3.bf16.msra.mxu1 %v5792_v3  ;;  %v5801_v12 = vld [vmem:[%s9707_s1 + $0x58] sm:$0xff]   ;;  %v5805_v16 = vld [vmem:[%s9707_s1 + $0x60] sm:$0xff]   ;;  %v5809_v20 = vld [vmem:[%s9707_s1 + $0x68] sm:$0xff]  }
   0x6   :  { %5278 = vmatprep.subr.bf16.mxu1 %v5795_v6  ;;  %v5802_v13 = vld [vmem:[%s9707_s1 + $0x18] sm:$0xff]   ;;  %v5806_v17 = vld [vmem:[%s9707_s1 + $0x20] sm:$0xff]   ;;  %v5810_v21 = vld [vmem:[%s9707_s1 + $0x28] sm:$0xff]  }
   0x7   :  { %5167 = vmatpush3.bf16.msra.mxu0 %v5794_v5  ;;  %v5803_v14 = vld [vmem:[%s9707_s1 + $0xd8] sm:$0xff]   ;;  %v5807_v18 = vld [vmem:[%s9707_s1 + $0xe0] sm:$0xff]   ;;  %v5811_v22 = vld [vmem:[%s9707_s1 + $0xe8] sm:$0xff]  }
   0x8   :  { %5168 = vmatprep.subr.bf16.mxu0 %v5797_v8  ;;  %v5804_v15 = vld [vmem:[%s9707_s1 + $0x98] sm:$0xff]   ;;  %v5808_v19 = vld [vmem:[%s9707_s1 + $0xa0] sm:$0xff]   ;;  %v5812_v23 = vld [vmem:[%s9707_s1 + $0xa8] sm:$0xff]  }
   0x9   :  { %5279 = vmatpush3.bf16.msra.mxu1 %v5796_v7  ;;  %v5813_v24 = vld [vmem:[%s9707_s1 + $0x70] sm:$0xff]   ;;  %v5817_v28 = vld [vmem:[%s9707_s1 + $0x78] sm:$0xff]   ;;  %v5822_v32 = vld [vmem:[%s9708_s0 + $0x4] ss:$28 sps:$4 sm:$0xff]  }
   0xa   :  { %5280 = vmatprep.subr.bf16.mxu1 %v5799_v10  ;;  %v5814_v25 = vld [vmem:[%s9707_s1 + $0x30] sm:$0xff]   ;;  %v5818_v29 = vld [vmem:[%s9707_s1 + $0x38] sm:$0xff]   ;;  %1224 = vmatprep.mubr.bf16.mxu0 %v5822_v32  ;;  %v5824_v34 = vld [vmem:[%s9707_s1 + $0x140] sm:$0xff]  }
   0xb   :  { %5169 = vmatpush3.bf16.msra.mxu0 %v5798_v9  ;;  %v5815_v26 = vld [vmem:[%s9707_s1 + $0xf0] sm:$0xff]   ;;  %v5819_v30 = vld [vmem:[%s9707_s1 + $0xf8] sm:$0xff]   ;;  %v5825_v35 = vld [vmem:[%s9708_s0 + $0x8] ss:$28 sps:$4 sm:$0xff]  }
   0xc   :  { %5170 = vmatprep.subr.bf16.mxu0 %v5801_v12  ;;  %v5816_v27 = vld [vmem:[%s9707_s1 + $0xb0] sm:$0xff]   ;;  %v5820_v31 = vld [vmem:[%s9708_s0] ss:$28 sps:$4 sm:$0xff]   ;;  %v5827_v36 = vld [vmem:[%s9708_s0 + $0xc] ss:$28 sps:$4 sm:$0xff]  }
   0xd   :  { %5281 = vmatpush3.bf16.msra.mxu1 %v5800_v11  ;;  %v5823_v33 = vld [vmem:[%s9707_s1 + $0xb8] sm:$0xff]   ;;  %v5828_v37 = vld [vmem:[%s9707_s1 + $0x100] sm:$0xff]   ;;  %1385 = vmatprep.mubr.bf16.mxu1 %v5827_v36  ;;  %v5836_v43 = vld [vmem:[%s9708_s0 + $0x74] ss:$28 sps:$4 sm:$0xff]  }
   0xe   :  { %5282 = vmatprep.subr.bf16.mxu1 %v5803_v14  ;;  %v5829_v38 = vld [vmem:[%s9708_s0 + $0x3c] ss:$28 sps:$4 sm:$0xff]   ;;  %v5832_v39 = vld [vmem:[%s9708_s0 + $0x44] ss:$28 sps:$4 sm:$0xff]   ;;  %v5839_v44 = vld [vmem:[%s9707_s1 + $0x148] sm:$0xff]  }
   0xf   :  { %5171 = vmatpush3.bf16.msra.mxu0 %v5802_v13  ;;  %v5831_v40 = vld [vmem:[%s9708_s0 + $0x38] ss:$28 sps:$4 sm:$0xff]   ;;  %v5835_v41 = vld [vmem:[%s9707_s1 + $0x180] sm:$0xff]   ;;  %v5842_v46 = vld [vmem:[%s9707_s1 + $0x108] sm:$0xff]  }
  0x10   :  { %5172 = vmatprep.subr.bf16.mxu0 %v5805_v16  ;;  %v5834_v42 = vld [vmem:[%s9708_s0 + $0x40] ss:$28 sps:$4 sm:$0xff]   ;;  %v5838_v47 = vld [vmem:[%s9708_s0 + $0x70] ss:$28 sps:$4 sm:$0xff]   ;;  %v5843_v50 = vld [vmem:[%s9708_s0 + $0x78] ss:$28 sps:$4 sm:$0xff]  }
  0x11   :  { %5283 = vmatpush3.bf16.msra.mxu1 %v5804_v15  ;;  %v5840_v45 = vld [vmem:[%s9708_s0 + $0x7c] ss:$28 sps:$4 sm:$0xff]   ;;  %v5844_v48 = vld [vmem:[%s9708_s0 + $0xac] ss:$28 sps:$4 sm:$0xff]   ;;  %v5854_v51 = vld [vmem:[%s9707_s1 + $0x150] sm:$0xff]  }
  0x12   :  { %5284 = vmatprep.subr.bf16.mxu1 %v5807_v18  ;;  %v5850_v49 = vld [vmem:[%s9707_s1 + $0x188] sm:$0xff]   ;;  %v5847_v52 = vld [vmem:[%s9708_s0 + $0xb4] ss:$28 sps:$4 sm:$0xff]   ;;  %v5851_v55 = vld [vmem:[%s9708_s0 + $0xe4] ss:$28 sps:$4 sm:$0xff]  }
  0x13   :  { %5173 = vmatpush3.bf16.msra.mxu0 %v5806_v17  ;;  %v5857_v53 = vld [vmem:[%s9707_s1 + $0x110] sm:$0xff]   ;;  %v5846_v54 = vld [vmem:[%s9708_s0 + $0xa8] ss:$28 sps:$4 sm:$0xff]   ;;  %v5869_v59 = vld [vmem:[%s9707_s1 + $0x158] sm:$0xff]  }
  0x14   :  { %5174 = vmatprep.subr.bf16.mxu0 %v5809_v20  ;;  %v5865_v56 = vld [vmem:[%s9707_s1 + $0x190] sm:$0xff]   ;;  %v5855_v58 = vld [vmem:[%s9708_s0 + $0xec] ss:$28 sps:$4 sm:$0xff]   ;;  %v5872_v60 = vld [vmem:[%s9707_s1 + $0x118] sm:$0xff]  }
  0x15   :  { %5285 = vmatpush3.bf16.msra.mxu1 %v5808_v19  ;;  %v5849_v57 = vld [vmem:[%s9708_s0 + $0xb0] ss:$28 sps:$4 sm:$0xff]   ;;  %v5853_v61 = vld [vmem:[%s9708_s0 + $0xe0] ss:$28 sps:$4 sm:$0xff]   ;;  %v5858_v0 = vld [vmem:[%s9708_s0 + $0xe8] ss:$28 sps:$4 sm:$0xff]  }
  0x16   :  { %5286 = vmatprep.subr.bf16.mxu1 %v5811_v22  ;;  %v5859_v62 = vld [vmem:[%s9708_s0 + $0x11c] ss:$28 sps:$4 sm:$0xff]   ;;  %v5862_v1 = vld [vmem:[%s9708_s0 + $0x124] ss:$28 sps:$4 sm:$0xff]   ;;  %v5866_v5 = vld [vmem:[%s9708_s0 + $0x154] ss:$28 sps:$4 sm:$0xff]  }
  0x17   :  { %5175 = vmatpush3.bf16.msra.mxu0 %v5810_v21  ;;  %v5880_v63 = vld [vmem:[%s9707_s1 + $0x198] sm:$0xff]   ;;  %v5884_v2 = vld [vmem:[%s9707_s1 + $0x160] sm:$0xff]   ;;  %v5899_v9 = vld [vmem:[%s9707_s1 + $0x168] sm:$0xff]  }
  0x18   :  { %5176 = vmatprep.subr.bf16.mxu0 %v5813_v24  ;;  %v5887_v3 = vld [vmem:[%s9707_s1 + $0x120] sm:$0xff]   ;;  %v5861_v4 = vld [vmem:[%s9708_s0 + $0x118] ss:$28 sps:$4 sm:$0xff]   ;;  %v5902_v10 = vld [vmem:[%s9707_s1 + $0x128] sm:$0xff]  }
  0x19   :  { %5287 = vmatpush3.bf16.msra.mxu1 %v5812_v23  ;;  %v5895_v6 = vld [vmem:[%s9707_s1 + $0x1a0] sm:$0xff]   ;;  %v5870_v8 = vld [vmem:[%s9708_s0 + $0x15c] ss:$28 sps:$4 sm:$0xff]   ;;  %v5868_v11 = vld [vmem:[%s9708_s0 + $0x150] ss:$28 sps:$4 sm:$0xff]  }
  0x1a   :  { %5288 = vmatprep.subr.bf16.mxu1 %v5815_v26  ;;  %v5864_v7 = vld [vmem:[%s9708_s0 + $0x120] ss:$28 sps:$4 sm:$0xff]   ;;  %v5874_v12 = vld [vmem:[%s9708_s0 + $0x18c] ss:$28 sps:$4 sm:$0xff]   ;;  %v5873_v14 = vld [vmem:[%s9708_s0 + $0x158] ss:$28 sps:$4 sm:$0xff]  }
  0x1b   :  { %5177 = vmatpush3.bf16.msra.mxu0 %v5814_v25  ;;  %v5910_v13 = vld [vmem:[%s9707_s1 + $0x1a8] sm:$0xff]   ;;  %v5877_v15 = vld [vmem:[%s9708_s0 + $0x194] ss:$28 sps:$4 sm:$0xff]   ;;  %v5881_v19 = vld [vmem:[%s9708_s0 + $0x1c4] ss:$28 sps:$4 sm:$0xff]  }
  0x1c   :  { %5178 = vmatprep.subr.bf16.mxu0 %v5817_v28  ;;  %v5914_v16 = vld [vmem:[%s9707_s1 + $0x170] sm:$0xff]   ;;  %v5876_v18 = vld [vmem:[%s9708_s0 + $0x188] ss:$28 sps:$4 sm:$0xff]   ;;  %v5929_v23 = vld [vmem:[%s9707_s1 + $0x178] sm:$0xff]  }
  0x1d   :  { %5289 = vmatpush3.bf16.msra.mxu1 %v5816_v27  ;;  %v5917_v17 = vld [vmem:[%s9707_s1 + $0x130] sm:$0xff]   ;;  %v5885_v22 = vld [vmem:[%s9708_s0 + $0x1cc] ss:$28 sps:$4 sm:$0xff]   ;;  %v5932_v24 = vld [vmem:[%s9707_s1 + $0x138] sm:$0xff]  }
  0x1e   :  { %5290 = vmatprep.subr.bf16.mxu1 %v5819_v30  ;;  %v5879_v20 = vld [vmem:[%s9708_s0 + $0x190] ss:$28 sps:$4 sm:$0xff]   ;;  %v5883_v25 = vld [vmem:[%s9708_s0 + $0x1c0] ss:$28 sps:$4 sm:$0xff]   ;;  %v5888_v27 = vld [vmem:[%s9708_s0 + $0x1c8] ss:$28 sps:$4 sm:$0xff]  }
  0x1f   :  { %5179 = vmatpush3.bf16.msra.mxu0 %v5818_v29  ;;  %v5925_v21 = vld [vmem:[%s9707_s1 + $0x1b0] sm:$0xff]   ;;  %v5889_v26 = vld [vmem:[%s9708_s0 + $0x1fc] ss:$28 sps:$4 sm:$0xff]   ;;  %v5892_v29 = vld [vmem:[%s9708_s0 + $0x204] ss:$28 sps:$4 sm:$0xff]  }
  0x20   :  { %5388 = vmatprep.subr.bf16.mxu0 %v5824_v34  ;;  %v5940_v28 = vld [vmem:[%s9707_s1 + $0x1b8] sm:$0xff]   ;;  %v5898_v34 = vld [vmem:[%s9708_s0 + $0x230] ss:$28 sps:$4 sm:$0xff]  }
  0x21   :  { %5291 = vmatpush3.bf16.msra.mxu1 %v5823_v33  ;;  %v5891_v30 = vld [vmem:[%s9708_s0 + $0x1f8] ss:$28 sps:$4 sm:$0xff]   ;;  %v5894_v32 = vld [vmem:[%s9708_s0 + $0x200] ss:$28 sps:$4 sm:$0xff]  }
  0x22   :  { %1225 = vmatmul.mubr.bf16.vlgmr.msra.gmra.mrb[0].mxu0 %v5820_v31  ;;  %5596 = vmatprep.subr.bf16.mxu1 %v5835_v41  ;;  %v5896_v31 = vld [vmem:[%s9708_s0 + $0x234] ss:$28 sps:$4 sm:$0xff]   ;;  %v5900_v33 = vld [vmem:[%s9708_s0 + $0x23c] ss:$28 sps:$4 sm:$0xff]  }
  0x23   :  { %5389 = vmatpush3.bf16.msra.mxu0 %v5828_v37  ;;  %1232 = vmatprep.mubr.bf16.mxu0 %v5829_v38  ;;  %v5903_v36 = vld [vmem:[%s9708_s0 + $0x238] ss:$28 sps:$4 sm:$0xff]   ;;  %v5906_v38 = vld [vmem:[%s9708_s0 + $0x268] ss:$28 sps:$4 sm:$0xff]  }
  0x24   :  { %1386 = vmatmul.mubr.bf16.vlgmr.msra.gmra.mrb[0].mxu1 %v5825_v35  ;;  %5390 = vmatprep.subr.bf16.mxu0 %v5839_v44  ;;  %v5904_v35 = vld [vmem:[%s9708_s0 + $0x26c] ss:$28 sps:$4 sm:$0xff]   ;;  %v5907_v37 = vld [vmem:[%s9708_s0 + $0x274] ss:$28 sps:$4 sm:$0xff]  }
  0x25   :  { %1393 = vmatprep.mubr.bf16.mxu1 %v5832_v39  ;;  %5597 = vmatpush3.bf16.msra.mxu1 %v5835_v41  ;;  %v5911_v39 = vld [vmem:[%s9708_s0 + $0x2a4] ss:$28 sps:$4 sm:$0xff]   ;;  %v5915_v41 = vld [vmem:[%s9708_s0 + $0x2ac] ss:$28 sps:$4 sm:$0xff]  }
  0x26   :  { %5598 = vmatprep.subr.bf16.mxu1 %v5850_v49  ;;  %v5918_v44 = vld [vmem:[%s9708_s0 + $0x2a8] ss:$28 sps:$4 sm:$0xff]  }
  0x27   :  { %5391 = vmatpush3.bf16.msra.mxu0 %v5842_v46  ;;  %v5921_v46 = vld [vmem:[%s9708_s0 + $0x2d8] ss:$28 sps:$4 sm:$0xff]  }
  0x28   :  { %5392 = vmatprep.subr.bf16.mxu0 %v5854_v51  ;;  %v5934_v51 = vld [vmem:[%s9708_s0 + $0x34c] ss:$28 sps:$4 sm:$0xff]  }
  0x29   :  { %5599 = vmatpush3.bf16.msra.mxu1 %v5850_v49  ;;  %v5930_v49 = vld [vmem:[%s9708_s0 + $0x31c] ss:$28 sps:$4 sm:$0xff]  }
  0x2a   :  { %1233 = vmatmul.mubr.bf16.gmra.mrb[4].mxu0 %v5831_v40  ;;  %5600 = vmatprep.subr.bf16.mxu1 %v5865_v56  ;;  %v5909_v40 = vld [vmem:[%s9708_s0 + $0x270] ss:$28 sps:$4 sm:$0xff]  }
  0x2b   :  { %1240 = vmatprep.mubr.bf16.mxu0 %v5836_v43  ;;  %5393 = vmatpush3.bf16.msra.mxu0 %v5857_v53  ;;  %v5919_v43 = vld [vmem:[%s9708_s0 + $0x2dc] ss:$28 sps:$4 sm:$0xff]   ;;  %v5937_v53 = vld [vmem:[%s9708_s0 + $0x354] ss:$28 sps:$4 sm:$0xff]  }
  0x2c   :  { %1394 = vmatmul.mubr.bf16.gmra.mrb[4].mxu1 %v5834_v42  ;;  %5394 = vmatprep.subr.bf16.mxu0 %v5869_v59  ;;  %v5913_v42 = vld [vmem:[%s9708_s0 + $0x2a0] ss:$28 sps:$4 sm:$0xff]   ;;  %v5946_v59 = vld [vmem:[%s9708_s0 + $0x4c] ss:$28 sps:$4 sm:$0xff]  }
  0x2d   :  { %1401 = vmatprep.mubr.bf16.mxu1 %v5840_v45  ;;  %5601 = vmatpush3.bf16.msra.mxu1 %v5865_v56  ;;  %v5922_v45 = vld [vmem:[%s9708_s0 + $0x2e4] ss:$28 sps:$4 sm:$0xff]   ;;  %v5939_v56 = vld [vmem:[%s9708_s0 + $0x350] ss:$28 sps:$4 sm:$0xff]  }
  0x2e   :  { %5602 = vmatprep.subr.bf16.mxu1 %v5880_v63 }
  0x2f   :  { %5395 = vmatpush3.bf16.msra.mxu0 %v5872_v60  ;;  %v5945_v60 = vld [vmem:[%s9708_s0 + $0x50] ss:$28 sps:$4 sm:$0xff]  }
  0x30   :  { %5396 = vmatprep.subr.bf16.mxu0 %v5884_v2  ;;  %v5951_v2 = vld [vmem:[%s9708_s0 + $0x80] ss:$28 sps:$4 sm:$0xff]  }
  0x31   :  { %5603 = vmatpush3.bf16.msra.mxu1 %v5880_v63  ;;  %v5949_v63 = vld [vmem:[%s9708_s0 + $0x84] ss:$28 sps:$4 sm:$0xff]  }
  0x32   :  { %1241 = vmatmul.mubr.bf16.gmra.mrb[8].mxu0 %v5838_v47  ;;  %5604 = vmatprep.subr.bf16.mxu1 %v5895_v6  ;;  %v5926_v47 = vld [vmem:[%s9708_s0 + $0x314] ss:$28 sps:$4 sm:$0xff]  }
  0x33   :  { %1248 = vmatprep.mubr.bf16.mxu0 %v5844_v48  ;;  %5397 = vmatpush3.bf16.msra.mxu0 %v5887_v3  ;;  %v5924_v48 = vld [vmem:[%s9708_s0 + $0x2e0] ss:$28 sps:$4 sm:$0xff]  }
  0x34   :  { %1402 = vmatmul.mubr.bf16.gmra.mrb[8].mxu1 %v5843_v50  ;;  %5398 = vmatprep.subr.bf16.mxu0 %v5899_v9  ;;  %v5928_v50 = vld [vmem:[%s9708_s0 + $0x310] ss:$28 sps:$4 sm:$0xff]   ;;  %v5954_v3 = vld [vmem:[%s9708_s0 + $0xbc] ss:$28 sps:$4 sm:$0xff]  }
  0x35   :  { %1409 = vmatprep.mubr.bf16.mxu1 %v5847_v52  ;;  %5605 = vmatpush3.bf16.msra.mxu1 %v5895_v6  ;;  %v5933_v52 = vld [vmem:[%s9708_s0 + $0x318] ss:$28 sps:$4 sm:$0xff]  }
  0x36   :  { %5606 = vmatprep.subr.bf16.mxu1 %v5910_v13  ;;  %v5956_v6 = vld [vmem:[%s9708_s0 + $0xb8] ss:$28 sps:$4 sm:$0xff]  }
  0x37   :  { %5399 = vmatpush3.bf16.msra.mxu0 %v5902_v10  ;;  %v5976_v9 = vld [vmem:[%s9708_s0 + $0x1d8] ss:$28 sps:$4 sm:$0xff]   ;;  %v5959_v10 = vld [vmem:[%s9708_s0 + $0xf0] ss:$28 sps:$4 sm:$0xff]  }
  0x38   :  { %5400 = vmatprep.subr.bf16.mxu0 %v5914_v16  ;;  %v5985_v16 = vld [vmem:[%s9708_s0 + $0x280] ss:$28 sps:$4 sm:$0xff]  }
  0x39   :  { %5607 = vmatpush3.bf16.msra.mxu1 %v5910_v13  ;;  %v5984_v13 = vld [vmem:[%s9708_s0 + $0x248] ss:$28 sps:$4 sm:$0xff]  }
  0x3a   :  { %1249 = vmatmul.mubr.bf16.gmra.mrb[12].mxu0 %v5846_v54  ;;  %5608 = vmatprep.subr.bf16.mxu1 %v5925_v21  ;;  %v5936_v54 = vld [vmem:[%s9708_s0 + $0x348] ss:$28 sps:$4 sm:$0xff]  }
  0x3b   :  { %1256 = vmatprep.mubr.bf16.mxu0 %v5851_v55  ;;  %5401 = vmatpush3.bf16.msra.mxu0 %v5917_v17  ;;  %v5943_v55 = vld [vmem:[%s9708_s0 + $0x14] ss:$28 sps:$4 sm:$0xff]  }
  0x3c   :  { %1410 = vmatmul.mubr.bf16.gmra.mrb[12].mxu1 %v5849_v57  ;;  %5402 = vmatprep.subr.bf16.mxu0 %v5929_v23  ;;  %v5944_v57 = vld [vmem:[%s9708_s0 + $0x18] ss:$28 sps:$4 sm:$0xff]  }
  0x3d   :  { %1417 = vmatprep.mubr.bf16.mxu1 %v5855_v58  ;;  %5609 = vmatpush3.bf16.msra.mxu1 %v5925_v21  ;;  %v5941_v58 = vld [vmem:[%s9708_s0 + $0x10] ss:$28 sps:$4 sm:$0xff]   ;;  %v5992_v17 = vld [vmem:[%s9708_s0 + $0x2b8] ss:$28 sps:$4 sm:$0xff]   ;;  %v6005_v21 = vld [vmem:[%s9709_s3] sm:$0xff]  }
  0x3e   :  { %5610 = vmatprep.subr.bf16.mxu1 %v5940_v28  ;;  %v5972_v23 = vld [vmem:[%s9708_s0 + $0x198] ss:$28 sps:$4 sm:$0xff]  }
  0x3f   :  { %5403 = vmatpush3.bf16.msra.mxu0 %v5932_v24  ;;  %v6006_v24 = vld [vmem:[%s9709_s3 + $0x8] sm:$0xff]  }
  0x41   :  { %5611 = vmatpush3.bf16.msra.mxu1 %v5940_v28  ;;  %v6007_v28 = vld [vmem:[%s9709_s3 + $0x10] sm:$0xff]  }
  0x42   :  { %1257 = vmatmul.mubr.bf16.gmra.mrb[16].mxu0 %v5853_v61  ;;  %v5952_v61 = vld [vmem:[%s9708_s0 + $0x88] ss:$28 sps:$4 sm:$0xff]   ;;  %5644 = vmatprep.subr.bf16.mxu1 %v6005_v21 }
  0x43   :  { %1264 = vmatprep.mubr.bf16.mxu0 %v5859_v62  ;;  %v5948_v62 = vld [vmem:[%s9708_s0 + $0x48] ss:$28 sps:$4 sm:$0xff]  }
  0x44   :  { %1418 = vmatmul.mubr.bf16.gmra.mrb[16].mxu1 %v5858_v0  ;;  %v5953_v0 = vld [vmem:[%s9708_s0 + $0xc0] ss:$28 sps:$4 sm:$0xff]  }
  0x45   :  { %1425 = vmatprep.mubr.bf16.mxu1 %v5862_v1  ;;  %v5960_v1 = vld [vmem:[%s9708_s0 + $0xf8] ss:$28 sps:$4 sm:$0xff]  }
  0x4a   :  { %1265 = vmatmul.mubr.bf16.gmra.mrb[20].mxu0 %v5861_v4  ;;  %v5961_v4 = vld [vmem:[%s9708_s0 + $0x130] ss:$28 sps:$4 sm:$0xff]  }
  0x4b   :  { %1272 = vmatprep.mubr.bf16.mxu0 %v5866_v5  ;;  %v5968_v5 = vld [vmem:[%s9708_s0 + $0x168] ss:$28 sps:$4 sm:$0xff]  }
  0x4c   :  { %1426 = vmatmul.mubr.bf16.gmra.mrb[20].mxu1 %v5864_v7  ;;  %v5957_v7 = vld [vmem:[%s9708_s0 + $0xf4] ss:$28 sps:$4 sm:$0xff]  }
  0x4d   :  { %1433 = vmatprep.mubr.bf16.mxu1 %v5870_v8  ;;  %v5969_v8 = vld [vmem:[%s9708_s0 + $0x1a0] ss:$28 sps:$4 sm:$0xff]  }
  0x52   :  { %1273 = vmatmul.mubr.bf16.gmra.mrb[24].mxu0 %v5868_v11  ;;  %v5962_v11 = vld [vmem:[%s9708_s0 + $0x12c] ss:$28 sps:$4 sm:$0xff]  }
  0x53   :  { %1280 = vmatprep.mubr.bf16.mxu0 %v5874_v12  ;;  %v5977_v12 = vld [vmem:[%s9708_s0 + $0x210] ss:$28 sps:$4 sm:$0xff]  }
  0x54   :  { %1434 = vmatmul.mubr.bf16.gmra.mrb[24].mxu1 %v5873_v14  ;;  %v5964_v14 = vld [vmem:[%s9708_s0 + $0x128] ss:$28 sps:$4 sm:$0xff]  }
  0x55   :  { %1441 = vmatprep.mubr.bf16.mxu1 %v5877_v15  ;;  %v5965_v15 = vld [vmem:[%s9708_s0 + $0x164] ss:$28 sps:$4 sm:$0xff]  }
  0x5a   :  { %1281 = vmatmul.mubr.bf16.gmra.mrb[28].mxu0 %v5876_v18  ;;  %v5967_v18 = vld [vmem:[%s9708_s0 + $0x160] ss:$28 sps:$4 sm:$0xff]  }
  0x5b   :  { %1288 = vmatprep.mubr.bf16.mxu0 %v5881_v19  ;;  %v5970_v19 = vld [vmem:[%s9708_s0 + $0x19c] ss:$28 sps:$4 sm:$0xff]  }
  0x5c   :  { %1442 = vmatmul.mubr.bf16.gmra.mrb[28].mxu1 %v5879_v20  ;;  %v5993_v20 = vld [vmem:[%s9708_s0 + $0x2f0] ss:$28 sps:$4 sm:$0xff]  }
  0x5d   :  { %1449 = vmatprep.mubr.bf16.mxu1 %v5885_v22  ;;  %v6000_v22 = vld [vmem:[%s9708_s0 + $0x328] ss:$28 sps:$4 sm:$0xff]  }
  0x62   :  { %1289 = vmatmul.mubr.bf16.gmra.mrb[32].mxu0 %v5883_v25  ;;  %v5973_v25 = vld [vmem:[%s9708_s0 + $0x1d4] ss:$28 sps:$4 sm:$0xff]  }
  0x63   :  { %1296 = vmatprep.mubr.bf16.mxu0 %v5889_v26  ;;  %v6001_v26 = vld [vmem:[%s9708_s0 + $0x360] ss:$28 sps:$4 sm:$0xff]  }
  0x64   :  { %1450 = vmatmul.mubr.bf16.gmra.mrb[32].mxu1 %v5888_v27  ;;  %v5975_v27 = vld [vmem:[%s9708_s0 + $0x1d0] ss:$28 sps:$4 sm:$0xff]  }
  0x65   :  { %1457 = vmatprep.mubr.bf16.mxu1 %v5892_v29  ;;  %v5978_v29 = vld [vmem:[%s9708_s0 + $0x20c] ss:$28 sps:$4 sm:$0xff]  }
  0x6a   :  { %1297 = vmatmul.mubr.bf16.gmra.mrb[36].mxu0 %v5891_v30  ;;  %v5980_v30 = vld [vmem:[%s9708_s0 + $0x208] ss:$28 sps:$4 sm:$0xff]  }
  0x6b   :  { %1304 = vmatprep.mubr.bf16.mxu0 %v5896_v31  ;;  %v6008_v31 = vld [vmem:[%s9709_s3 + $0x18] sm:$0xff]  }
  0x6c   :  { %1458 = vmatmul.mubr.bf16.gmra.mrb[36].mxu1 %v5894_v32  ;;  %v5981_v32 = vld [vmem:[%s9708_s0 + $0x244] ss:$28 sps:$4 sm:$0xff]  }
  0x6d   :  { %1465 = vmatprep.mubr.bf16.mxu1 %v5900_v33  ;;  %v5983_v33 = vld [vmem:[%s9708_s0 + $0x240] ss:$28 sps:$4 sm:$0xff]  }
  0x72   :  { %1305 = vmatmul.mubr.bf16.gmra.mrb[40].mxu0 %v5898_v34  ;;  %v6009_v34 = vld [vmem:[%s9709_s3 + $0x20] sm:$0xff]  }
  0x73   :  { %1312 = vmatprep.mubr.bf16.mxu0 %v5904_v35  ;;  %v5986_v35 = vld [vmem:[%s9708_s0 + $0x27c] ss:$28 sps:$4 sm:$0xff]  }
  0x74   :  { %1466 = vmatmul.mubr.bf16.gmra.mrb[40].mxu1 %v5903_v36 }
  0x75   :  { %1473 = vmatprep.mubr.bf16.mxu1 %v5907_v37  ;;  %v7544_v37 = vld [vmem:[%s9710_s2] ss:$0 sm:$0xff] }
  0x7a   :  { %1313 = vmatmul.mubr.bf16.gmra.mrb[44].mxu0 %v5906_v38 }
  0x7b   :  { %1320 = vmatprep.mubr.bf16.mxu0 %v5911_v39  ;;  %v5988_v39 = vld [vmem:[%s9708_s0 + $0x278] ss:$28 sps:$4 sm:$0xff]  }
  0x7c   :  { %1474 = vmatmul.mubr.bf16.gmra.mrb[44].mxu1 %v5909_v40  ;;  %v6010_v40 = vld [vmem:[%s9709_s3 + $0x28] sm:$0xff]  }
  0x7d   :  { %1481 = vmatprep.mubr.bf16.mxu1 %v5915_v41 }
  0x82   :  { %1321 = vmatmul.mubr.bf16.gmra.mrb[48].mxu0 %v5913_v42 }
  0x83   :  { %1328 = vmatprep.mubr.bf16.mxu0 %v5919_v43  ;;  %v5989_v43 = vld [vmem:[%s9708_s0 + $0x2b4] ss:$28 sps:$4 sm:$0xff]  }
  0x84   :  { %1482 = vmatmul.mubr.bf16.gmra.mrb[48].mxu1 %v5918_v44 }
  0x85   :  { %1489 = vmatprep.mubr.bf16.mxu1 %v5922_v45 }
  0x8a   :  { %1329 = vmatmul.mubr.bf16.gmra.mrb[52].mxu0 %v5921_v46 }
  0x8b   :  { %1336 = vmatprep.mubr.bf16.mxu0 %v5926_v47 }
  0x8c   :  { %1490 = vmatmul.mubr.bf16.gmra.mrb[52].mxu1 %v5924_v48 }
  0x8d   :  { %1497 = vmatprep.mubr.bf16.mxu1 %v5930_v49 }
  0x92   :  { %1337 = vmatmul.mubr.bf16.gmra.mrb[56].mxu0 %v5928_v50 }
  0x93   :  { %1344 = vmatprep.mubr.bf16.mxu0 %v5934_v51 }
  0x94   :  { %1498 = vmatmul.mubr.bf16.gmra.mrb[56].mxu1 %v5933_v52 }
  0x95   :  { %1505 = vmatprep.mubr.bf16.mxu1 %v5937_v53 }
  0x9a   :  { %1345 = vmatmul.mubr.bf16.gmra.mrb[60].mxu0 %v5936_v54 }
  0x9b   :  { %1546 = vmatprep.mubr.bf16.mxu0 %v5943_v55 }
  0x9c   :  { %1506 = vmatmul.mubr.bf16.gmra.mrb[60].mxu1 %v5939_v56  ;;  %v6011_v56 = vld [vmem:[%s9709_s3 + $0x30] sm:$0xff]  }
  0x9d   :  { %5612 = vmatprep.mubr.bf16.mxu1 %v5944_v57 }
  0xa2   :  { %1547 = vmatmul.mubr.bf16.vlgmr.msra.gmra.mrb[64].mxu0 %v5941_v58 }
  0xa3   :  { %1554 = vmatprep.mubr.bf16.mxu0 %v5946_v59  ;;  %v5991_v59 = vld [vmem:[%s9708_s0 + $0x2b0] ss:$28 sps:$4 sm:$0xff]  }
  0xa4   :  { %5613 = vmatmul.mubr.bf16.vlgmr.msra.gmra.mrb[64].mxu1 %v5945_v60 }
  0xa5   :  { %5616 = vmatprep.mubr.bf16.mxu1 %v5952_v61  ;;  %5645 = vmatpush3.bf16.msra.mxu1 %v6005_v21 }
  0xa6   :  { %5646 = vmatprep.subr.bf16.mxu1 %v6006_v24 }
  0xa9   :  { %5647 = vmatpush3.bf16.msra.mxu1 %v6006_v24 }
  0xaa   :  { %1555 = vmatmul.mubr.bf16.gmra.mrb[68].mxu0 %v5948_v62  ;;  %5648 = vmatprep.subr.bf16.mxu1 %v6007_v28  ;;  %v5994_v62 = vld [vmem:[%s9708_s0 + $0x2ec] ss:$28 sps:$4 sm:$0xff]  }
  0xab   :  { %1562 = vmatprep.mubr.bf16.mxu0 %v5949_v63 }
  0xac   :  { %5617 = vmatmul.mubr.bf16.gmra.mrb[68].mxu1 %v5953_v0 }
  0xad   :  { %5620 = vmatprep.mubr.bf16.mxu1 %v5960_v1  ;;  %5649 = vmatpush3.bf16.msra.mxu1 %v6007_v28 }
  0xae   :  { %5650 = vmatprep.subr.bf16.mxu1 %v6008_v31 }
  0xb1   :  { %5651 = vmatpush3.bf16.msra.mxu1 %v6008_v31 }
  0xb2   :  { %1563 = vmatmul.mubr.bf16.gmra.mrb[72].mxu0 %v5951_v2  ;;  %5652 = vmatprep.subr.bf16.mxu1 %v6009_v34 }
  0xb3   :  { %1570 = vmatprep.mubr.bf16.mxu0 %v5954_v3 }
  0xb4   :  { %5621 = vmatmul.mubr.bf16.gmra.mrb[72].mxu1 %v5961_v4 }
  0xb5   :  { %5624 = vmatprep.mubr.bf16.mxu1 %v5968_v5  ;;  %5653 = vmatpush3.bf16.msra.mxu1 %v6009_v34 }
  0xb6   :  { %5654 = vmatprep.subr.bf16.mxu1 %v6010_v40 }
  0xb9   :  { %5655 = vmatpush3.bf16.msra.mxu1 %v6010_v40 }
  0xba   :  { %1571 = vmatmul.mubr.bf16.gmra.mrb[76].mxu0 %v5956_v6  ;;  %5656 = vmatprep.subr.bf16.mxu1 %v6011_v56 }
  0xbb   :  { %1578 = vmatprep.mubr.bf16.mxu0 %v5957_v7 }
  0xbc   :  { %5625 = vmatmul.mubr.bf16.gmra.mrb[76].mxu1 %v5969_v8 }
  0xbd   :  { %5628 = vmatprep.mubr.bf16.mxu1 %v5976_v9  ;;  %5657 = vmatpush3.bf16.msra.mxu1 %v6011_v56 }
  0xc2   :  { %1579 = vmatmul.mubr.bf16.gmra.mrb[80].mxu0 %v5959_v10 }
  0xc3   :  { %1586 = vmatprep.mubr.bf16.mxu0 %v5962_v11 }
  0xc4   :  { %5629 = vmatmul.mubr.bf16.gmra.mrb[80].mxu1 %v5977_v12 }
  0xc5   :  { %5632 = vmatprep.mubr.bf16.mxu1 %v5984_v13  ;;  %v5996_v13 = vld [vmem:[%s9708_s0 + $0x2e8] ss:$28 sps:$4 sm:$0xff]  }
  0xca   :  { %1587 = vmatmul.mubr.bf16.gmra.mrb[84].mxu0 %v5964_v14  ;;  %v6012_v14 = vld [vmem:[%s9709_s3 + $0x38] sm:$0xff]  }
  0xcb   :  { %1594 = vmatprep.mubr.bf16.mxu0 %v5965_v15  ;;  %5658 = vmatprep.subr.bf16.mxu1 %v6012_v14 }
  0xcc   :  { %5633 = vmatmul.mubr.bf16.gmra.mrb[84].mxu1 %v5985_v16 }
  0xcd   :  { %5636 = vmatprep.mubr.bf16.mxu1 %v5992_v17  ;;  %v5997_v17 = vld [vmem:[%s9708_s0 + $0x324] ss:$28 sps:$4 sm:$0xff]   ;;  %5659 = vmatpush3.bf16.msra.mxu1 %v6012_v14 }
  0xd2   :  { %1595 = vmatmul.mubr.bf16.gmra.mrb[88].mxu0 %v5967_v18 }
  0xd3   :  { %1602 = vmatprep.mubr.bf16.mxu0 %v5970_v19 }
  0xd4   :  { %5637 = vmatmul.mubr.bf16.gmra.mrb[88].mxu1 %v5993_v20 }
  0xd5   :  { %5640 = vmatprep.mubr.bf16.mxu1 %v6000_v22 }
  0xda   :  { %1603 = vmatmul.mubr.bf16.gmra.mrb[92].mxu0 %v5972_v23 }
  0xdb   :  { %1610 = vmatprep.mubr.bf16.mxu0 %v5973_v25 }
  0xdc   :  { %5641 = vmatmul.mubr.bf16.gmra.mrb[92].mxu1 %v6001_v26 }
  0xe2   :  { %1611 = vmatmul.mubr.bf16.gmra.mrb[96].mxu0 %v5975_v27 }
  0xe3   :  { %1618 = vmatprep.mubr.bf16.mxu0 %v5978_v29 }
  0xea   :  { %1619 = vmatmul.mubr.bf16.gmra.mrb[100].mxu0 %v5980_v30 }
  0xeb   :  { %1626 = vmatprep.mubr.bf16.mxu0 %v5981_v32  ;;  %v5999_v32 = vld [vmem:[%s9708_s0 + $0x320] ss:$28 sps:$4 sm:$0xff]  }
  0xf2   :  { %1627 = vmatmul.mubr.bf16.gmra.mrb[104].mxu0 %v5983_v33 }
  0xf3   :  { %1634 = vmatprep.mubr.bf16.mxu0 %v5986_v35  ;;  %v6002_v35 = vld [vmem:[%s9708_s0 + $0x35c] ss:$28 sps:$4 sm:$0xff]  }
  0xf5   :  { %v5180_v36 = vpop.f32.mrb[0].mxu0 }
  0xf6   :  { %v5181_v38 = vpop.f32.mrb[1].mxu0 }
  0xf7   :  { %v5182_v41 = vadd.f32 %v5181_v38, %v5180_v36  ;;  %v5183_v42 = vpop.f32.mrb[2].mxu0  ;;  %v5292_v44 = vpop.f32.mrb[0].mxu1 }
  0xf8   :  { %v5184_v45 = vpop.f32.mrb[3].mxu0  ;;  %v5293_v48 = vpop.f32.mrb[1].mxu1 }
  0xf9   :  { %v1227_v46 = vadd.f32 %v5182_v41, %v7544_v37  ;;  %v5185_v47 = vadd.f32 %v5184_v45, %v5183_v42  ;;  %v5294_v49 = vadd.f32 %v5293_v48, %v5292_v44  ;;  %v5295_v50 = vpop.f32.mrb[2].mxu1 }
  0xfa   :  { %1635 = vmatmul.mubr.bf16.gmra.mrb[108].mxu0 %v5988_v39  ;;  %v5296_v52 = vpop.f32.mrb[3].mxu1 }
  0xfb   :  { %v1230_v51 = vadd.f32 %v5185_v47, %v7544_v37  ;;  %1642 = vmatprep.mubr.bf16.mxu0 %v5989_v43  ;;  %v7557_v53 = vadd.f32 %v5294_v49, %v1227_v46  ;;  %v5297_v54 = vadd.f32 %v5296_v52, %v5295_v50 }
  0xfd   :  { %v5186_v55 = vpop.f32.mrb[4].mxu0  ;;  %v7562_v57 = vadd.f32 %v5297_v54, %v1230_v51  ;;  %v6004_v51 = vld [vmem:[%s9708_s0 + $0x358] ss:$28 sps:$4 sm:$0xff]  }
  0xfe   :  { %v5187_v58 = vpop.f32.mrb[5].mxu0 }
  0xff   :  { %v5188_v60 = vadd.f32 %v5187_v58, %v5186_v55  ;;  %v5189_v61 = vpop.f32.mrb[6].mxu0  ;;  %v5298_v63 = vpop.f32.mrb[4].mxu1 }
 0x100   :  { %v5190_v0 = vpop.f32.mrb[7].mxu0  ;;  %v5299_v3 = vpop.f32.mrb[5].mxu1 }
 0x101   :  { %v1235_v1 = vadd.f32 %v5188_v60, %v7544_v37  ;;  %v5191_v2 = vadd.f32 %v5190_v0, %v5189_v61  ;;  %v5300_v4 = vadd.f32 %v5299_v3, %v5298_v63  ;;  %v5301_v5 = vpop.f32.mrb[6].mxu1 }
 0x102   :  { %1643 = vmatmul.mubr.bf16.gmra.mrb[112].mxu0 %v5991_v59  ;;  %v5302_v7 = vpop.f32.mrb[7].mxu1 }
 0x103   :  { %v1238_v6 = vadd.f32 %v5191_v2, %v7544_v37  ;;  %1650 = vmatprep.mubr.bf16.mxu0 %v5994_v62  ;;  %v7572_v8 = vadd.f32 %v5300_v4, %v1235_v1  ;;  %v5303_v9 = vadd.f32 %v5302_v7, %v5301_v5 }
 0x105   :  { %v5192_v10 = vpop.f32.mrb[8].mxu0  ;;  %v7574_v11 = vadd.f32 %v5303_v9, %v1238_v6 }
 0x106   :  { %v5193_v12 = vpop.f32.mrb[9].mxu0 }
 0x107   :  { %v5194_v15 = vadd.f32 %v5193_v12, %v5192_v10  ;;  %v5195_v16 = vpop.f32.mrb[10].mxu0  ;;  %v5304_v18 = vpop.f32.mrb[8].mxu1 }
 0x108   :  { %v5196_v19 = vpop.f32.mrb[11].mxu0  ;;  %v5305_v22 = vpop.f32.mrb[9].mxu1 }
 0x109   :  { %v1243_v20 = vadd.f32 %v5194_v15, %v7544_v37  ;;  %v5197_v21 = vadd.f32 %v5196_v19, %v5195_v16  ;;  %v5306_v23 = vadd.f32 %v5305_v22, %v5304_v18  ;;  %v5307_v24 = vpop.f32.mrb[10].mxu1 }
 0x10a   :  { %1651 = vmatmul.mubr.bf16.gmra.mrb[116].mxu0 %v5996_v13  ;;  %v5308_v26 = vpop.f32.mrb[11].mxu1 }
 0x10b   :  { %v1246_v25 = vadd.f32 %v5197_v21, %v7544_v37  ;;  %1658 = vmatprep.mubr.bf16.mxu0 %v5997_v17  ;;  %v7587_v27 = vadd.f32 %v5306_v23, %v1243_v20  ;;  %v5309_v28 = vadd.f32 %v5308_v26, %v5307_v24 }
 0x10d   :  { %v5198_v29 = vpop.f32.mrb[12].mxu0  ;;  %v7589_v30 = vadd.f32 %v5309_v28, %v1246_v25 }
 0x10e   :  { %v5199_v31 = vpop.f32.mrb[13].mxu0 }
 0x10f   :  { %v5200_v33 = vadd.f32 %v5199_v31, %v5198_v29  ;;  %v5201_v34 = vpop.f32.mrb[14].mxu0  ;;  %v5310_v36 = vpop.f32.mrb[12].mxu1 }
 0x110   :  { %v5202_v38 = vpop.f32.mrb[15].mxu0  ;;  %v5311_v41 = vpop.f32.mrb[13].mxu1 }
 0x111   :  { %v1251_v39 = vadd.f32 %v5200_v33, %v7544_v37  ;;  %v5203_v40 = vadd.f32 %v5202_v38, %v5201_v34  ;;  %v5312_v42 = vadd.f32 %v5311_v41, %v5310_v36  ;;  %v5313_v43 = vpop.f32.mrb[14].mxu1 }
 0x112   :  { %1659 = vmatmul.mubr.bf16.gmra.mrb[120].mxu0 %v5999_v32  ;;  %v5314_v45 = vpop.f32.mrb[15].mxu1 }
 0x113   :  { %v1254_v44 = vadd.f32 %v5203_v40, %v7544_v37  ;;  %1666 = vmatprep.mubr.bf16.mxu0 %v6002_v35  ;;  %v7599_v46 = vadd.f32 %v5312_v42, %v1251_v39  ;;  %v5315_v47 = vadd.f32 %v5314_v45, %v5313_v43 }
 0x115   :  { %v5204_v48 = vpop.f32.mrb[16].mxu0  ;;  %v7601_v49 = vadd.f32 %v5315_v47, %v1254_v44 }
 0x116   :  { %v5205_v50 = vpop.f32.mrb[17].mxu0 }
 0x117   :  { %v5206_v52 = vadd.f32 %v5205_v50, %v5204_v48  ;;  %v5207_v54 = vpop.f32.mrb[18].mxu0  ;;  %v5316_v55 = vpop.f32.mrb[16].mxu1 }
 0x118   :  { %v5208_v56 = vpop.f32.mrb[19].mxu0  ;;  %v5317_v60 = vpop.f32.mrb[17].mxu1 }
 0x119   :  { %v1259_v58 = vadd.f32 %v5206_v52, %v7544_v37  ;;  %v5209_v59 = vadd.f32 %v5208_v56, %v5207_v54  ;;  %v5318_v61 = vadd.f32 %v5317_v60, %v5316_v55  ;;  %v5319_v62 = vpop.f32.mrb[18].mxu1 }
 0x11a   :  { %1667 = vmatmul.mubr.bf16.gmra.mrb[124].mxu0 %v6004_v51  ;;  %v5320_v0 = vpop.f32.mrb[19].mxu1 }
 0x11b   :  { %v1262_v63 = vadd.f32 %v5209_v59, %v7544_v37  ;;  %v7608_v1 = vadd.f32 %v5318_v61, %v1259_v58  ;;  %v5321_v2 = vadd.f32 %v5320_v0, %v5319_v62 }
 0x11d   :  { %v5210_v3 = vpop.f32.mrb[20].mxu0  ;;  %v7610_v4 = vadd.f32 %v5321_v2, %v1262_v63 }
 0x11e   :  { %v5211_v5 = vpop.f32.mrb[21].mxu0 }
 0x11f   :  { %v5212_v6 = vadd.f32 %v5211_v5, %v5210_v3  ;;  %v5213_v7 = vpop.f32.mrb[22].mxu0  ;;  %v5322_v9 = vpop.f32.mrb[20].mxu1 }
 0x120   :  { %v5214_v10 = vpop.f32.mrb[23].mxu0  ;;  %v5323_v14 = vpop.f32.mrb[21].mxu1 }
 0x121   :  { %v1267_v12 = vadd.f32 %v5212_v6, %v7544_v37  ;;  %v5215_v13 = vadd.f32 %v5214_v10, %v5213_v7  ;;  %v5324_v15 = vadd.f32 %v5323_v14, %v5322_v9  ;;  %v5325_v16 = vpop.f32.mrb[22].mxu1 }
 0x122   :  { %v5326_v18 = vpop.f32.mrb[23].mxu1 }
 0x123   :  { %v1270_v17 = vadd.f32 %v5215_v13, %v7544_v37  ;;  %v7614_v19 = vadd.f32 %v5324_v15, %v1267_v12  ;;  %v5327_v20 = vadd.f32 %v5326_v18, %v5325_v16 }
 0x125   :  { %v5216_v21 = vpop.f32.mrb[24].mxu0  ;;  %v7616_v22 = vadd.f32 %v5327_v20, %v1270_v17 }
 0x126   :  { %v5217_v23 = vpop.f32.mrb[25].mxu0 }
 0x127   :  { %v5218_v24 = vadd.f32 %v5217_v23, %v5216_v21  ;;  %v5219_v25 = vpop.f32.mrb[26].mxu0  ;;  %v5328_v26 = vpop.f32.mrb[24].mxu1 }
 0x128   :  { %v5220_v28 = vpop.f32.mrb[27].mxu0  ;;  %v5329_v32 = vpop.f32.mrb[25].mxu1 }
 0x129   :  { %v1275_v29 = vadd.f32 %v5218_v24, %v7544_v37  ;;  %v5221_v31 = vadd.f32 %v5220_v28, %v5219_v25  ;;  %v5330_v33 = vadd.f32 %v5329_v32, %v5328_v26  ;;  %v5331_v34 = vpop.f32.mrb[26].mxu1 }
 0x12a   :  { %v5332_v36 = vpop.f32.mrb[27].mxu1 }
 0x12b   :  { %v1278_v35 = vadd.f32 %v5221_v31, %v7544_v37  ;;  %v7620_v38 = vadd.f32 %v5330_v33, %v1275_v29  ;;  %v5333_v39 = vadd.f32 %v5332_v36, %v5331_v34 }
 0x12d   :  { %v5222_v40 = vpop.f32.mrb[28].mxu0  ;;  %v7622_v41 = vadd.f32 %v5333_v39, %v1278_v35 }
 0x12e   :  { %v5223_v42 = vpop.f32.mrb[29].mxu0 }
 0x12f   :  { %v5224_v43 = vadd.f32 %v5223_v42, %v5222_v40  ;;  %v5225_v44 = vpop.f32.mrb[30].mxu0  ;;  %v5334_v45 = vpop.f32.mrb[28].mxu1 }
 0x130   :  { %v5226_v47 = vpop.f32.mrb[31].mxu0  ;;  %v5335_v51 = vpop.f32.mrb[29].mxu1 }
 0x131   :  { %v1283_v48 = vadd.f32 %v5224_v43, %v7544_v37  ;;  %v5227_v50 = vadd.f32 %v5226_v47, %v5225_v44  ;;  %v5336_v52 = vadd.f32 %v5335_v51, %v5334_v45  ;;  %v5337_v54 = vpop.f32.mrb[30].mxu1 }
 0x132   :  { %v5338_v56 = vpop.f32.mrb[31].mxu1 }
 0x133   :  { %v1286_v55 = vadd.f32 %v5227_v50, %v7544_v37  ;;  %v7626_v58 = vadd.f32 %v5336_v52, %v1283_v48  ;;  %v5339_v59 = vadd.f32 %v5338_v56, %v5337_v54 }
 0x135   :  { %v5228_v60 = vpop.f32.mrb[32].mxu0  ;;  %v7628_v61 = vadd.f32 %v5339_v59, %v1286_v55 }
 0x136   :  { %v5229_v62 = vpop.f32.mrb[33].mxu0 }
 0x137   :  { %v5230_v63 = vadd.f32 %v5229_v62, %v5228_v60  ;;  %v5231_v0 = vpop.f32.mrb[34].mxu0  ;;  %v5340_v2 = vpop.f32.mrb[32].mxu1 }
 0x138   :  { %v5232_v3 = vpop.f32.mrb[35].mxu0  ;;  %v5341_v7 = vpop.f32.mrb[33].mxu1 }
 0x139   :  { %v1291_v5 = vadd.f32 %v5230_v63, %v7544_v37  ;;  %v5233_v6 = vadd.f32 %v5232_v3, %v5231_v0  ;;  %v5342_v9 = vadd.f32 %v5341_v7, %v5340_v2  ;;  %v5343_v10 = vpop.f32.mrb[34].mxu1 }
 0x13a   :  { %v5344_v13 = vpop.f32.mrb[35].mxu1 }
 0x13b   :  { %v1294_v12 = vadd.f32 %v5233_v6, %v7544_v37  ;;  %v7632_v14 = vadd.f32 %v5342_v9, %v1291_v5  ;;  %v5345_v15 = vadd.f32 %v5344_v13, %v5343_v10 }
 0x13d   :  { %v5234_v16 = vpop.f32.mrb[36].mxu0  ;;  %v7634_v17 = vadd.f32 %v5345_v15, %v1294_v12 }
 0x13e   :  { %v5235_v18 = vpop.f32.mrb[37].mxu0 }
 0x13f   :  { %v5236_v20 = vadd.f32 %v5235_v18, %v5234_v16  ;;  %v5237_v21 = vpop.f32.mrb[38].mxu0  ;;  %v5346_v23 = vpop.f32.mrb[36].mxu1 }
 0x140   :  { %v5238_v24 = vpop.f32.mrb[39].mxu0  ;;  %v5347_v28 = vpop.f32.mrb[37].mxu1 }
 0x141   :  { %v1299_v25 = vadd.f32 %v5236_v20, %v7544_v37  ;;  %v5239_v26 = vadd.f32 %v5238_v24, %v5237_v21  ;;  %v5348_v29 = vadd.f32 %v5347_v28, %v5346_v23  ;;  %v5349_v31 = vpop.f32.mrb[38].mxu1 }
 0x142   :  { %v5350_v33 = vpop.f32.mrb[39].mxu1 }
 0x143   :  { %v1302_v32 = vadd.f32 %v5239_v26, %v7544_v37  ;;  %v7638_v34 = vadd.f32 %v5348_v29, %v1299_v25  ;;  %v5351_v35 = vadd.f32 %v5350_v33, %v5349_v31 }
 0x145   :  { %v5240_v36 = vpop.f32.mrb[40].mxu0  ;;  %v7640_v39 = vadd.f32 %v5351_v35, %v1302_v32 }
 0x146   :  { %v5241_v40 = vpop.f32.mrb[41].mxu0 }
 0x147   :  { %v5242_v42 = vadd.f32 %v5241_v40, %v5240_v36  ;;  %v5243_v43 = vpop.f32.mrb[42].mxu0  ;;  %v5352_v44 = vpop.f32.mrb[40].mxu1 }
 0x148   :  { %v5244_v45 = vpop.f32.mrb[43].mxu0  ;;  %v5353_v50 = vpop.f32.mrb[41].mxu1 }
 0x149   :  { %v1307_v47 = vadd.f32 %v5242_v42, %v7544_v37  ;;  %v5245_v48 = vadd.f32 %v5244_v45, %v5243_v43  ;;  %v5354_v51 = vadd.f32 %v5353_v50, %v5352_v44  ;;  %v5355_v52 = vpop.f32.mrb[42].mxu1 }
 0x14a   :  { %v5356_v55 = vpop.f32.mrb[43].mxu1 }
 0x14b   :  { %v1310_v54 = vadd.f32 %v5245_v48, %v7544_v37  ;;  %v7644_v56 = vadd.f32 %v5354_v51, %v1307_v47  ;;  %v5357_v59 = vadd.f32 %v5356_v55, %v5355_v52 }
 0x14d   :  { %v5246_v60 = vpop.f32.mrb[44].mxu0  ;;  %v7646_v62 = vadd.f32 %v5357_v59, %v1310_v54 }
 0x14e   :  { %v5247_v63 = vpop.f32.mrb[45].mxu0 }
 0x14f   :  { %v5248_v0 = vadd.f32 %v5247_v63, %v5246_v60  ;;  %v5249_v2 = vpop.f32.mrb[46].mxu0  ;;  %v5358_v3 = vpop.f32.mrb[44].mxu1 }
 0x150   :  { %v5250_v5 = vpop.f32.mrb[47].mxu0  ;;  %v5359_v9 = vpop.f32.mrb[45].mxu1 }
 0x151   :  { %v1315_v6 = vadd.f32 %v5248_v0, %v7544_v37  ;;  %v5251_v7 = vadd.f32 %v5250_v5, %v5249_v2  ;;  %v5360_v10 = vadd.f32 %v5359_v9, %v5358_v3  ;;  %v5361_v12 = vpop.f32.mrb[46].mxu1 }
 0x152   :  { %v5362_v15 = vpop.f32.mrb[47].mxu1 }
 0x153   :  { %v1318_v13 = vadd.f32 %v5251_v7, %v7544_v37  ;;  %v7650_v16 = vadd.f32 %v5360_v10, %v1315_v6  ;;  %v5363_v18 = vadd.f32 %v5362_v15, %v5361_v12 }
 0x155   :  { %v5252_v20 = vpop.f32.mrb[48].mxu0  ;;  %v7652_v21 = vadd.f32 %v5363_v18, %v1318_v13 }
 0x156   :  { %v5253_v23 = vpop.f32.mrb[49].mxu0 }
 0x157   :  { %v5254_v24 = vadd.f32 %v5253_v23, %v5252_v20  ;;  %v5255_v25 = vpop.f32.mrb[50].mxu0  ;;  %v5364_v26 = vpop.f32.mrb[48].mxu1 }
 0x158   :  { %v5256_v28 = vpop.f32.mrb[51].mxu0  ;;  %v5365_v32 = vpop.f32.mrb[49].mxu1 }
 0x159   :  { %v1323_v29 = vadd.f32 %v5254_v24, %v7544_v37  ;;  %v5257_v31 = vadd.f32 %v5256_v28, %v5255_v25  ;;  %v5366_v33 = vadd.f32 %v5365_v32, %v5364_v26  ;;  %v5367_v35 = vpop.f32.mrb[50].mxu1  ;;  %v6013_v26 = vld [vmem:[%s9711_s5] sm:$0xff]  }
 0x15a   :  { %v5368_v40 = vpop.f32.mrb[51].mxu1  ;;  %5692 = vmatprep.subr.bf16.mxu0 %v6013_v26 }
 0x15b   :  { %v1326_v36 = vadd.f32 %v5257_v31, %v7544_v37  ;;  %v7656_v42 = vadd.f32 %v5366_v33, %v1323_v29  ;;  %v5369_v43 = vadd.f32 %v5368_v40, %v5367_v35  ;;  %5693 = vmatpush3.bf16.msra.mxu0 %v6013_v26  ;;  %v6015_v26 = vld [vmem:[%s9711_s5 + $0x10] sm:$0xff]  }
 0x15d   :  { %v5258_v44 = vpop.f32.mrb[52].mxu0  ;;  %v7658_v45 = vadd.f32 %v5369_v43, %v1326_v36 }
 0x15e   :  { %v5259_v47 = vpop.f32.mrb[53].mxu0 }
 0x15f   :  { %v5260_v48 = vadd.f32 %v5259_v47, %v5258_v44  ;;  %v5261_v50 = vpop.f32.mrb[54].mxu0  ;;  %v5370_v51 = vpop.f32.mrb[52].mxu1 }
 0x160   :  { %v5262_v52 = vpop.f32.mrb[55].mxu0  ;;  %v5371_v59 = vpop.f32.mrb[53].mxu1 }
 0x161   :  { %v1331_v54 = vadd.f32 %v5260_v48, %v7544_v37  ;;  %v5263_v55 = vadd.f32 %v5262_v52, %v5261_v50  ;;  %v5372_v60 = vadd.f32 %v5371_v59, %v5370_v51  ;;  %v5373_v63 = vpop.f32.mrb[54].mxu1 }
 0x162   :  { %v5374_v2 = vpop.f32.mrb[55].mxu1 }
 0x163   :  { %v1334_v0 = vadd.f32 %v5263_v55, %v7544_v37  ;;  %v7662_v3 = vadd.f32 %v5372_v60, %v1331_v54  ;;  %v5375_v5 = vadd.f32 %v5374_v2, %v5373_v63 }
 0x165   :  { %v5264_v6 = vpop.f32.mrb[56].mxu0  ;;  %v7664_v7 = vadd.f32 %v5375_v5, %v1334_v0 }
 0x166   :  { %v5265_v9 = vpop.f32.mrb[57].mxu0 }
 0x167   :  { %v5266_v10 = vadd.f32 %v5265_v9, %v5264_v6  ;;  %v5267_v12 = vpop.f32.mrb[58].mxu0  ;;  %v5376_v13 = vpop.f32.mrb[56].mxu1 }
 0x168   :  { %v5268_v15 = vpop.f32.mrb[59].mxu0  ;;  %v5377_v23 = vpop.f32.mrb[57].mxu1 }
 0x169   :  { %v1339_v18 = vadd.f32 %v5266_v10, %v7544_v37  ;;  %v5269_v20 = vadd.f32 %v5268_v15, %v5267_v12  ;;  %v5378_v24 = vadd.f32 %v5377_v23, %v5376_v13  ;;  %v5379_v25 = vpop.f32.mrb[58].mxu1  ;;  %v6014_v10 = vld [vmem:[%s9711_s5 + $0x8] sm:$0xff]  }
 0x16a   :  { %v5380_v29 = vpop.f32.mrb[59].mxu1  ;;  %5694 = vmatprep.subr.bf16.mxu0 %v6014_v10 }
 0x16b   :  { %v1342_v28 = vadd.f32 %v5269_v20, %v7544_v37  ;;  %v7671_v31 = vadd.f32 %v5378_v24, %v1339_v18  ;;  %v5381_v32 = vadd.f32 %v5380_v29, %v5379_v25  ;;  %5695 = vmatpush3.bf16.msra.mxu0 %v6014_v10 }
 0x16c   :  { %5696 = vmatprep.subr.bf16.mxu0 %v6015_v26 }
 0x16d   :  { %v5270_v33 = vpop.f32.mrb[60].mxu0  ;;  %v7673_v35 = vadd.f32 %v5381_v32, %v1342_v28  ;;  %v6016_v28 = vld [vmem:[%s9711_s5 + $0x18] sm:$0xff]  }
 0x16e   :  { %v5271_v36 = vpop.f32.mrb[61].mxu0 }
 0x16f   :  { %v5272_v40 = vadd.f32 %v5271_v36, %v5270_v33  ;;  %v5273_v43 = vpop.f32.mrb[62].mxu0  ;;  %v5382_v44 = vpop.f32.mrb[60].mxu1  ;;  %5697 = vmatpush3.bf16.msra.mxu0 %v6015_v26 }
 0x170   :  { %v5274_v47 = vpop.f32.mrb[63].mxu0  ;;  %v5383_v51 = vpop.f32.mrb[61].mxu1  ;;  %5698 = vmatprep.subr.bf16.mxu0 %v6016_v28 }
 0x171   :  { %v1347_v48 = vadd.f32 %v5272_v40, %v7544_v37  ;;  %v5275_v50 = vadd.f32 %v5274_v47, %v5273_v43  ;;  %v5384_v52 = vadd.f32 %v5383_v51, %v5382_v44  ;;  %v5385_v54 = vpop.f32.mrb[62].mxu1 }
 0x172   :  { %v5386_v59 = vpop.f32.mrb[63].mxu1 }
 0x173   :  { %v1350_v55 = vadd.f32 %v5275_v50, %v7544_v37  ;;  %v7677_v60 = vadd.f32 %v5384_v52, %v1347_v48  ;;  %v5387_v63 = vadd.f32 %v5386_v59, %v5385_v54  ;;  %5699 = vmatpush3.bf16.msra.mxu0 %v6016_v28 }
 0x175   :  { %v5404_v0 = vpop.f32.mrb[64].mxu0  ;;  %v7679_v2 = vadd.f32 %v5387_v63, %v1350_v55 }
 0x176   :  { %v5405_v5 = vpop.f32.mrb[65].mxu0 }
 0x177   :  { %v5406_v6 = vadd.f32 %v5405_v5, %v5404_v0  ;;  %v5407_v9 = vpop.f32.mrb[66].mxu0  ;;  %v5614_v13 = vpop.f32.mrb[64].mxu1  ;;  %v6018_v0 = vld [vmem:[%s9711_s5 + $0x28] sm:$0xff]  }
 0x178   :  { %v5408_v12 = vpop.f32.mrb[67].mxu0  ;;  %v1709_v37 = vpop.f32.mrb[65].mxu1 }
 0x179   :  { %v5409_v15 = vadd.f32 %v5408_v12, %v5407_v9  ;;  %v1549_v18 = vadd.f32 %v5406_v6, %v7557_v53  ;;  %v5615_v20 = vpop.f32.mrb[66].mxu1 }
 0x17a   :  { %v1712_v25 = vpop.f32.mrb[67].mxu1 }
 0x17b   :  { %v1710_v23 = vadd.f32 %v1709_v37, %v1549_v18  ;;  %v1552_v24 = vadd.f32 %v5409_v15, %v7562_v57  ;;  %v6017_v57 = vld [vmem:[%s9711_s5 + $0x20] sm:$0xff]  }
 0x17c   :  { %5700 = vmatprep.subr.bf16.mxu0 %v6017_v57 }
 0x17d   :  { %v1713_v29 = vadd.f32 %v1712_v25, %v1552_v24  ;;  %v5410_v32 = vpop.f32.mrb[68].mxu0  ;;  %v1836_v33 = vmax.f32 %v1710_v23, 0.0  ;;  %5701 = vmatpush3.bf16.msra.mxu0 %v6017_v57 }
 0x17e   :  { %v5411_v53 = vpop.f32.mrb[69].mxu0  ;;  %5702 = vmatprep.subr.bf16.mxu0 %v6018_v0 }
 0x17f   :  { %v1837_v36 = vmax.f32 %v1713_v29, 0.0  ;;  %v5412_v40 = vadd.f32 %v5411_v53, %v5410_v32  ;;  %v5413_v43 = vpop.f32.mrb[70].mxu0  ;;  %v5618_v47 = vpop.f32.mrb[68].mxu1  ;;  %v6020_v32 = vld [vmem:[%s9711_s5 + $0x38] sm:$0xff]  }
 0x180   :  { %v5414_v44 = vpop.f32.mrb[71].mxu0  ;;  %v1725_v52 = vpop.f32.mrb[69].mxu1 }
 0x181   :  { %v1868_v48 = vpack.c.bf16 %v1837_v36, %v1836_v33  ;;  %v1557_v50 = vadd.f32 %v5412_v40, %v7572_v8  ;;  %v5415_v51 = vadd.f32 %v5414_v44, %v5413_v43  ;;  %v5619_v54 = vpop.f32.mrb[70].mxu1  ;;  %5703 = vmatpush3.bf16.msra.mxu0 %v6018_v0 }
 0x182   :  { %v1728_v63 = vpop.f32.mrb[71].mxu1 }
 0x183   :  { %v1718_v55 = vadd.f32 %v5614_v13, %v1557_v50  ;;  %v1560_v59 = vadd.f32 %v5415_v51, %v7574_v11  ;;  %5660 = vmatprep.mubr.bf16.mxu1 %v1868_v48  ;;  %v6019_v11 = vld [vmem:[%s9711_s5 + $0x30] sm:$0xff]  }
 0x184   :  { %5704 = vmatprep.subr.bf16.mxu0 %v6019_v11 }
 0x185   :  { %v1721_v5 = vadd.f32 %v5615_v20, %v1560_v59  ;;  %v5416_v6 = vpop.f32.mrb[72].mxu0  ;;  %v1838_v10 = vmax.f32 %v1718_v55, 0.0  ;;  %5705 = vmatpush3.bf16.msra.mxu0 %v6019_v11 }
 0x186   :  { %v5417_v9 = vpop.f32.mrb[73].mxu0  ;;  %5706 = vmatprep.subr.bf16.mxu0 %v6020_v32 }
 0x187   :  { %v1839_v8 = vmax.f32 %v1721_v5, 0.0  ;;  %v5418_v12 = vadd.f32 %v5417_v9, %v5416_v6  ;;  %v5419_v15 = vpop.f32.mrb[74].mxu0  ;;  %v7703_v18 = vpop.f32.mrb[72].mxu1 }
 0x188   :  { %v5420_v13 = vpop.f32.mrb[75].mxu0  ;;  %v1741_v20 = vpop.f32.mrb[73].mxu1 }
 0x189   :  { %v1869_v37 = vpack.c.bf16 %v1839_v8, %v1838_v10  ;;  %v5421_v23 = vadd.f32 %v5420_v13, %v5419_v15  ;;  %v1565_v24 = vadd.f32 %v5418_v12, %v7587_v27  ;;  %v7706_v25 = vpop.f32.mrb[74].mxu1  ;;  %5707 = vmatpush3.bf16.msra.mxu0 %v6020_v32 }
 0x18a   :  { %v1744_v29 = vpop.f32.mrb[75].mxu1 }
 0x18b   :  { %v1726_v26 = vadd.f32 %v1725_v52, %v1565_v24  ;;  %5661 = vmatmul.mubr.bf16.vlgmr.msra.gmra.mrb[96].mxu1 %v1869_v37  ;;  %v1568_v28 = vadd.f32 %v5421_v23, %v7589_v30 }
 0x18d   :  { %v1729_v53 = vadd.f32 %v1728_v63, %v1568_v28  ;;  %v5422_v33 = vpop.f32.mrb[76].mxu0  ;;  %v1840_v40 = vmax.f32 %v1726_v26, 0.0 }
 0x18e   :  { %v5423_v36 = vpop.f32.mrb[77].mxu0 }
 0x18f   :  { %v1841_v27 = vmax.f32 %v1729_v53, 0.0  ;;  %v5424_v43 = vadd.f32 %v5423_v36, %v5422_v33  ;;  %v5425_v57 = vpop.f32.mrb[78].mxu0  ;;  %v7712_v48 = vpop.f32.mrb[76].mxu1 }
 0x190   :  { %v5426_v44 = vpop.f32.mrb[79].mxu0  ;;  %v1757_v52 = vpop.f32.mrb[77].mxu1 }
 0x191   :  { %v1870_v50 = vpack.c.bf16 %v1841_v27, %v1840_v40  ;;  %v1573_v30 = vadd.f32 %v5424_v43, %v7599_v46  ;;  %v5427_v51 = vadd.f32 %v5426_v44, %v5425_v57  ;;  %v7715_v55 = vpop.f32.mrb[78].mxu1 }
 0x192   :  { %v1760_v0 = vpop.f32.mrb[79].mxu1 }
 0x193   :  { %v1734_v59 = vadd.f32 %v5618_v47, %v1573_v30  ;;  %v1576_v63 = vadd.f32 %v5427_v51, %v7601_v49  ;;  %5664 = vmatprep.mubr.bf16.mxu1 %v1870_v50 }
 0x195   :  { %v1737_v5 = vadd.f32 %v5619_v54, %v1576_v63  ;;  %v5428_v6 = vpop.f32.mrb[80].mxu0  ;;  %v1842_v10 = vmax.f32 %v1734_v59, 0.0 }
 0x196   :  { %v5429_v9 = vpop.f32.mrb[81].mxu0 }
 0x197   :  { %v1843_v8 = vmax.f32 %v1737_v5, 0.0  ;;  %v5430_v12 = vadd.f32 %v5429_v9, %v5428_v6  ;;  %v5431_v15 = vpop.f32.mrb[82].mxu0  ;;  %v7718_v13 = vpop.f32.mrb[80].mxu1 }
 0x198   :  { %v5432_v11 = vpop.f32.mrb[83].mxu0  ;;  %v7721_v24 = vpop.f32.mrb[81].mxu1 }
 0x199   :  { %v5433_v46 = vadd.f32 %v5432_v11, %v5431_v15  ;;  %v1581_v37 = vadd.f32 %v5430_v12, %v7608_v1  ;;  %v1871_v23 = vpack.c.bf16 %v1843_v8, %v1842_v10  ;;  %v7723_v47 = vpop.f32.mrb[82].mxu1 }
 0x19a   :  { %v7726_v26 = vpop.f32.mrb[83].mxu1 }
 0x19b   :  { %v1742_v49 = vadd.f32 %v1741_v20, %v1581_v37  ;;  %5665 = vmatmul.mubr.bf16.gmra.mrb[100].mxu1 %v1871_v23  ;;  %v1584_v54 = vadd.f32 %v5433_v46, %v7610_v4 }
 0x19d   :  { %v1745_v28 = vadd.f32 %v1744_v29, %v1584_v54  ;;  %v5434_v32 = vpop.f32.mrb[84].mxu0  ;;  %v1844_v33 = vmax.f32 %v1742_v49, 0.0 }
 0x19e   :  { %v5435_v53 = vpop.f32.mrb[85].mxu0 }
 0x19f   :  { %v1845_v36 = vmax.f32 %v1745_v28, 0.0  ;;  %v5436_v40 = vadd.f32 %v5435_v53, %v5434_v32  ;;  %v5437_v27 = vpop.f32.mrb[86].mxu0  ;;  %v7728_v1 = vpop.f32.mrb[84].mxu1 }
 0x1a0   :  { %v5438_v43 = vpop.f32.mrb[87].mxu0  ;;  %v7731_v20 = vpop.f32.mrb[85].mxu1 }
 0x1a1   :  { %v1872_v57 = vpack.c.bf16 %v1845_v36, %v1844_v33  ;;  %v1589_v44 = vadd.f32 %v5436_v40, %v7614_v19  ;;  %v5439_v50 = vadd.f32 %v5438_v43, %v5437_v27  ;;  %v7733_v30 = vpop.f32.mrb[86].mxu1 }
 0x1a2   :  { %v7737_v51 = vpop.f32.mrb[87].mxu1 }
 0x1a3   :  { %v1750_v4 = vadd.f32 %v7703_v18, %v1589_v44  ;;  %v1592_v29 = vadd.f32 %v5439_v50, %v7616_v22  ;;  %5668 = vmatprep.mubr.bf16.mxu1 %v1872_v57 }
 0x1a5   :  { %v1753_v59 = vadd.f32 %v7706_v25, %v1592_v29  ;;  %v5440_v63 = vpop.f32.mrb[88].mxu0  ;;  %v1846_v6 = vmax.f32 %v1750_v4, 0.0 }
 0x1a6   :  { %v5441_v5 = vpop.f32.mrb[89].mxu0 }
 0x1a7   :  { %v1847_v9 = vmax.f32 %v1753_v59, 0.0  ;;  %v5442_v10 = vadd.f32 %v5441_v5, %v5440_v63  ;;  %v5443_v19 = vpop.f32.mrb[90].mxu0  ;;  %v7740_v12 = vpop.f32.mrb[88].mxu1 }
 0x1a8   :  { %v5444_v8 = vpop.f32.mrb[91].mxu0  ;;  %v7743_v46 = vpop.f32.mrb[89].mxu1 }
 0x1a9   :  { %v5445_v15 = vadd.f32 %v5444_v8, %v5443_v19  ;;  %v1597_v11 = vadd.f32 %v5442_v10, %v7620_v38  ;;  %v1873_v18 = vpack.c.bf16 %v1847_v9, %v1846_v6  ;;  %v7745_v22 = vpop.f32.mrb[90].mxu1 }
 0x1aa   :  { %v7748_v23 = vpop.f32.mrb[91].mxu1 }
 0x1ab   :  { %v1758_v37 = vadd.f32 %v1757_v52, %v1597_v11  ;;  %5669 = vmatmul.mubr.bf16.gmra.mrb[104].mxu1 %v1873_v18  ;;  %v1600_v25 = vadd.f32 %v5445_v15, %v7622_v41 }
 0x1ad   :  { %v1761_v49 = vadd.f32 %v1760_v0, %v1600_v25  ;;  %v5446_v54 = vpop.f32.mrb[92].mxu0  ;;  %v1848_v32 = vmax.f32 %v1758_v37, 0.0 }
 0x1ae   :  { %v5447_v28 = vpop.f32.mrb[93].mxu0 }
 0x1af   :  { %v1849_v53 = vmax.f32 %v1761_v49, 0.0  ;;  %v5448_v33 = vadd.f32 %v5447_v28, %v5446_v54  ;;  %v5449_v36 = vpop.f32.mrb[94].mxu0  ;;  %v7750_v38 = vpop.f32.mrb[92].mxu1 }
 0x1b0   :  { %v5450_v40 = vpop.f32.mrb[95].mxu0  ;;  %v7753_v52 = vpop.f32.mrb[93].mxu1 }
 0x1b1   :  { %v1874_v27 = vpack.c.bf16 %v1849_v53, %v1848_v32  ;;  %v1605_v43 = vadd.f32 %v5448_v33, %v7626_v58  ;;  %v5451_v57 = vadd.f32 %v5450_v40, %v5449_v36  ;;  %v7755_v44 = vpop.f32.mrb[94].mxu1 }
 0x1b2   :  { %v7759_v50 = vpop.f32.mrb[95].mxu1 }
 0x1b3   :  { %v1766_v41 = vadd.f32 %v7712_v48, %v1605_v43  ;;  %v1608_v0 = vadd.f32 %v5451_v57, %v7628_v61  ;;  %5672 = vmatprep.mubr.bf16.mxu1 %v1874_v27 }
 0x1b5   :  { %v1769_v4 = vadd.f32 %v7715_v55, %v1608_v0  ;;  %v5452_v29 = vpop.f32.mrb[96].mxu0  ;;  %v1850_v63 = vmax.f32 %v1766_v41, 0.0 }
 0x1b6   :  { %v5453_v59 = vpop.f32.mrb[97].mxu0 }
 0x1b7   :  { %v1851_v5 = vmax.f32 %v1769_v4, 0.0  ;;  %v5454_v6 = vadd.f32 %v5453_v59, %v5452_v29  ;;  %v5455_v58 = vpop.f32.mrb[98].mxu0 }
 0x1b8   :  { %v5456_v9 = vpop.f32.mrb[99].mxu0 }
 0x1b9   :  { %v5457_v10 = vadd.f32 %v5456_v9, %v5455_v58  ;;  %v1613_v19 = vadd.f32 %v5454_v6, %v7632_v14  ;;  %v1875_v8 = vpack.c.bf16 %v1851_v5, %v1850_v63 }
 0x1bb   :  { %v1774_v48 = vadd.f32 %v7721_v24, %v1613_v19  ;;  %5673 = vmatmul.mubr.bf16.gmra.mrb[108].mxu1 %v1875_v8  ;;  %v1616_v61 = vadd.f32 %v5457_v10, %v7634_v17 }
 0x1bd   :  { %v1777_v15 = vadd.f32 %v7726_v26, %v1616_v61  ;;  %v5458_v11 = vpop.f32.mrb[100].mxu0  ;;  %v1852_v18 = vmax.f32 %v1774_v48, 0.0 }
 0x1be   :  { %v5459_v55 = vpop.f32.mrb[101].mxu0 }
 0x1bf   :  { %v1853_v37 = vmax.f32 %v1777_v15, 0.0  ;;  %v5460_v25 = vadd.f32 %v5459_v55, %v5458_v11  ;;  %v5461_v49 = vpop.f32.mrb[102].mxu0 }
 0x1c0   :  { %v5462_v54 = vpop.f32.mrb[103].mxu0 }
 0x1c1   :  { %v1876_v28 = vpack.c.bf16 %v1853_v37, %v1852_v18  ;;  %v1621_v32 = vadd.f32 %v5460_v25, %v7638_v34  ;;  %v5463_v53 = vadd.f32 %v5462_v54, %v5461_v49 }
 0x1c3   :  { %v1782_v14 = vadd.f32 %v7718_v13, %v1621_v32  ;;  %v1624_v24 = vadd.f32 %v5463_v53, %v7640_v39  ;;  %5676 = vmatprep.mubr.bf16.mxu1 %v1876_v28 }
 0x1c5   :  { %v1785_v17 = vadd.f32 %v7723_v47, %v1624_v24  ;;  %v5464_v33 = vpop.f32.mrb[104].mxu0  ;;  %v1854_v36 = vmax.f32 %v1782_v14, 0.0 }
 0x1c6   :  { %v5465_v26 = vpop.f32.mrb[105].mxu0 }
 0x1c7   :  { %v1855_v40 = vmax.f32 %v1785_v17, 0.0  ;;  %v5466_v27 = vadd.f32 %v5465_v26, %v5464_v33  ;;  %v5467_v43 = vpop.f32.mrb[106].mxu0 }
 0x1c8   :  { %v5468_v57 = vpop.f32.mrb[107].mxu0 }
 0x1c9   :  { %v5469_v41 = vadd.f32 %v5468_v57, %v5467_v43  ;;  %v1629_v0 = vadd.f32 %v5466_v27, %v7644_v56  ;;  %v1877_v4 = vpack.c.bf16 %v1855_v40, %v1854_v36 }
 0x1cb   :  { %v1790_v34 = vadd.f32 %v7731_v20, %v1629_v0  ;;  %5677 = vmatmul.mubr.bf16.gmra.mrb[112].mxu1 %v1877_v4  ;;  %v1632_v13 = vadd.f32 %v5469_v41, %v7646_v62 }
 0x1cd   :  { %v1793_v39 = vadd.f32 %v7737_v51, %v1632_v13  ;;  %v5470_v29 = vpop.f32.mrb[108].mxu0  ;;  %v1856_v59 = vmax.f32 %v1790_v34, 0.0 }
 0x1ce   :  { %v5471_v47 = vpop.f32.mrb[109].mxu0 }
 0x1cf   :  { %v1857_v63 = vmax.f32 %v1793_v39, 0.0  ;;  %v5472_v5 = vadd.f32 %v5471_v47, %v5470_v29  ;;  %v5473_v6 = vpop.f32.mrb[110].mxu0 }
 0x1d0   :  { %v5474_v58 = vpop.f32.mrb[111].mxu0 }
 0x1d1   :  { %v1878_v9 = vpack.c.bf16 %v1857_v63, %v1856_v59  ;;  %v1637_v10 = vadd.f32 %v5472_v5, %v7650_v16  ;;  %v5475_v19 = vadd.f32 %v5474_v58, %v5473_v6 }
 0x1d3   :  { %v1798_v56 = vadd.f32 %v7728_v1, %v1637_v10  ;;  %v1640_v20 = vadd.f32 %v5475_v19, %v7652_v21  ;;  %5680 = vmatprep.mubr.bf16.mxu1 %v1878_v9  ;;  %v6021_v10 = vld [vmem:[%s9713_s7] ss:$28 sps:$4 sm:$0xff]   ;;  %v6024_v19 = vld [vmem:[%s9713_s7 + $0x38] ss:$28 sps:$4 sm:$0xff]  }
 0x1d5   :  { %v1801_v62 = vadd.f32 %v7733_v30, %v1640_v20  ;;  %v5476_v8 = vpop.f32.mrb[112].mxu0  ;;  %v1858_v48 = vmax.f32 %v1798_v56, 0.0 }
 0x1d6   :  { %v5477_v51 = vpop.f32.mrb[113].mxu0 }
 0x1d7   :  { %v1859_v61 = vmax.f32 %v1801_v62, 0.0  ;;  %v5478_v15 = vadd.f32 %v5477_v51, %v5476_v8  ;;  %v5479_v11 = vpop.f32.mrb[114].mxu0  ;;  %v6029_v62 = vld [vmem:[%s9713_s7 + $0x74] ss:$28 sps:$4 sm:$0xff]  }
 0x1d8   :  { %v5480_v55 = vpop.f32.mrb[115].mxu0 }
 0x1d9   :  { %v5481_v18 = vadd.f32 %v5480_v55, %v5479_v11  ;;  %v1645_v37 = vadd.f32 %v5478_v15, %v7656_v42  ;;  %v1879_v25 = vpack.c.bf16 %v1859_v61, %v1858_v48  ;;  %v6027_v11 = vld [vmem:[%s9713_s7 + $0x70] ss:$28 sps:$4 sm:$0xff]  }
 0x1da   :  { %v6038_v55 = vld [vmem:[%s9713_s7 + $0xc] ss:$28 sps:$4 sm:$0xff]  }
 0x1db   :  { %v1806_v16 = vadd.f32 %v7743_v46, %v1645_v37  ;;  %5681 = vmatmul.mubr.bf16.gmra.mrb[116].mxu1 %v1879_v25  ;;  %v1648_v1 = vadd.f32 %v5481_v18, %v7658_v45  ;;  %v6032_v25 = vld [vmem:[%s9713_s7 + $0xac] ss:$28 sps:$4 sm:$0xff]   ;;  %3026 = vmatprep.subr.bf16.mxu0 %v6038_v55 }
 0x1dd   :  { %v1809_v21 = vadd.f32 %v7748_v23, %v1648_v1  ;;  %v5482_v49 = vpop.f32.mrb[116].mxu0  ;;  %v1860_v54 = vmax.f32 %v1806_v16, 0.0 }
 0x1de   :  { %v5483_v30 = vpop.f32.mrb[117].mxu0 }
 0x1df   :  { %v1861_v28 = vmax.f32 %v1809_v21, 0.0  ;;  %v5484_v32 = vadd.f32 %v5483_v30, %v5482_v49  ;;  %v5485_v53 = vpop.f32.mrb[118].mxu0  ;;  %v6030_v49 = vld [vmem:[%s9713_s7 + $0xa8] ss:$28 sps:$4 sm:$0xff]  }
 0x1e0   :  { %v5486_v14 = vpop.f32.mrb[119].mxu0  ;;  %v6035_v30 = vld [vmem:[%s9713_s7 + $0xe4] ss:$28 sps:$4 sm:$0xff]  }
 0x1e1   :  { %v1880_v24 = vpack.c.bf16 %v1861_v28, %v1860_v54  ;;  %v1653_v17 = vadd.f32 %v5484_v32, %v7662_v3  ;;  %v5487_v33 = vadd.f32 %v5486_v14, %v5485_v53  ;;  %v6036_v28 = vld [vmem:[%s9713_s7 + $0x8] ss:$28 sps:$4 sm:$0xff]   ;;  %v6033_v53 = vld [vmem:[%s9713_s7 + $0xe0] ss:$28 sps:$4 sm:$0xff]  }
 0x1e2   :  { %v6041_v32 = vld [vmem:[%s9713_s7 + $0x44] ss:$28 sps:$4 sm:$0xff]  }
 0x1e3   :  { %v1814_v42 = vadd.f32 %v7740_v12, %v1653_v17  ;;  %v1656_v46 = vadd.f32 %v5487_v33, %v7664_v7  ;;  %5684 = vmatprep.mubr.bf16.mxu1 %v1880_v24  ;;  %v6039_v14 = vld [vmem:[%s9713_s7 + $0x40] ss:$28 sps:$4 sm:$0xff]   ;;  %v6042_v33 = vld [vmem:[%s9713_s7 + $0x118] ss:$28 sps:$4 sm:$0xff]  }
 0x1e4   :  { %v6044_v24 = vld [vmem:[%s9713_s7 + $0x11c] ss:$28 sps:$4 sm:$0xff]  }
 0x1e5   :  { %v1817_v45 = vadd.f32 %v7745_v22, %v1656_v46  ;;  %v5488_v26 = vpop.f32.mrb[120].mxu0  ;;  %v1862_v36 = vmax.f32 %v1814_v42, 0.0  ;;  %v6047_v17 = vld [vmem:[%s9713_s7 + $0x7c] ss:$28 sps:$4 sm:$0xff]   ;;  %v6050_v46 = vld [vmem:[%s9713_s7 + $0xb4] ss:$28 sps:$4 sm:$0xff]  }
 0x1e6   :  { %v5489_v23 = vpop.f32.mrb[121].mxu0  ;;  %v6045_v42 = vld [vmem:[%s9713_s7 + $0x78] ss:$28 sps:$4 sm:$0xff]  }
 0x1e7   :  { %v1863_v40 = vmax.f32 %v1817_v45, 0.0  ;;  %v5490_v27 = vadd.f32 %v5489_v23, %v5488_v26  ;;  %v5491_v43 = vpop.f32.mrb[122].mxu0  ;;  %v6053_v45 = vld [vmem:[%s9713_s7 + $0x154] ss:$28 sps:$4 sm:$0xff]  }
 0x1e8   :  { %v5492_v57 = vpop.f32.mrb[123].mxu0 }
 0x1e9   :  { %v5493_v41 = vadd.f32 %v5492_v57, %v5491_v43  ;;  %v1661_v0 = vadd.f32 %v5490_v27, %v7671_v31  ;;  %v1881_v4 = vpack.c.bf16 %v1863_v40, %v1862_v36  ;;  %v6048_v43 = vld [vmem:[%s9713_s7 + $0xb0] ss:$28 sps:$4 sm:$0xff]  }
 0x1ea   :  { %v6051_v57 = vld [vmem:[%s9713_s7 + $0x150] ss:$28 sps:$4 sm:$0xff]  }
 0x1eb   :  { %v1822_v3 = vadd.f32 %v7753_v52, %v1661_v0  ;;  %5685 = vmatmul.mubr.bf16.gmra.mrb[120].mxu1 %v1881_v4  ;;  %v1664_v12 = vadd.f32 %v5493_v41, %v7673_v35 }
 0x1ed   :  { %v1825_v7 = vadd.f32 %v7759_v50, %v1664_v12  ;;  %v5494_v34 = vpop.f32.mrb[124].mxu0  ;;  %v1864_v13 = vmax.f32 %v1822_v3, 0.0  ;;  %v6056_v3 = vld [vmem:[%s9713_s7 + $0xec] ss:$28 sps:$4 sm:$0xff]  }
 0x1ee   :  { %v5495_v22 = vpop.f32.mrb[125].mxu0 }
 0x1ef   :  { %v1865_v39 = vmax.f32 %v1825_v7, 0.0  ;;  %v5496_v29 = vadd.f32 %v5495_v22, %v5494_v34  ;;  %v5497_v47 = vpop.f32.mrb[126].mxu0 }
 0x1f0   :  { %v5498_v59 = vpop.f32.mrb[127].mxu0 }
 0x1f1   :  { %v1882_v63 = vpack.c.bf16 %v1865_v39, %v1864_v13  ;;  %v1669_v5 = vadd.f32 %v5496_v29, %v7677_v60  ;;  %v5499_v6 = vadd.f32 %v5498_v59, %v5497_v47  ;;  %v6023_v60 = vld [vmem:[%s9713_s7 + $0x4] ss:$28 sps:$4 sm:$0xff]  }
 0x1f2   :  { %2833 = vmatprep.subr.bf16.mxu1 %v6023_v60  ;;  %v6054_v13 = vld [vmem:[%s9713_s7 + $0xe8] ss:$28 sps:$4 sm:$0xff]   ;;  %v6057_v59 = vld [vmem:[%s9713_s7 + $0x120] ss:$28 sps:$4 sm:$0xff]  }
 0x1f3   :  { %v1830_v31 = vadd.f32 %v7750_v38, %v1669_v5  ;;  %v1672_v52 = vadd.f32 %v5499_v6, %v7679_v2  ;;  %5688 = vmatprep.mubr.bf16.mxu1 %v1882_v63  ;;  %v7803_v38 = vld [vmem:[%s9712_s4] ss:$0 sm:$0xff]  ;;  %v6026_v2 = vld [vmem:[%s9713_s7 + $0x3c] ss:$28 sps:$4 sm:$0xff]   ;;  %2834 = vmatpush1.bf16.msra.mxu1 %v6021_v10 }
 0x1f4   :  { %2835 = vmatprep.subr.bf16.mxu1 %v6026_v2  ;;  %v6059_v29 = vld [vmem:[%s9713_s7 + $0x124] ss:$28 sps:$4 sm:$0xff]  }
 0x1f5   :  { %v1833_v35 = vadd.f32 %v7755_v44, %v1672_v52  ;;  %v1866_v58 = vmax.f32 %v1830_v31, 0.0 }
 0x1f7   :  { %v1867_v50 = vmax.f32 %v1833_v35, 0.0  ;;  %2836 = vmatpush1.bf16.msra.mxu1 %v6024_v19 }
 0x1f8   :  { %2837 = vmatprep.subr.bf16.mxu1 %v6029_v62 }
 0x1f9   :  { %v1883_v9 = vpack.c.bf16 %v1867_v50, %v1866_v58 }
 0x1fb   :  { %5689 = vmatmul.mubr.bf16.gmra.mrb[124].mxu1 %v1883_v9 }
 0x1fc   :  { %2838 = vmatpush1.bf16.msra.mxu1 %v6027_v11 }
 0x1fd   :  { %2839 = vmatprep.subr.bf16.mxu1 %v6032_v25 }
 0x200   :  { %2840 = vmatpush1.bf16.msra.mxu1 %v6030_v49 }
 0x201   :  { %2841 = vmatprep.subr.bf16.mxu1 %v6035_v30 }
 0x204   :  { %2842 = vmatpush1.bf16.msra.mxu1 %v6033_v53 }
 0x205   :  { %2843 = vmatprep.subr.bf16.mxu1 %v6044_v24 }
 0x208   :  { %2844 = vmatpush1.bf16.msra.mxu1 %v6042_v33 }
 0x209   :  { %2845 = vmatprep.subr.bf16.mxu1 %v6053_v45 }
 0x20c   :  { %2846 = vmatpush1.bf16.msra.mxu1 %v6051_v57 }
 0x25e   :  { %v5662_v44 = vpop.f32.mrb[96].mxu1 }
 0x25f   :  { %v1998_v56 = vadd.f32 %v5662_v44, %v7803_v38  ;;  %v1989_v20 = vpop.f32.mrb[97].mxu1 }
 0x260   :  { %v1990_v8 = vadd.f32 %v7803_v38, %v1989_v20  ;;  %v5663_v51 = vpop.f32.mrb[98].mxu1 }
 0x261   :  { %v2001_v48 = vadd.f32 %v5663_v51, %v7803_v38  ;;  %v1992_v61 = vpop.f32.mrb[99].mxu1  ;;  %v2118_v18 = vmax.f32 %v1998_v56, 0.0 }
 0x262   :  { %v1993_v15 = vadd.f32 %v7803_v38, %v1992_v61  ;;  %v2116_v16 = vmax.f32 %v1990_v8, 0.0 }
 0x263   :  { %v2119_v37 = vmax.f32 %v2001_v48, 0.0 }
 0x264   :  { %v2117_v1 = vmax.f32 %v1993_v15, 0.0 }
 0x265   :  { %v2149_v21 = vpack.c.bf16 %v2119_v37, %v2118_v18 }
 0x266   :  { %v2148_v54 = vpack.c.bf16 %v2117_v1, %v2116_v16 }
 0x268   :  { %5708 = vmatprep.mubr.bf16.mxu0 %v2148_v54 }
 0x269   :  { %5709 = vmatmul.mubr.bf16.vlgmr.msra.gmra.mrb[128].mxu0 %v2149_v21 }
 0x26a   :  { %3027 = vmatpush1.bf16.msra.mxu0 %v6036_v28 }
 0x26b   :  { %3028 = vmatprep.subr.bf16.mxu0 %v6041_v32 }
 0x26e   :  { %v5666_v26 = vpop.f32.mrb[100].mxu1  ;;  %3029 = vmatpush1.bf16.msra.mxu0 %v6039_v14 }
 0x26f   :  { %v2014_v23 = vadd.f32 %v5666_v26, %v7803_v38  ;;  %v2005_v36 = vpop.f32.mrb[101].mxu1  ;;  %3030 = vmatprep.subr.bf16.mxu0 %v6047_v17 }
 0x270   :  { %v2006_v40 = vadd.f32 %v7803_v38, %v2005_v36  ;;  %v5667_v27 = vpop.f32.mrb[102].mxu1 }
 0x271   :  { %v2122_v41 = vmax.f32 %v2014_v23, 0.0  ;;  %v2017_v0 = vadd.f32 %v5667_v27, %v7803_v38  ;;  %v2008_v4 = vpop.f32.mrb[103].mxu1 }
 0x272   :  { %v2120_v12 = vmax.f32 %v2006_v40, 0.0  ;;  %v2009_v7 = vadd.f32 %v7803_v38, %v2008_v4  ;;  %3031 = vmatpush1.bf16.msra.mxu0 %v6045_v42 }
 0x273   :  { %v2123_v34 = vmax.f32 %v2017_v0, 0.0  ;;  %3032 = vmatprep.subr.bf16.mxu0 %v6050_v46 }
 0x274   :  { %v2121_v22 = vmax.f32 %v2009_v7, 0.0 }
 0x275   :  { %v2151_v39 = vpack.c.bf16 %v2123_v34, %v2122_v41  ;;  %v6065_v34 = vld [vmem:[%s9713_s7 + $0x15c] ss:$28 sps:$4 sm:$0xff]  }
 0x276   :  { %v2150_v47 = vpack.c.bf16 %v2121_v22, %v2120_v12  ;;  %3033 = vmatpush1.bf16.msra.mxu0 %v6048_v43 }
 0x277   :  { %3034 = vmatprep.subr.bf16.mxu0 %v6056_v3 }
 0x278   :  { %5712 = vmatprep.mubr.bf16.mxu0 %v2150_v47 }
 0x279   :  { %5713 = vmatmul.mubr.bf16.gmra.mrb[132].mxu0 %v2151_v39 }
 0x27a   :  { %3035 = vmatpush1.bf16.msra.mxu0 %v6054_v13  ;;  %v6063_v13 = vld [vmem:[%s9713_s7 + $0x158] ss:$28 sps:$4 sm:$0xff]  }
 0x27b   :  { %3036 = vmatprep.subr.bf16.mxu0 %v6059_v29 }
 0x27e   :  { %v5670_v63 = vpop.f32.mrb[104].mxu1  ;;  %3037 = vmatpush1.bf16.msra.mxu0 %v6057_v59 }
 0x27f   :  { %v2030_v5 = vadd.f32 %v5670_v63, %v7803_v38  ;;  %v2021_v6 = vpop.f32.mrb[105].mxu1  ;;  %3038 = vmatprep.subr.bf16.mxu0 %v6065_v34 }
 0x280   :  { %v2022_v31 = vadd.f32 %v7803_v38, %v2021_v6  ;;  %v5671_v52 = vpop.f32.mrb[106].mxu1  ;;  %v6062_v6 = vld [vmem:[%s9713_s7 + $0x18c] ss:$28 sps:$4 sm:$0xff]  }
 0x281   :  { %v2033_v35 = vadd.f32 %v5671_v52, %v7803_v38  ;;  %v2024_v58 = vpop.f32.mrb[107].mxu1  ;;  %v2126_v9 = vmax.f32 %v2030_v5, 0.0  ;;  %2847 = vmatprep.subr.bf16.mxu1 %v6062_v6 }
 0x282   :  { %v2025_v50 = vadd.f32 %v7803_v38, %v2024_v58  ;;  %v2124_v60 = vmax.f32 %v2022_v31, 0.0  ;;  %3039 = vmatpush1.bf16.msra.mxu0 %v6063_v13  ;;  %v6068_v31 = vld [vmem:[%s9713_s7 + $0x194] ss:$28 sps:$4 sm:$0xff]  }
 0x283   :  { %v2127_v10 = vmax.f32 %v2033_v35, 0.0  ;;  %v6060_v35 = vld [vmem:[%s9713_s7 + $0x188] ss:$28 sps:$4 sm:$0xff]   ;;  %v6066_v58 = vld [vmem:[%s9713_s7 + $0x190] ss:$28 sps:$4 sm:$0xff]   ;;  %3040 = vmatprep.subr.bf16.mxu0 %v6068_v31 }
 0x284   :  { %v2125_v2 = vmax.f32 %v2025_v50, 0.0  ;;  %2848 = vmatpush1.bf16.msra.mxu1 %v6060_v35 }
 0x285   :  { %v2153_v44 = vpack.c.bf16 %v2127_v10, %v2126_v9 }
 0x286   :  { %v2152_v19 = vpack.c.bf16 %v2125_v2, %v2124_v60  ;;  %3041 = vmatpush1.bf16.msra.mxu0 %v6066_v58  ;;  %v6081_v58 = vld [vmem:[%s9713_s7 + $0xf0] ss:$28 sps:$4 sm:$0xff]  }
 0x288   :  { %5716 = vmatprep.mubr.bf16.mxu0 %v2152_v19 }
 0x289   :  { %5717 = vmatmul.mubr.bf16.gmra.mrb[136].mxu0 %v2153_v44  ;;  %v6998_v44 = vmov 0  }
 0x28a   :  { %2865 = vmatprep.mubr.bf16.mxu1 %v6998_v44 }
 0x28e   :  { %v5674_v56 = vpop.f32.mrb[108].mxu1 }
 0x28f   :  { %v2046_v20 = vadd.f32 %v5674_v56, %v7803_v38  ;;  %v2037_v62 = vpop.f32.mrb[109].mxu1  ;;  %v6071_v56 = vld [vmem:[%s9713_s7 + $0x14] ss:$28 sps:$4 sm:$0xff]  }
 0x290   :  { %v2038_v8 = vadd.f32 %v7803_v38, %v2037_v62  ;;  %v5675_v51 = vpop.f32.mrb[110].mxu1  ;;  %3219 = vmatprep.subr.bf16.mxu1 %v6071_v56  ;;  %v6089_v56 = vld [vmem:[%s9713_s7 + $0x160] ss:$28 sps:$4 sm:$0xff]  }
 0x291   :  { %v2049_v48 = vadd.f32 %v5675_v51, %v7803_v38  ;;  %v2040_v61 = vpop.f32.mrb[111].mxu1  ;;  %v2130_v11 = vmax.f32 %v2046_v20, 0.0 }
 0x292   :  { %v2041_v15 = vadd.f32 %v7803_v38, %v2040_v61  ;;  %v2128_v18 = vmax.f32 %v2038_v8, 0.0 }
 0x293   :  { %v2131_v55 = vmax.f32 %v2049_v48, 0.0 }
 0x294   :  { %v2129_v37 = vmax.f32 %v2041_v15, 0.0 }
 0x295   :  { %v2155_v25 = vpack.c.bf16 %v2131_v55, %v2130_v11 }
 0x296   :  { %v2154_v16 = vpack.c.bf16 %v2129_v37, %v2128_v18 }
 0x298   :  { %5720 = vmatprep.mubr.bf16.mxu0 %v2154_v16 }
 0x299   :  { %5721 = vmatmul.mubr.bf16.gmra.mrb[140].mxu0 %v2155_v25 }
 0x29e   :  { %v5678_v1 = vpop.f32.mrb[112].mxu1 }
 0x29f   :  { %v2062_v21 = vadd.f32 %v5678_v1, %v7803_v38  ;;  %v2053_v49 = vpop.f32.mrb[113].mxu1 }
 0x2a0   :  { %v2054_v30 = vadd.f32 %v7803_v38, %v2053_v49  ;;  %v5679_v54 = vpop.f32.mrb[114].mxu1  ;;  %v7938_v49 = vld [vmem:[%s9714_s6] ss:$0 sm:$0xff] }
 0x2a1   :  { %v2065_v28 = vadd.f32 %v5679_v54, %v7803_v38  ;;  %v2056_v32 = vpop.f32.mrb[115].mxu1  ;;  %v2134_v14 = vmax.f32 %v2062_v21, 0.0  ;;  %v6084_v21 = vld [vmem:[%s9713_s7 + $0x18] ss:$28 sps:$4 sm:$0xff]  }
 0x2a2   :  { %v2057_v53 = vadd.f32 %v7803_v38, %v2056_v32  ;;  %v2132_v17 = vmax.f32 %v2054_v30, 0.0  ;;  %5740 = vmatprep.subr.bf16.mxu0 %v6084_v21 }
 0x2a3   :  { %v2135_v24 = vmax.f32 %v2065_v28, 0.0 }
 0x2a4   :  { %v2133_v33 = vmax.f32 %v2057_v53, 0.0 }
 0x2a5   :  { %v2157_v42 = vpack.c.bf16 %v2135_v24, %v2134_v14 }
 0x2a6   :  { %v2156_v46 = vpack.c.bf16 %v2133_v33, %v2132_v17 }
 0x2a8   :  { %5724 = vmatprep.mubr.bf16.mxu0 %v2156_v46 }
 0x2a9   :  { %5725 = vmatmul.mubr.bf16.gmra.mrb[144].mxu0 %v2157_v42 }
 0x2ae   :  { %v5682_v45 = vpop.f32.mrb[116].mxu1 }
 0x2af   :  { %v2078_v26 = vadd.f32 %v5682_v45, %v7803_v38  ;;  %v2069_v23 = vpop.f32.mrb[117].mxu1 }
 0x2b0   :  { %v2070_v36 = vadd.f32 %v7803_v38, %v2069_v23  ;;  %v5683_v40 = vpop.f32.mrb[118].mxu1 }
 0x2b1   :  { %v2081_v27 = vadd.f32 %v5683_v40, %v7803_v38  ;;  %v2072_v43 = vpop.f32.mrb[119].mxu1  ;;  %v2138_v41 = vmax.f32 %v2078_v26, 0.0  ;;  %v6069_v26 = vld [vmem:[%s9713_s7 + $0x10] ss:$28 sps:$4 sm:$0xff]  }
 0x2b2   :  { %v2073_v57 = vadd.f32 %v7803_v38, %v2072_v43  ;;  %v2136_v4 = vmax.f32 %v2070_v36, 0.0  ;;  %v6074_v36 = vld [vmem:[%s9713_s7 + $0x4c] ss:$28 sps:$4 sm:$0xff]   ;;  %v6077_v43 = vld [vmem:[%s9713_s7 + $0x84] ss:$28 sps:$4 sm:$0xff]  }
 0x2b3   :  { %v2139_v0 = vmax.f32 %v2081_v27, 0.0  ;;  %v6088_v40 = vld [vmem:[%s9713_s7 + $0x50] ss:$28 sps:$4 sm:$0xff]   ;;  %v6072_v27 = vld [vmem:[%s9713_s7 + $0x48] ss:$28 sps:$4 sm:$0xff]  }
 0x2b4   :  { %v2137_v3 = vmax.f32 %v2073_v57, 0.0 }
 0x2b5   :  { %v2159_v12 = vpack.c.bf16 %v2139_v0, %v2138_v41  ;;  %v6075_v41 = vld [vmem:[%s9713_s7 + $0x80] ss:$28 sps:$4 sm:$0xff]   ;;  %v6092_v0 = vld [vmem:[%s9713_s7 + $0x88] ss:$28 sps:$4 sm:$0xff]  }
 0x2b6   :  { %v2158_v7 = vpack.c.bf16 %v2137_v3, %v2136_v4 }
 0x2b8   :  { %5728 = vmatprep.mubr.bf16.mxu0 %v2158_v7 }
 0x2b9   :  { %5729 = vmatmul.mubr.bf16.gmra.mrb[148].mxu0 %v2159_v12  ;;  %v6080_v12 = vld [vmem:[%s9713_s7 + $0xbc] ss:$28 sps:$4 sm:$0xff]  }
 0x2be   :  { %v5686_v22 = vpop.f32.mrb[120].mxu1 }
 0x2bf   :  { %v2094_v39 = vadd.f32 %v5686_v22, %v7803_v38  ;;  %v2085_v29 = vpop.f32.mrb[121].mxu1  ;;  %v6093_v22 = vld [vmem:[%s9713_s7 + $0xc0] ss:$28 sps:$4 sm:$0xff]  }
 0x2c0   :  { %v2086_v47 = vadd.f32 %v7803_v38, %v2085_v29  ;;  %v5687_v59 = vpop.f32.mrb[122].mxu1 }
 0x2c1   :  { %v2097_v63 = vadd.f32 %v5687_v59, %v7803_v38  ;;  %v2088_v5 = vpop.f32.mrb[123].mxu1  ;;  %v2142_v50 = vmax.f32 %v2094_v39, 0.0 }
 0x2c2   :  { %v2089_v52 = vadd.f32 %v7803_v38, %v2088_v5  ;;  %v2140_v10 = vmax.f32 %v2086_v47, 0.0  ;;  %v6078_v47 = vld [vmem:[%s9713_s7 + $0xb8] ss:$28 sps:$4 sm:$0xff]  }
 0x2c3   :  { %v2143_v9 = vmax.f32 %v2097_v63, 0.0  ;;  %v6083_v5 = vld [vmem:[%s9713_s7 + $0xf4] ss:$28 sps:$4 sm:$0xff]  }
 0x2c4   :  { %v2141_v60 = vmax.f32 %v2089_v52, 0.0 }
 0x2c5   :  { %v2161_v2 = vpack.c.bf16 %v2143_v9, %v2142_v50  ;;  %v6097_v50 = vld [vmem:[%s9713_s7 + $0xf8] ss:$28 sps:$4 sm:$0xff]   ;;  %v6087_v9 = vld [vmem:[%s9713_s7 + $0x12c] ss:$28 sps:$4 sm:$0xff]  }
 0x2c6   :  { %v2160_v19 = vpack.c.bf16 %v2141_v60, %v2140_v10  ;;  %v6098_v10 = vld [vmem:[%s9713_s7 + $0x130] ss:$28 sps:$4 sm:$0xff]   ;;  %v6085_v60 = vld [vmem:[%s9713_s7 + $0x128] ss:$28 sps:$4 sm:$0xff]  }
 0x2c8   :  { %5732 = vmatprep.mubr.bf16.mxu0 %v2160_v19 }
 0x2c9   :  { %5733 = vmatmul.mubr.bf16.gmra.mrb[152].mxu0 %v2161_v2  ;;  %v6091_v2 = vld [vmem:[%s9713_s7 + $0x164] ss:$28 sps:$4 sm:$0xff]  }
 0x2ce   :  { %v5690_v20 = vpop.f32.mrb[124].mxu1 }
 0x2cf   :  { %v2110_v62 = vadd.f32 %v5690_v20, %v7803_v38  ;;  %v2101_v8 = vpop.f32.mrb[125].mxu1  ;;  %v6099_v20 = vld [vmem:[%s9713_s7 + $0x168] ss:$28 sps:$4 sm:$0xff]  }
 0x2d0   :  { %v2102_v51 = vadd.f32 %v7803_v38, %v2101_v8  ;;  %v5691_v48 = vpop.f32.mrb[126].mxu1 }
 0x2d1   :  { %v2113_v61 = vadd.f32 %v5691_v48, %v7803_v38  ;;  %v2104_v15 = vpop.f32.mrb[127].mxu1  ;;  %v2146_v55 = vmax.f32 %v2110_v62, 0.0 }
 0x2d2   :  { %v2105_v11 = vadd.f32 %v7803_v38, %v2104_v15  ;;  %v2144_v37 = vmax.f32 %v2102_v51, 0.0  ;;  %v6096_v51 = vld [vmem:[%s9713_s7 + $0x19c] ss:$28 sps:$4 sm:$0xff]  }
 0x2d3   :  { %v2147_v18 = vmax.f32 %v2113_v61, 0.0  ;;  %v6100_v15 = vld [vmem:[%s9713_s7 + $0x1a0] ss:$28 sps:$4 sm:$0xff]  }
 0x2d4   :  { %v2145_v25 = vmax.f32 %v2105_v11, 0.0 }
 0x2d5   :  { %v2163_v16 = vpack.c.bf16 %v2147_v18, %v2146_v55 }
 0x2d6   :  { %v2162_v1 = vpack.c.bf16 %v2145_v25, %v2144_v37  ;;  %v6094_v37 = vld [vmem:[%s9713_s7 + $0x198] ss:$28 sps:$4 sm:$0xff]  }
 0x2d8   :  { %5736 = vmatprep.mubr.bf16.mxu0 %v2162_v1 }
 0x2d9   :  { %5737 = vmatmul.mubr.bf16.gmra.mrb[156].mxu0 %v2163_v16 }
 0x2da   :  { %3058 = vmatprep.mubr.bf16.mxu0 %v6998_v44 }
 0x33c   :  { %v5710_v38 = vpop.f32.mrb[128].mxu0 }
 0x33d   :  { %v2278_v30 = vadd.f32 %v5710_v38, %v7938_v49  ;;  %v2269_v54 = vpop.f32.mrb[129].mxu0 }
 0x33e   :  { %v2270_v28 = vadd.f32 %v7938_v49, %v2269_v54  ;;  %v5711_v32 = vpop.f32.mrb[130].mxu0 }
 0x33f   :  { %v2281_v53 = vadd.f32 %v5711_v32, %v7938_v49  ;;  %v2272_v14 = vpop.f32.mrb[131].mxu0  ;;  %v2398_v17 = vmax.f32 %v2278_v30, 0.0 }
 0x340   :  { %v2273_v24 = vadd.f32 %v7938_v49, %v2272_v14  ;;  %v2396_v42 = vmax.f32 %v2270_v28, 0.0 }
 0x341   :  { %v2399_v33 = vmax.f32 %v2281_v53, 0.0 }
 0x342   :  { %v2397_v46 = vmax.f32 %v2273_v24, 0.0 }
 0x343   :  { %v7944_v45 = vpack.c.bf16 %v2399_v33, %v2398_v17 }
 0x344   :  { %v7949_v23 = vpack.c.bf16 %v2397_v46, %v2396_v42 }
 0x346   :  { %2866 = vmatmul.mubr.bf16.vlgmr.msra.gmra.mrb[128].mxu1 %v7949_v23  ;;  %3059 = vmatmul.mubr.bf16.vlgmr.msra.gmra.mrb[160].mxu0 %v7949_v23 }
 0x347   :  { %3220 = vmatpush1.bf16.msra.mxu1 %v6069_v26  ;;  %2875 = vmatprep.mubr.bf16.mxu1 %v6998_v44 }
 0x348   :  { %3068 = vmatprep.mubr.bf16.mxu0 %v6998_v44  ;;  %3221 = vmatprep.subr.bf16.mxu1 %v6074_v36 }
 0x349   :  { %5741 = vmatpush3.bf16.msra.mxu0 %v6084_v21 }
 0x34a   :  { %5742 = vmatprep.subr.bf16.mxu0 %v6088_v40 }
 0x34b   :  { %3222 = vmatpush1.bf16.msra.mxu1 %v6072_v27 }
 0x34c   :  { %v5714_v57 = vpop.f32.mrb[132].mxu0  ;;  %3223 = vmatprep.subr.bf16.mxu1 %v6077_v43 }
 0x34d   :  { %v2294_v4 = vadd.f32 %v5714_v57, %v7938_v49  ;;  %v2285_v3 = vpop.f32.mrb[133].mxu0  ;;  %5743 = vmatpush3.bf16.msra.mxu0 %v6088_v40 }
 0x34e   :  { %v2286_v7 = vadd.f32 %v7938_v49, %v2285_v3  ;;  %v5715_v34 = vpop.f32.mrb[134].mxu0  ;;  %2876 = vmatmul.mubr.bf16.gmra.mrb[132].mxu1 %v7944_v45  ;;  %3069 = vmatmul.mubr.bf16.gmra.mrb[164].mxu0 %v7944_v45 }
 0x34f   :  { %v2297_v13 = vadd.f32 %v5715_v34, %v7938_v49  ;;  %v2288_v39 = vpop.f32.mrb[135].mxu0  ;;  %2885 = vmatprep.mubr.bf16.mxu1 %v6998_v44  ;;  %3078 = vmatprep.mubr.bf16.mxu0 %v6998_v44  ;;  %v2402_v59 = vmax.f32 %v2294_v4, 0.0 }
 0x350   :  { %v2289_v29 = vadd.f32 %v7938_v49, %v2288_v39  ;;  %3224 = vmatpush1.bf16.msra.mxu1 %v6075_v41  ;;  %5744 = vmatprep.subr.bf16.mxu0 %v6092_v0  ;;  %v2400_v6 = vmax.f32 %v2286_v7, 0.0 }
 0x351   :  { %v2403_v63 = vmax.f32 %v2297_v13, 0.0  ;;  %3225 = vmatprep.subr.bf16.mxu1 %v6080_v12  ;;  %5745 = vmatpush3.bf16.msra.mxu0 %v6092_v0 }
 0x352   :  { %v2401_v31 = vmax.f32 %v2289_v29, 0.0  ;;  %5746 = vmatprep.subr.bf16.mxu0 %v6093_v22 }
 0x353   :  { %v7993_v52 = vpack.c.bf16 %v2403_v63, %v2402_v59 }
 0x354   :  { %v7995_v35 = vpack.c.bf16 %v2401_v31, %v2400_v6  ;;  %3226 = vmatpush1.bf16.msra.mxu1 %v6078_v47 }
 0x355   :  { %3227 = vmatprep.subr.bf16.mxu1 %v6083_v5  ;;  %5747 = vmatpush3.bf16.msra.mxu0 %v6093_v22 }
 0x356   :  { %2886 = vmatmul.mubr.bf16.gmra.mrb[136].mxu1 %v7995_v35  ;;  %3079 = vmatmul.mubr.bf16.gmra.mrb[168].mxu0 %v7995_v35 }
 0x357   :  { %2895 = vmatprep.mubr.bf16.mxu1 %v6998_v44  ;;  %3088 = vmatprep.mubr.bf16.mxu0 %v6998_v44 }
 0x358   :  { %3228 = vmatpush1.bf16.msra.mxu1 %v6081_v58  ;;  %5748 = vmatprep.subr.bf16.mxu0 %v6097_v50 }
 0x359   :  { %3229 = vmatprep.subr.bf16.mxu1 %v6087_v9  ;;  %5749 = vmatpush3.bf16.msra.mxu0 %v6097_v50 }
 0x35a   :  { %5750 = vmatprep.subr.bf16.mxu0 %v6098_v10 }
 0x35c   :  { %v5718_v19 = vpop.f32.mrb[136].mxu0  ;;  %3230 = vmatpush1.bf16.msra.mxu1 %v6085_v60 }
 0x35d   :  { %v2310_v62 = vadd.f32 %v5718_v19, %v7938_v49  ;;  %v2301_v8 = vpop.f32.mrb[137].mxu0  ;;  %3231 = vmatprep.subr.bf16.mxu1 %v6091_v2  ;;  %5751 = vmatpush3.bf16.msra.mxu0 %v6098_v10 }
 0x35e   :  { %v2302_v48 = vadd.f32 %v7938_v49, %v2301_v8  ;;  %v5719_v61 = vpop.f32.mrb[138].mxu0  ;;  %2896 = vmatmul.mubr.bf16.gmra.mrb[140].mxu1 %v7993_v52  ;;  %3089 = vmatmul.mubr.bf16.gmra.mrb[172].mxu0 %v7993_v52 }
 0x35f   :  { %v2313_v11 = vadd.f32 %v5719_v61, %v7938_v49  ;;  %v2304_v55 = vpop.f32.mrb[139].mxu0  ;;  %2905 = vmatprep.mubr.bf16.mxu1 %v6998_v44  ;;  %3098 = vmatprep.mubr.bf16.mxu0 %v6998_v44  ;;  %v2406_v25 = vmax.f32 %v2310_v62, 0.0 }
 0x360   :  { %v2305_v18 = vadd.f32 %v7938_v49, %v2304_v55  ;;  %3232 = vmatpush1.bf16.msra.mxu1 %v6089_v56  ;;  %5752 = vmatprep.subr.bf16.mxu0 %v6099_v20  ;;  %v2404_v1 = vmax.f32 %v2302_v48, 0.0 }
 0x361   :  { %v2407_v16 = vmax.f32 %v2313_v11, 0.0  ;;  %3233 = vmatprep.subr.bf16.mxu1 %v6096_v51  ;;  %5753 = vmatpush3.bf16.msra.mxu0 %v6099_v20 }
 0x362   :  { %v2405_v21 = vmax.f32 %v2305_v18, 0.0  ;;  %5754 = vmatprep.subr.bf16.mxu0 %v6100_v15 }
 0x363   :  { %v8042_v38 = vpack.c.bf16 %v2407_v16, %v2406_v25 }
 0x364   :  { %v8044_v30 = vpack.c.bf16 %v2405_v21, %v2404_v1  ;;  %3234 = vmatpush1.bf16.msra.mxu1 %v6094_v37 }
 0x365   :  { %5755 = vmatpush3.bf16.msra.mxu0 %v6100_v15 }
 0x366   :  { %2906 = vmatmul.mubr.bf16.gmra.mrb[144].mxu1 %v8044_v30  ;;  %3099 = vmatmul.mubr.bf16.gmra.mrb[176].mxu0 %v8044_v30 }
 0x367   :  { %2915 = vmatprep.mubr.bf16.mxu1 %v6998_v44  ;;  %3108 = vmatprep.mubr.bf16.mxu0 %v6998_v44 }
 0x36c   :  { %v5722_v54 = vpop.f32.mrb[140].mxu0 }
 0x36d   :  { %v2326_v28 = vadd.f32 %v5722_v54, %v7938_v49  ;;  %v2317_v32 = vpop.f32.mrb[141].mxu0 }
 0x36e   :  { %v2318_v53 = vadd.f32 %v7938_v49, %v2317_v32  ;;  %v5723_v14 = vpop.f32.mrb[142].mxu0  ;;  %2916 = vmatmul.mubr.bf16.gmra.mrb[148].mxu1 %v8042_v38  ;;  %3109 = vmatmul.mubr.bf16.gmra.mrb[180].mxu0 %v8042_v38 }
 0x36f   :  { %v2329_v24 = vadd.f32 %v5723_v14, %v7938_v49  ;;  %v2320_v17 = vpop.f32.mrb[143].mxu0  ;;  %2925 = vmatprep.mubr.bf16.mxu1 %v6998_v44  ;;  %3118 = vmatprep.mubr.bf16.mxu0 %v6998_v44  ;;  %v2410_v42 = vmax.f32 %v2326_v28, 0.0 }
 0x370   :  { %v2321_v33 = vadd.f32 %v7938_v49, %v2320_v17  ;;  %v2408_v26 = vmax.f32 %v2318_v53, 0.0 }
 0x371   :  { %v2411_v46 = vmax.f32 %v2329_v24, 0.0 }
 0x372   :  { %v2409_v36 = vmax.f32 %v2321_v33, 0.0 }
 0x373   :  { %v8058_v40 = vpack.c.bf16 %v2411_v46, %v2410_v42 }
 0x374   :  { %v8060_v27 = vpack.c.bf16 %v2409_v36, %v2408_v26 }
 0x376   :  { %2926 = vmatmul.mubr.bf16.gmra.mrb[152].mxu1 %v8060_v27  ;;  %3119 = vmatmul.mubr.bf16.gmra.mrb[184].mxu0 %v8060_v27 }
 0x377   :  { %2935 = vmatprep.mubr.bf16.mxu1 %v6998_v44  ;;  %3128 = vmatprep.mubr.bf16.mxu0 %v6998_v44 }
 0x37c   :  { %v5726_v43 = vpop.f32.mrb[144].mxu0 }
 0x37d   :  { %v2342_v57 = vadd.f32 %v5726_v43, %v7938_v49  ;;  %v2333_v41 = vpop.f32.mrb[145].mxu0 }
 0x37e   :  { %v2334_v0 = vadd.f32 %v7938_v49, %v2333_v41  ;;  %v5727_v4 = vpop.f32.mrb[146].mxu0  ;;  %2936 = vmatmul.mubr.bf16.gmra.mrb[156].mxu1 %v8058_v40  ;;  %3129 = vmatmul.mubr.bf16.gmra.mrb[188].mxu0 %v8058_v40 }
 0x37f   :  { %v2345_v3 = vadd.f32 %v5727_v4, %v7938_v49  ;;  %v2336_v12 = vpop.f32.mrb[147].mxu0  ;;  %2945 = vmatprep.mubr.bf16.mxu1 %v6998_v44  ;;  %3138 = vmatprep.mubr.bf16.mxu0 %v6998_v44  ;;  %v2414_v34 = vmax.f32 %v2342_v57, 0.0 }
 0x380   :  { %v2337_v7 = vadd.f32 %v7938_v49, %v2336_v12  ;;  %v2412_v13 = vmax.f32 %v2334_v0, 0.0 }
 0x381   :  { %v2415_v22 = vmax.f32 %v2345_v3, 0.0 }
 0x382   :  { %v2413_v39 = vmax.f32 %v2337_v7, 0.0 }
 0x383   :  { %v8074_v29 = vpack.c.bf16 %v2415_v22, %v2414_v34 }
 0x384   :  { %v8076_v47 = vpack.c.bf16 %v2413_v39, %v2412_v13 }
 0x386   :  { %2946 = vmatmul.mubr.bf16.gmra.mrb[160].mxu1 %v8076_v47  ;;  %3139 = vmatmul.mubr.bf16.gmra.mrb[192].mxu0 %v8076_v47 }
 0x387   :  { %2955 = vmatprep.mubr.bf16.mxu1 %v6998_v44  ;;  %3148 = vmatprep.mubr.bf16.mxu0 %v6998_v44 }
 0x38c   :  { %v5730_v59 = vpop.f32.mrb[148].mxu0 }
 0x38d   :  { %v2358_v63 = vadd.f32 %v5730_v59, %v7938_v49  ;;  %v2349_v5 = vpop.f32.mrb[149].mxu0 }
 0x38e   :  { %v2350_v6 = vadd.f32 %v7938_v49, %v2349_v5  ;;  %v5731_v31 = vpop.f32.mrb[150].mxu0  ;;  %2956 = vmatmul.mubr.bf16.gmra.mrb[164].mxu1 %v8074_v29  ;;  %3149 = vmatmul.mubr.bf16.gmra.mrb[196].mxu0 %v8074_v29 }
 0x38f   :  { %v2361_v58 = vadd.f32 %v5731_v31, %v7938_v49  ;;  %v2352_v50 = vpop.f32.mrb[151].mxu0  ;;  %2965 = vmatprep.mubr.bf16.mxu1 %v6998_v44  ;;  %3158 = vmatprep.mubr.bf16.mxu0 %v6998_v44  ;;  %v2418_v10 = vmax.f32 %v2358_v63, 0.0 }
 0x390   :  { %v2353_v9 = vadd.f32 %v7938_v49, %v2352_v50  ;;  %v2416_v2 = vmax.f32 %v2350_v6, 0.0 }
 0x391   :  { %v2419_v60 = vmax.f32 %v2361_v58, 0.0 }
 0x392   :  { %v2417_v19 = vmax.f32 %v2353_v9, 0.0 }
 0x393   :  { %v8090_v56 = vpack.c.bf16 %v2419_v60, %v2418_v10 }
 0x394   :  { %v8092_v20 = vpack.c.bf16 %v2417_v19, %v2416_v2 }
 0x396   :  { %2966 = vmatmul.mubr.bf16.gmra.mrb[168].mxu1 %v8092_v20  ;;  %3159 = vmatmul.mubr.bf16.gmra.mrb[200].mxu0 %v8092_v20 }
 0x397   :  { %2975 = vmatprep.mubr.bf16.mxu1 %v6998_v44  ;;  %3168 = vmatprep.mubr.bf16.mxu0 %v6998_v44 }
 0x39c   :  { %v5734_v62 = vpop.f32.mrb[152].mxu0 }
 0x39d   :  { %v2374_v8 = vadd.f32 %v5734_v62, %v7938_v49  ;;  %v2365_v51 = vpop.f32.mrb[153].mxu0 }
 0x39e   :  { %v2366_v48 = vadd.f32 %v7938_v49, %v2365_v51  ;;  %v5735_v61 = vpop.f32.mrb[154].mxu0  ;;  %2976 = vmatmul.mubr.bf16.gmra.mrb[172].mxu1 %v8090_v56  ;;  %3169 = vmatmul.mubr.bf16.gmra.mrb[204].mxu0 %v8090_v56 }
 0x39f   :  { %v2377_v15 = vadd.f32 %v5735_v61, %v7938_v49  ;;  %v2368_v11 = vpop.f32.mrb[155].mxu0  ;;  %2985 = vmatprep.mubr.bf16.mxu1 %v6998_v44  ;;  %3178 = vmatprep.mubr.bf16.mxu0 %v6998_v44  ;;  %v2422_v18 = vmax.f32 %v2374_v8, 0.0 }
 0x3a0   :  { %v2369_v55 = vadd.f32 %v7938_v49, %v2368_v11  ;;  %v2420_v25 = vmax.f32 %v2366_v48, 0.0 }
 0x3a1   :  { %v2423_v37 = vmax.f32 %v2377_v15, 0.0 }
 0x3a2   :  { %v2421_v16 = vmax.f32 %v2369_v55, 0.0 }
 0x3a3   :  { %v8106_v1 = vpack.c.bf16 %v2423_v37, %v2422_v18 }
 0x3a4   :  { %v8108_v21 = vpack.c.bf16 %v2421_v16, %v2420_v25 }
 0x3a6   :  { %2986 = vmatmul.mubr.bf16.gmra.mrb[176].mxu1 %v8108_v21  ;;  %3179 = vmatmul.mubr.bf16.gmra.mrb[208].mxu0 %v8108_v21 }
 0x3a7   :  { %2995 = vmatprep.mubr.bf16.mxu1 %v6998_v44  ;;  %3188 = vmatprep.mubr.bf16.mxu0 %v6998_v44 }
 0x3ac   :  { %v5738_v54 = vpop.f32.mrb[156].mxu0 }
 0x3ad   :  { %v2390_v28 = vadd.f32 %v5738_v54, %v7938_v49  ;;  %v2381_v32 = vpop.f32.mrb[157].mxu0 }
 0x3ae   :  { %v2382_v53 = vadd.f32 %v7938_v49, %v2381_v32  ;;  %v5739_v14 = vpop.f32.mrb[158].mxu0  ;;  %2996 = vmatmul.mubr.bf16.gmra.mrb[180].mxu1 %v8106_v1  ;;  %3189 = vmatmul.mubr.bf16.gmra.mrb[212].mxu0 %v8106_v1 }
 0x3af   :  { %v2393_v24 = vadd.f32 %v5739_v14, %v7938_v49  ;;  %v2384_v17 = vpop.f32.mrb[159].mxu0  ;;  %3005 = vmatprep.mubr.bf16.mxu1 %v6998_v44  ;;  %3198 = vmatprep.mubr.bf16.mxu0 %v6998_v44  ;;  %v2426_v42 = vmax.f32 %v2390_v28, 0.0 }
 0x3b0   :  { %v2385_v33 = vadd.f32 %v7938_v49, %v2384_v17  ;;  %v2424_v26 = vmax.f32 %v2382_v53, 0.0  ;;  %v2510_v49 = vlaneseq }
 0x3b1   :  { %v2427_v46 = vmax.f32 %v2393_v24, 0.0 }
 0x3b2   :  { %v2425_v36 = vmax.f32 %v2385_v33, 0.0 }
 0x3b3   :  { %v8122_v43 = vpack.c.bf16 %v2427_v46, %v2426_v42 }
 0x3b4   :  { %v8124_v57 = vpack.c.bf16 %v2425_v36, %v2424_v26 }
 0x3b6   :  { %3006 = vmatmul.mubr.bf16.gmra.mrb[184].mxu1 %v8124_v57  ;;  %3199 = vmatmul.mubr.bf16.gmra.mrb[216].mxu0 %v8124_v57 }
 0x3b7   :  { %3015 = vmatprep.mubr.bf16.mxu1 %v6998_v44  ;;  %3208 = vmatprep.mubr.bf16.mxu0 %v6998_v44 }
 0x3be   :  { %3016 = vmatmul.mubr.bf16.gmra.mrb[188].mxu1 %v8122_v43  ;;  %3209 = vmatmul.mubr.bf16.gmra.mrb[220].mxu0 %v8122_v43 }
 0x3bf   :  { %5756 = vmatprep.mubr.bf16.mxu0 %v7949_v23  ;;  %3251 = vmatprep.mubr.bf16.mxu1 %v6998_v44 }
 0x3c6   :  { %3252 = vmatmul.mubr.bf16.vlgmr.msra.gmra.mrb[192].mxu1 %v7949_v23  ;;  %5757 = vmatmul.mubr.bf16.vlgmr.msra.gmra.mrb[224].mxu0 %v7944_v45 }
 0x3c7   :  { %5760 = vmatprep.mubr.bf16.mxu0 %v7995_v35  ;;  %3261 = vmatprep.mubr.bf16.mxu1 %v6998_v44 }
 0x3ce   :  { %3262 = vmatmul.mubr.bf16.gmra.mrb[196].mxu1 %v7944_v45  ;;  %5761 = vmatmul.mubr.bf16.gmra.mrb[228].mxu0 %v7993_v52  ;;  %v8168_v45 = vshrl.u32 %v2510_v49, 7 }
 0x3cf   :  { %5764 = vmatprep.mubr.bf16.mxu0 %v8044_v30  ;;  %3271 = vmatprep.mubr.bf16.mxu1 %v6998_v44 }
 0x3d0   :  { %9719 = vst [vmem:[#allocation2_spill] sm:$0xff] %v8168_v45  ;;  %v2512_v23 = vsub.s32 0, %v8168_v45 }
 0x3d6   :  { %3272 = vmatmul.mubr.bf16.gmra.mrb[200].mxu1 %v7995_v35  ;;  %5765 = vmatmul.mubr.bf16.gmra.mrb[232].mxu0 %v8042_v38  ;;  %v2508_v35 = vld [vmem:[%s9715_s8] sm:$0xff] }
 0x3d7   :  { %5768 = vmatprep.mubr.bf16.mxu0 %v8060_v27  ;;  %3281 = vmatprep.mubr.bf16.mxu1 %v6998_v44 }
 0x3de   :  { %3282 = vmatmul.mubr.bf16.gmra.mrb[204].mxu1 %v7993_v52  ;;  %5769 = vmatmul.mubr.bf16.gmra.mrb[236].mxu0 %v8058_v40  ;;  %v2520_v52 = vsub.s32 2, %v8168_v45 }
 0x3df   :  { %5772 = vmatprep.mubr.bf16.mxu0 %v8076_v47  ;;  %3291 = vmatprep.mubr.bf16.mxu1 %v6998_v44 }
 0x3e6   :  { %3292 = vmatmul.mubr.bf16.gmra.mrb[208].mxu1 %v8044_v30  ;;  %5773 = vmatmul.mubr.bf16.gmra.mrb[240].mxu0 %v8074_v29  ;;  %v2524_v30 = vsub.s32 3, %v8168_v45 }
 0x3e7   :  { %5776 = vmatprep.mubr.bf16.mxu0 %v8092_v20  ;;  %3301 = vmatprep.mubr.bf16.mxu1 %v6998_v44 }
 0x3e8   :  { %v8185_v0 = vrot.slane %v2508_v35, %v2524_v30 }
 0x3ee   :  { %3302 = vmatmul.mubr.bf16.gmra.mrb[212].mxu1 %v8042_v38  ;;  %5777 = vmatmul.mubr.bf16.gmra.mrb[244].mxu0 %v8090_v56  ;;  %v2516_v38 = vsub.s32 1, %v8168_v45 }
 0x3ef   :  { %5780 = vmatprep.mubr.bf16.mxu0 %v8108_v21  ;;  %3311 = vmatprep.mubr.bf16.mxu1 %v6998_v44 }
 0x3f0   :  { %v8183_v41 = vrot.slane %v2508_v35, %v2516_v38 }
 0x3f6   :  { %3312 = vmatmul.mubr.bf16.gmra.mrb[216].mxu1 %v8060_v27  ;;  %5781 = vmatmul.mubr.bf16.gmra.mrb[248].mxu0 %v8106_v1  ;;  %v8181_v27 = vrot.slane %v2508_v35, %v2520_v52 }
 0x3f7   :  { %5784 = vmatprep.mubr.bf16.mxu0 %v8124_v57  ;;  %3321 = vmatprep.mubr.bf16.mxu1 %v6998_v44 }
 0x3fe   :  { %3322 = vmatmul.mubr.bf16.gmra.mrb[220].mxu1 %v8058_v40  ;;  %5785 = vmatmul.mubr.bf16.gmra.mrb[252].mxu0 %v8122_v43  ;;  %v8179_v40 = vrot.slane %v2508_v35, %v2512_v23 }
 0x3ff   :  { %3331 = vmatprep.mubr.bf16.mxu1 %v6998_v44 }
 0x406   :  { %3332 = vmatmul.mubr.bf16.gmra.mrb[224].mxu1 %v8076_v47 }
 0x407   :  { %3341 = vmatprep.mubr.bf16.mxu1 %v6998_v44 }
 0x40e   :  { %3342 = vmatmul.mubr.bf16.gmra.mrb[228].mxu1 %v8074_v29 }
 0x40f   :  { %3351 = vmatprep.mubr.bf16.mxu1 %v6998_v44 }
 0x416   :  { %3352 = vmatmul.mubr.bf16.gmra.mrb[232].mxu1 %v8092_v20 }
 0x417   :  { %3361 = vmatprep.mubr.bf16.mxu1 %v6998_v44 }
 0x419   :  { %v2867_v4 = vpop.f32.mrb[128].mxu1  ;;  %v3060_v3 = vpop.f32.mrb[160].mxu0 }
 0x41a   :  { %v2868_v12 = vadd.f32 %v2867_v4, %v8179_v40  ;;  %v3061_v7 = vadd.f32 %v3060_v3, %v8181_v27  ;;  %v2869_v34 = vpop.f32.mrb[129].mxu1  ;;  %v3062_v22 = vpop.f32.mrb[161].mxu0 }
 0x41b   :  { %v2870_v13 = vadd.f32 %v2869_v34, %v8183_v41  ;;  %v3063_v39 = vadd.f32 %v3062_v22, %v8185_v0  ;;  %v2871_v29 = vpop.f32.mrb[130].mxu1  ;;  %v3064_v47 = vpop.f32.mrb[162].mxu0 }
 0x41c   :  { %v3573_v59 = vsub.f32 0.0, %v2868_v12  ;;  %v3575_v63 = vsub.f32 0.0, %v3061_v7  ;;  %v2872_v5 = vadd.f32 %v2871_v29, %v8179_v40  ;;  %v3065_v6 = vadd.f32 %v3064_v47, %v8181_v27  ;;  %v2873_v31 = vpop.f32.mrb[131].mxu1  ;;  %v3066_v58 = vpop.f32.mrb[163].mxu0 }
 0x41d   :  { %v3574_v50 = vsub.f32 0.0, %v2870_v13  ;;  %v3576_v9 = vsub.f32 0.0, %v3063_v39  ;;  %v2874_v10 = vadd.f32 %v2873_v31, %v8183_v41  ;;  %v3067_v60 = vadd.f32 %v3066_v58, %v8185_v0 }
 0x41e   :  { %v3797_v2 = vmul.f32 1.442695, %v3573_v59  ;;  %v3801_v19 = vmul.f32 1.442695, %v3575_v63  ;;  %v3580_v20 = vsub.f32 0.0, %v2872_v5  ;;  %v3582_v62 = vsub.f32 0.0, %v3065_v6  ;;  %3362 = vmatmul.mubr.bf16.gmra.mrb[236].mxu1 %v8090_v56 }
 0x41f   :  { %v3799_v8 = vmul.f32 1.442695, %v3574_v50  ;;  %v3803_v51 = vmul.f32 1.442695, %v3576_v9  ;;  %v3581_v48 = vsub.f32 0.0, %v2874_v10  ;;  %v3583_v61 = vsub.f32 0.0, %v3067_v60  ;;  %3371 = vmatprep.mubr.bf16.mxu1 %v6998_v44 }
 0x420   :  { %6101 = vpow2.f32 %v3797_v2  ;;  %v3811_v15 = vmul.f32 1.442695, %v3580_v20  ;;  %v3815_v11 = vmul.f32 1.442695, %v3582_v62 }
 0x421   :  { %6103 = vpow2.f32 %v3801_v19  ;;  %v2877_v55 = vpop.f32.mrb[132].mxu1  ;;  %v3070_v18 = vpop.f32.mrb[164].mxu0  ;;  %v3813_v37 = vmul.f32 1.442695, %v3581_v48  ;;  %v3817_v28 = vmul.f32 1.442695, %v3583_v61 }
 0x422   :  { %6105 = vpow2.f32 %v3799_v8  ;;  %v2878_v25 = vadd.f32 %v2877_v55, %v8179_v40  ;;  %v3071_v16 = vadd.f32 %v3070_v18, %v8181_v27  ;;  %v2879_v54 = vpop.f32.mrb[133].mxu1  ;;  %v3072_v56 = vpop.f32.mrb[165].mxu0 }
 0x423   :  { %6107 = vpow2.f32 %v3803_v51  ;;  %v2880_v32 = vadd.f32 %v2879_v54, %v8183_v41  ;;  %v3073_v53 = vadd.f32 %v3072_v56, %v8185_v0  ;;  %v2881_v14 = vpop.f32.mrb[134].mxu1  ;;  %v3074_v24 = vpop.f32.mrb[166].mxu0 }
 0x424   :  { %6109 = vpow2.f32 %v3811_v15  ;;  %v3587_v17 = vsub.f32 0.0, %v2878_v25  ;;  %v3589_v33 = vsub.f32 0.0, %v3071_v16  ;;  %v2882_v42 = vadd.f32 %v2881_v14, %v8179_v40  ;;  %v2883_v46 = vpop.f32.mrb[135].mxu1  ;;  %v3076_v26 = vpop.f32.mrb[167].mxu0 }
 0x425   :  { %6111 = vpow2.f32 %v3815_v11  ;;  %v3588_v36 = vsub.f32 0.0, %v2880_v32  ;;  %v3590_v49 = vsub.f32 0.0, %v3073_v53  ;;  %v3075_v34 = vadd.f32 %v3074_v24, %v8181_v27 }
 0x426   :  { %6113 = vpow2.f32 %v3813_v37  ;;  %v3825_v23 = vmul.f32 1.442695, %v3587_v17  ;;  %v3829_v52 = vmul.f32 1.442695, %v3589_v33  ;;  %v3594_v35 = vsub.f32 0.0, %v2882_v42  ;;  %3372 = vmatmul.mubr.bf16.gmra.mrb[240].mxu1 %v8108_v21 }
 0x427   :  { %6115 = vpow2.f32 %v3817_v28  ;;  %v3827_v38 = vmul.f32 1.442695, %v3588_v36  ;;  %v3831_v30 = vmul.f32 1.442695, %v3590_v49  ;;  %3381 = vmatprep.mubr.bf16.mxu1 %v6998_v44  ;;  %v2884_v5 = vadd.f32 %v2883_v46, %v8183_v41 }
 0x428   :  { %6117 = vpow2.f32 %v3825_v23  ;;  %v3839_v4 = vmul.f32 1.442695, %v3594_v35  ;;  %v3596_v60 = vsub.f32 0.0, %v3075_v34  ;;  %v3077_v20 = vadd.f32 %v3076_v26, %v8185_v0 }
 0x429   :  { %6119 = vpow2.f32 %v3829_v52  ;;  %v2887_v3 = vpop.f32.mrb[136].mxu1  ;;  %v3080_v12 = vpop.f32.mrb[168].mxu0  ;;  %v3595_v51 = vsub.f32 0.0, %v2884_v5 }
 0x42a   :  { %v6102_v7 = vpop.eup %6101  ;;  %6121 = vpow2.f32 %v3827_v38  ;;  %v2889_v22 = vpop.f32.mrb[137].mxu1  ;;  %v2888_v15 = vadd.f32 %v2887_v3, %v8179_v40  ;;  %v3843_v37 = vmul.f32 1.442695, %v3596_v60  ;;  %v3081_v25 = vadd.f32 %v3080_v12, %v8181_v27 }
 0x42b   :  { %v3082_v13 = vpop.f32.mrb[169].mxu0  ;;  %v6104_v39 = vpop.eup %6103  ;;  %v4245_v29 = vadd.f32 1.0, %v6102_v7  ;;  %6123 = vpow2.f32 %v3831_v30  ;;  %v3597_v32 = vsub.f32 0.0, %v3077_v20  ;;  %v2890_v53 = vadd.f32 %v2889_v22, %v8183_v41 }
 0x42c   :  { %v2891_v21 = vpop.f32.mrb[138].mxu1  ;;  %v3084_v47 = vpop.f32.mrb[170].mxu0  ;;  %v4247_v63 = vadd.f32 1.0, %v6104_v39  ;;  %6125 = vpow2.f32 %v3839_v4  ;;  %v3841_v42 = vmul.f32 1.442695, %v3595_v51  ;;  %v3083_v46 = vadd.f32 %v3082_v13, %v8185_v0 }
 0x42d   :  { %v6106_v59 = vpop.eup %6105  ;;  %v2893_v6 = vpop.f32.mrb[139].mxu1  ;;  %6127 = vrcp.f32 %v4245_v29  ;;  %v3601_v52 = vsub.f32 0.0, %v2888_v15  ;;  %v2892_v35 = vadd.f32 %v2891_v21, %v8179_v40  ;;  %v3603_v4 = vsub.f32 0.0, %v3081_v25 }
 0x42e   :  { %v6108_v31 = vpop.eup %6107  ;;  %v4246_v58 = vadd.f32 1.0, %v6106_v59  ;;  %v8207_v50 = vpop.f32.mrb[171].mxu0  ;;  %6129 = vrcp.f32 %v4247_v63  ;;  %3382 = vmatmul.mubr.bf16.gmra.mrb[244].mxu1 %v8106_v1  ;;  %v3085_v3 = vadd.f32 %v3084_v47, %v8181_v27  ;;  %v3602_v34 = vsub.f32 0.0, %v2890_v53 }
 0x42f   :  { %v6110_v9 = vpop.eup %6109  ;;  %v4248_v10 = vadd.f32 1.0, %v6108_v31  ;;  %3391 = vmatprep.mubr.bf16.mxu1 %v6998_v44  ;;  %v2894_v22 = vadd.f32 %v2893_v6, %v8183_v41  ;;  %v3845_v39 = vmul.f32 1.442695, %v3597_v32  ;;  %v3604_v29 = vsub.f32 0.0, %v3083_v46 }
 0x430   :  { %v6112_v2 = vpop.eup %6111  ;;  %6131 = vrcp.f32 %v4246_v58  ;;  %v4252_v19 = vadd.f32 1.0, %v6110_v9  ;;  %v3087_v21 = vadd.f32 %v8207_v50, %v8185_v0  ;;  %v3853_v47 = vmul.f32 1.442695, %v3601_v52 }
 0x431   :  { %v6114_v62 = vpop.eup %6113  ;;  %6133 = vrcp.f32 %v4248_v10  ;;  %v4254_v8 = vadd.f32 1.0, %v6112_v2  ;;  %v2897_v11 = vpop.f32.mrb[140].mxu1  ;;  %v3608_v59 = vsub.f32 0.0, %v2892_v35  ;;  %v3857_v31 = vmul.f32 1.442695, %v3603_v4 }
 0x432   :  { %v6116_v48 = vpop.eup %6115  ;;  %6135 = vrcp.f32 %v4252_v19  ;;  %v4253_v61 = vadd.f32 1.0, %v6114_v62  ;;  %v3090_v55 = vpop.f32.mrb[172].mxu0  ;;  %v3610_v58 = vsub.f32 0.0, %v3085_v3  ;;  %v3855_v2 = vmul.f32 1.442695, %v3602_v34 }
 0x433   :  { %v6118_v18 = vpop.eup %6117  ;;  %6137 = vrcp.f32 %v4254_v8  ;;  %v4255_v1 = vadd.f32 1.0, %v6116_v48  ;;  %v8214_v16 = vpop.f32.mrb[141].mxu1  ;;  %v3091_v50 = vadd.f32 %v3090_v55, %v8181_v27  ;;  %v3609_v19 = vsub.f32 0.0, %v2894_v22 }
 0x434   :  { %v8216_v54 = vpop.f32.mrb[173].mxu0  ;;  %v6120_v56 = vpop.eup %6119  ;;  %6139 = vrcp.f32 %v4253_v61  ;;  %v4259_v28 = vadd.f32 1.0, %v6118_v18  ;;  %v3859_v8 = vmul.f32 1.442695, %v3604_v29  ;;  %v3611_v51 = vsub.f32 0.0, %v3087_v21 }
 0x435   :  { %v8219_v14 = vpop.f32.mrb[142].mxu1  ;;  %v8221_v24 = vpop.f32.mrb[174].mxu0  ;;  %6141 = vrcp.f32 %v4255_v1  ;;  %v4261_v33 = vadd.f32 1.0, %v6120_v56  ;;  %v3867_v15 = vmul.f32 1.442695, %v3608_v59  ;;  %v3617_v25 = vsub.f32 0.0, %v3091_v50 }
 0x436   :  { %v6122_v17 = vpop.eup %6121  ;;  %v8224_v26 = vpop.f32.mrb[143].mxu1  ;;  %6143 = vrcp.f32 %v4259_v28  ;;  %3392 = vmatmul.mubr.bf16.gmra.mrb[248].mxu1 %v8124_v57  ;;  %v3869_v28 = vmul.f32 1.442695, %v3609_v19  ;;  %v3873_v53 = vmul.f32 1.442695, %v3611_v51  ;;  %v3093_v29 = vadd.f32 %v8216_v54, %v8185_v0 }
 0x437   :  { %v8226_v36 = vpop.f32.mrb[175].mxu0  ;;  %v6124_v49 = vpop.eup %6123  ;;  %v4260_v23 = vadd.f32 1.0, %v6122_v17  ;;  %6145 = vrcp.f32 %v4261_v33  ;;  %3401 = vmatprep.mubr.bf16.mxu1 %v6998_v44  ;;  %v2898_v44 = vadd.f32 %v2897_v11, %v8179_v40  ;;  %v3885_v46 = vmul.f32 1.442695, %v3617_v25 }
 0x438   :  { %v6126_v38 = vpop.eup %6125  ;;  %v4262_v30 = vadd.f32 1.0, %v6124_v49  ;;  %v2904_v25 = vadd.f32 %v8224_v26, %v8183_v41 }
 0x439   :  { %v6128_v12 = vpop.eup %6127  ;;  %6147 = vrcp.f32 %v4260_v23  ;;  %v4266_v7 = vadd.f32 1.0, %v6126_v38  ;;  %v8242_v63 = vpop.f32.mrb[144].mxu1  ;;  %v3615_v11 = vsub.f32 0.0, %v2898_v44  ;;  %v2902_v44 = vadd.f32 %v8219_v14, %v8179_v40 }
 0x43a   :  { %v6130_v13 = vpop.eup %6129  ;;  %4693 = vst [vmem:[%s9716_s9] sm:$0xff] %v6128_v12  ;;  %6149 = vrcp.f32 %v4262_v30  ;;  %v8244_v5 = vpop.f32.mrb[176].mxu0  ;;  %v3095_v14 = vadd.f32 %v8221_v24, %v8181_v27  ;;  %v3097_v24 = vadd.f32 %v8226_v36, %v8185_v0 }
 0x43b   :  { %v6132_v57 = vpop.eup %6131  ;;  %4695 = vst [vmem:[%s9716_s9 + $0x10] sm:$0xff] %v6130_v13  ;;  %6151 = vrcp.f32 %v4266_v7  ;;  %v8250_v9 = vpop.f32.mrb[145].mxu1  ;;  %v2900_v7 = vadd.f32 %v8214_v16, %v8183_v41 }
 0x43c   :  { %v6134_v6 = vpop.eup %6133  ;;  %4694 = vst [vmem:[%s9716_s9 + $0x8] sm:$0xff] %v6132_v57  ;;  %6153 = vpow2.f32 %v3843_v37  ;;  %v8252_v10 = vpop.f32.mrb[177].mxu0  ;;  %v3871_v37 = vmul.f32 1.442695, %v3610_v58  ;;  %v2910_v36 = vadd.f32 %v8250_v9, %v8183_v41 }
 0x43d   :  { %v6136_v60 = vpop.eup %6135  ;;  %4696 = vst [vmem:[%s9716_s9 + $0x18] sm:$0xff] %v6134_v6  ;;  %6155 = vpow2.f32 %v3841_v42  ;;  %v8257_v20 = vpop.f32.mrb[146].mxu1 }
 0x43e   :  { %v6138_v62 = vpop.eup %6137  ;;  %4700 = vst [vmem:[%s9716_s9 + $0x38] sm:$0xff] %v6136_v60  ;;  %6157 = vpow2.f32 %v3845_v39  ;;  %v8262_v48 = vpop.f32.mrb[178].mxu0  ;;  %3402 = vmatmul.mubr.bf16.gmra.mrb[252].mxu1 %v8122_v43  ;;  %v3881_v43 = vmul.f32 1.442695, %v3615_v11  ;;  %v2912_v9 = vadd.f32 %v8257_v20, %v8179_v40 }
 0x43f   :  { %v6140_v61 = vpop.eup %6139  ;;  %4702 = vst [vmem:[%s9716_s9 + $0x48] sm:$0xff] %v6138_v62  ;;  %6159 = vpow2.f32 %v3853_v47  ;;  %v8267_v55 = vpop.f32.mrb[147].mxu1 }
 0x440   :  { %v8269_v18 = vpop.f32.mrb[179].mxu0  ;;  %v6142_v1 = vpop.eup %6141  ;;  %4701 = vst [vmem:[%s9716_s9 + $0x40] sm:$0xff] %v6140_v61  ;;  %6161 = vpow2.f32 %v3857_v31  ;;  %v3616_v31 = vsub.f32 0.0, %v2900_v7 }
 0x441   :  { %v6144_v56 = vpop.eup %6143  ;;  %4703 = vst [vmem:[%s9716_s9 + $0x50] sm:$0xff] %v6142_v1  ;;  %6163 = vpow2.f32 %v3855_v2  ;;  %v8284_v33 = vpop.f32.mrb[148].mxu1  ;;  %v3618_v2 = vsub.f32 0.0, %v3093_v29 }
 0x442   :  { %v6146_v32 = vpop.eup %6145  ;;  %4707 = vst [vmem:[%s9716_s9 + $0x70] sm:$0xff] %v6144_v56  ;;  %6165 = vpow2.f32 %v3859_v8  ;;  %v8289_v49 = vpop.f32.mrb[180].mxu0 }
 0x443   :  { %v6148_v17 = vpop.eup %6147  ;;  %4709 = vst [vmem:[%s9716_s9 + $0x80] sm:$0xff] %v6146_v32  ;;  %6167 = vpow2.f32 %v3867_v15  ;;  %v8294_v52 = vpop.f32.mrb[149].mxu1 }
 0x444   :  { %v6150_v42 = vpop.eup %6149  ;;  %4708 = vst [vmem:[%s9716_s9 + $0x78] sm:$0xff] %v6148_v17  ;;  %6169 = vpow2.f32 %v3871_v37  ;;  %v8296_v35 = vpop.f32.mrb[181].mxu0  ;;  %v3622_v37 = vsub.f32 0.0, %v2902_v44  ;;  %v3883_v17 = vmul.f32 1.442695, %v3616_v31 }
 0x445   :  { %v6152_v23 = vpop.eup %6151  ;;  %4710 = vst [vmem:[%s9716_s9 + $0x88] sm:$0xff] %v6150_v42  ;;  %6171 = vpow2.f32 %v3869_v28  ;;  %v8301_v30 = vpop.f32.mrb[150].mxu1 }
 0x446   :  { %v6154_v38 = vpop.eup %6153  ;;  %4714 = vst [vmem:[%s9716_s9 + $0xa8] sm:$0xff] %v6152_v23  ;;  %6173 = vpow2.f32 %v3873_v53  ;;  %v8303_v4 = vpop.f32.mrb[182].mxu0  ;;  %v2908_v23 = vadd.f32 %v8242_v63, %v8179_v40  ;;  %v3103_v63 = vadd.f32 %v8252_v10, %v8185_v0 }
 0x447   :  { %v6156_v3 = vpop.eup %6155  ;;  %v4268_v12 = vadd.f32 1.0, %v6154_v38  ;;  %6175 = vpow2.f32 %v3881_v43  ;;  %v8307_v34 = vpop.f32.mrb[151].mxu1 }
 0x448   :  { %v8309_v22 = vpop.f32.mrb[183].mxu0  ;;  %v6158_v13 = vpop.eup %6157  ;;  %v4267_v39 = vadd.f32 1.0, %v6156_v3  ;;  %6177 = vpow2.f32 %v3885_v46  ;;  %v3887_v46 = vmul.f32 1.442695, %v3618_v2  ;;  %v3624_v3 = vsub.f32 0.0, %v3095_v14 }
 0x449   :  { %v6160_v21 = vpop.eup %6159  ;;  %6179 = vrcp.f32 %v4268_v12  ;;  %v4269_v57 = vadd.f32 1.0, %v6158_v13  ;;  %v8315_v58 = vpop.f32.mrb[152].mxu1  ;;  %v3101_v12 = vadd.f32 %v8244_v5, %v8181_v27  ;;  %v3895_v5 = vmul.f32 1.442695, %v3622_v37 }
 0x44a   :  { %v6162_v47 = vpop.eup %6161  ;;  %6181 = vrcp.f32 %v4267_v39  ;;  %v4273_v59 = vadd.f32 1.0, %v6160_v21  ;;  %v8317_v50 = vpop.f32.mrb[184].mxu0  ;;  %v3623_v39 = vsub.f32 0.0, %v2904_v25  ;;  %v3105_v2 = vadd.f32 %v8262_v48, %v8181_v27 }
 0x44b   :  { %v6164_v16 = vpop.eup %6163  ;;  %6183 = vrcp.f32 %v4269_v57  ;;  %v4275_v6 = vadd.f32 1.0, %v6162_v47  ;;  %v8319_v19 = vpop.f32.mrb[153].mxu1  ;;  %v3625_v57 = vsub.f32 0.0, %v3097_v24 }
 0x44c   :  { %v6166_v60 = vpop.eup %6165  ;;  %6185 = vrcp.f32 %v4273_v59  ;;  %v4274_v54 = vadd.f32 1.0, %v6164_v16  ;;  %v8321_v62 = vpop.f32.mrb[185].mxu0  ;;  %v3629_v16 = vsub.f32 0.0, %v2908_v23  ;;  %v3897_v14 = vmul.f32 1.442695, %v3623_v39 }
 0x44d   :  { %v6168_v8 = vpop.eup %6167  ;;  %6187 = vrcp.f32 %v4275_v6  ;;  %v4276_v51 = vadd.f32 1.0, %v6166_v60  ;;  %v8325_v61 = vpop.f32.mrb[154].mxu1  ;;  %v3899_v60 = vmul.f32 1.442695, %v3624_v3  ;;  %v3901_v48 = vmul.f32 1.442695, %v3625_v57 }
 0x44e   :  { %v8327_v15 = vpop.f32.mrb[186].mxu0  ;;  %v6170_v11 = vpop.eup %6169  ;;  %6189 = vrcp.f32 %v4274_v54  ;;  %v4280_v1 = vadd.f32 1.0, %v6168_v8  ;;  %v3631_v54 = vsub.f32 0.0, %v3101_v12 }
 0x44f   :  { %v8331_v56 = vpop.f32.mrb[155].mxu1  ;;  %v8333_v28 = vpop.f32.mrb[187].mxu0  ;;  %6191 = vrcp.f32 %v4276_v51  ;;  %v4282_v53 = vadd.f32 1.0, %v6170_v11  ;;  %v3630_v11 = vsub.f32 0.0, %v2910_v36 }
 0x450   :  { %v6172_v32 = vpop.eup %6171  ;;  %6193 = vrcp.f32 %v4280_v1  ;;  %v2914_v1 = vadd.f32 %v8267_v55, %v8183_v41  ;;  %v3636_v55 = vsub.f32 0.0, %v2912_v9 }
 0x451   :  { %v6174_v43 = vpop.eup %6173  ;;  %v4281_v42 = vadd.f32 1.0, %v6172_v32  ;;  %6195 = vrcp.f32 %v4282_v53  ;;  %v8345_v47 = vpop.f32.mrb[156].mxu1  ;;  %v3632_v32 = vsub.f32 0.0, %v3103_v63 }
 0x452   :  { %v6176_v38 = vpop.eup %6175  ;;  %v4283_v26 = vadd.f32 1.0, %v6174_v43  ;;  %v8347_v59 = vpop.f32.mrb[188].mxu0  ;;  %v3923_v36 = vmul.f32 1.442695, %v3636_v55 }
 0x453   :  { %v6178_v7 = vpop.eup %6177  ;;  %6197 = vrcp.f32 %v4281_v42  ;;  %v4287_v13 = vadd.f32 1.0, %v6176_v38  ;;  %v8354_v6 = vpop.f32.mrb[157].mxu1  ;;  %v3913_v42 = vmul.f32 1.442695, %v3631_v54  ;;  %v3911_v38 = vmul.f32 1.442695, %v3630_v11 }
 0x454   :  { %v6180_v29 = vpop.eup %6179  ;;  %6199 = vrcp.f32 %v4283_v26  ;;  %v4289_v21 = vadd.f32 1.0, %v6178_v7  ;;  %v8356_v31 = vpop.f32.mrb[189].mxu0  ;;  %v3637_v26 = vsub.f32 0.0, %v2914_v1  ;;  %v3915_v12 = vmul.f32 1.442695, %v3632_v32 }
 0x455   :  { %v6182_v44 = vpop.eup %6181  ;;  %4716 = vst [vmem:[%s9716_s9 + $0xb8] sm:$0xff] %v6180_v29  ;;  %6201 = vrcp.f32 %v4287_v13  ;;  %v8363_v8 = vpop.f32.mrb[158].mxu1 }
 0x456   :  { %v6184_v10 = vpop.eup %6183  ;;  %4715 = vst [vmem:[%s9716_s9 + $0xb0] sm:$0xff] %v6182_v44  ;;  %6203 = vrcp.f32 %v4289_v21  ;;  %v8365_v51 = vpop.f32.mrb[190].mxu0 }
 0x457   :  { %v6186_v20 = vpop.eup %6185  ;;  %4717 = vst [vmem:[%s9716_s9 + $0xc0] sm:$0xff] %v6184_v10  ;;  %6205 = vpow2.f32 %v3883_v17  ;;  %v8372_v37 = vpop.f32.mrb[159].mxu1  ;;  %v3909_v17 = vmul.f32 1.442695, %v3629_v16  ;;  %v3925_v16 = vmul.f32 1.442695, %v3637_v26 }
 0x458   :  { %v6188_v25 = vpop.eup %6187  ;;  %4721 = vst [vmem:[%s9716_s9 + $0xe0] sm:$0xff] %v6186_v20  ;;  %6207 = vpow2.f32 %v3887_v46  ;;  %v8377_v53 = vpop.f32.mrb[191].mxu0  ;;  %v3638_v46 = vsub.f32 0.0, %v3105_v2  ;;  %v3107_v20 = vadd.f32 %v8269_v18, %v8185_v0  ;;  %v2918_v18 = vadd.f32 %v8284_v33, %v8179_v40 }
 0x459   :  { %v6190_v24 = vpop.eup %6189  ;;  %4723 = vst [vmem:[%s9716_s9 + $0xf0] sm:$0xff] %v6188_v25  ;;  %6209 = vpow2.f32 %v3895_v5  ;;  %v8391_v7 = vpop.f32.mrb[160].mxu1  ;;  %v2920_v33 = vadd.f32 %v8294_v52, %v8183_v41  ;;  %v2922_v52 = vadd.f32 %v8301_v30, %v8179_v40 }
 0x45a   :  { %v6192_v43 = vpop.eup %6191  ;;  %4722 = vst [vmem:[%s9716_s9 + $0xe8] sm:$0xff] %v6190_v24  ;;  %6211 = vpow2.f32 %v3899_v60  ;;  %v8393_v13 = vpop.f32.mrb[192].mxu0  ;;  %v3927_v57 = vmul.f32 1.442695, %v3638_v46 }
 0x45b   :  { %v6194_v23 = vpop.eup %6193  ;;  %4724 = vst [vmem:[%s9716_s9 + $0xf8] sm:$0xff] %v6192_v43  ;;  %6213 = vpow2.f32 %v3897_v14  ;;  %v8398_v29 = vpop.f32.mrb[161].mxu1 }
 0x45c   :  { %v6196_v3 = vpop.eup %6195  ;;  %4728 = vst [vmem:[%s9716_s9 + $0x118] sm:$0xff] %v6194_v23  ;;  %6215 = vpow2.f32 %v3901_v48  ;;  %v8403_v63 = vpop.f32.mrb[193].mxu0 }
 0x45d   :  { %v6198_v39 = vpop.eup %6197  ;;  %4730 = vst [vmem:[%s9716_s9 + $0x128] sm:$0xff] %v6196_v3  ;;  %6217 = vpow2.f32 %v3909_v17  ;;  %v8405_v44 = vpop.f32.mrb[162].mxu1  ;;  %v3111_v3 = vadd.f32 %v8289_v49, %v8181_v27  ;;  %v3113_v49 = vadd.f32 %v8296_v35, %v8185_v0 }
 0x45e   :  { %v6200_v21 = vpop.eup %6199  ;;  %4729 = vst [vmem:[%s9716_s9 + $0x120] sm:$0xff] %v6198_v39  ;;  %6219 = vpow2.f32 %v3913_v42  ;;  %v8410_v9 = vpop.f32.mrb[194].mxu0  ;;  %v3639_v42 = vsub.f32 0.0, %v3107_v20 }
 0x45f   :  { %v6202_v5 = vpop.eup %6201  ;;  %4731 = vst [vmem:[%s9716_s9 + $0x130] sm:$0xff] %v6200_v21  ;;  %6221 = vpow2.f32 %v3911_v38  ;;  %v8412_v10 = vpop.f32.mrb[163].mxu1 }
 0x460   :  { %v6204_v60 = vpop.eup %6203  ;;  %4735 = vst [vmem:[%s9716_s9 + $0x150] sm:$0xff] %v6202_v5  ;;  %6223 = vpow2.f32 %v3915_v12  ;;  %v8417_v54 = vpop.f32.mrb[195].mxu0 }
 0x461   :  { %v6206_v2 = vpop.eup %6205  ;;  %4737 = vst [vmem:[%s9716_s9 + $0x160] sm:$0xff] %v6204_v60  ;;  %6225 = vpow2.f32 %v3923_v36  ;;  %v8424_v24 = vpop.f32.mrb[164].mxu1 }
 0x462   :  { %v6208_v14 = vpop.eup %6207  ;;  %v4288_v11 = vadd.f32 1.0, %v6206_v2  ;;  %6227 = vpow2.f32 %v3927_v57  ;;  %v8426_v17 = vpop.f32.mrb[196].mxu0 }
 0x463   :  { %v6210_v1 = vpop.eup %6209  ;;  %v4290_v25 = vadd.f32 1.0, %v6208_v14  ;;  %6229 = vpow2.f32 %v3925_v16  ;;  %v8430_v46 = vpop.f32.mrb[165].mxu1  ;;  %v3929_v14 = vmul.f32 1.442695, %v3639_v42  ;;  %v2924_v42 = vadd.f32 %v8307_v34, %v8183_v41 }
 0x464   :  { %v6212_v48 = vpop.eup %6211  ;;  %6231 = vrcp.f32 %v4288_v11  ;;  %v4294_v32 = vadd.f32 1.0, %v6210_v1  ;;  %v8432_v23 = vpop.f32.mrb[197].mxu0  ;;  %v3643_v11 = vsub.f32 0.0, %v2918_v18  ;;  %v2928_v34 = vadd.f32 %v8315_v58, %v8179_v40 }
 0x465   :  { %v6214_v55 = vpop.eup %6213  ;;  %6233 = vrcp.f32 %v4290_v25  ;;  %v4296_v43 = vadd.f32 1.0, %v6212_v48  ;;  %v8436_v12 = vpop.f32.mrb[166].mxu1  ;;  %v3645_v48 = vsub.f32 0.0, %v3111_v3 }
 0x466   :  { %v6216_v38 = vpop.eup %6215  ;;  %6235 = vrcp.f32 %v4294_v32  ;;  %v4295_v26 = vadd.f32 1.0, %v6214_v55  ;;  %v8438_v39 = vpop.f32.mrb[198].mxu0 }
 0x467   :  { %v6218_v36 = vpop.eup %6217  ;;  %6237 = vrcp.f32 %v4296_v43  ;;  %v4297_v21 = vadd.f32 1.0, %v6216_v38  ;;  %v8442_v57 = vpop.f32.mrb[167].mxu1  ;;  %v3644_v43 = vsub.f32 0.0, %v2920_v33  ;;  %v3115_v38 = vadd.f32 %v8303_v4, %v8181_v27 }
 0x468   :  { %v8444_v5 = vpop.f32.mrb[199].mxu0  ;;  %v6220_v16 = vpop.eup %6219  ;;  %6239 = vrcp.f32 %v4295_v26  ;;  %v4301_v60 = vadd.f32 1.0, %v6218_v36  ;;  %v3646_v36 = vsub.f32 0.0, %v3113_v49  ;;  %v3117_v33 = vadd.f32 %v8309_v22, %v8185_v0 }
 0x469   :  { %v6222_v2 = vpop.eup %6221  ;;  %6241 = vrcp.f32 %v4297_v21  ;;  %v4303_v20 = vadd.f32 1.0, %v6220_v16  ;;  %v8454_v18 = vpop.f32.mrb[168].mxu1  ;;  %v3937_v16 = vmul.f32 1.442695, %v3643_v11  ;;  %v3941_v22 = vmul.f32 1.442695, %v3645_v48 }
 0x46a   :  { %v6224_v1 = vpop.eup %6223  ;;  %6243 = vrcp.f32 %v4301_v60  ;;  %v4302_v25 = vadd.f32 1.0, %v6222_v2  ;;  %v8456_v3 = vpop.f32.mrb[200].mxu0  ;;  %v3652_v11 = vsub.f32 0.0, %v3115_v38  ;;  %v3653_v38 = vsub.f32 0.0, %v3117_v33 }
 0x46b   :  { %v6226_v32 = vpop.eup %6225  ;;  %6245 = vrcp.f32 %v4303_v20  ;;  %v4304_v55 = vadd.f32 1.0, %v6224_v1  ;;  %v8460_v60 = vpop.f32.mrb[169].mxu1  ;;  %v3650_v20 = vsub.f32 0.0, %v2922_v52 }
 0x46c   :  { %v6228_v35 = vpop.eup %6227  ;;  %6247 = vrcp.f32 %v4302_v25  ;;  %v4308_v26 = vadd.f32 1.0, %v6226_v32  ;;  %v8462_v4 = vpop.f32.mrb[201].mxu0 }
 0x46d   :  { %v6230_v21 = vpop.eup %6229  ;;  %6249 = vrcp.f32 %v4304_v55  ;;  %v4310_v30 = vadd.f32 1.0, %v6228_v35  ;;  %v8466_v1 = vpop.f32.mrb[170].mxu1  ;;  %v3121_v55 = vadd.f32 %v8317_v50, %v8181_v27  ;;  %v3943_v50 = vmul.f32 1.442695, %v3646_v36 }
 0x46e   :  { %v6232_v2 = vpop.eup %6231  ;;  %6251 = vrcp.f32 %v4308_v26  ;;  %v4309_v49 = vadd.f32 1.0, %v6230_v21  ;;  %v8468_v25 = vpop.f32.mrb[202].mxu0  ;;  %v3939_v26 = vmul.f32 1.442695, %v3644_v43  ;;  %v3651_v21 = vsub.f32 0.0, %v2924_v42 }
 0x46f   :  { %v6234_v32 = vpop.eup %6233  ;;  %4736 = vst [vmem:[%s9716_s9 + $0x158] sm:$0xff] %v6232_v2  ;;  %6253 = vrcp.f32 %v4310_v30  ;;  %v8475_v35 = vpop.f32.mrb[171].mxu1  ;;  %v2930_v30 = vadd.f32 %v8319_v19, %v8183_v41  ;;  %v3123_v2 = vadd.f32 %v8321_v62, %v8185_v0  ;;  %v3951_v43 = vmul.f32 1.442695, %v3650_v20 }
 0x470   :  { %v8477_v52 = vpop.f32.mrb[203].mxu0  ;;  %v6236_v58 = vpop.eup %6235  ;;  %4738 = vst [vmem:[%s9716_s9 + $0x168] sm:$0xff] %v6234_v32  ;;  %6255 = vrcp.f32 %v4309_v49  ;;  %v3657_v42 = vsub.f32 0.0, %v2928_v34  ;;  %v3659_v36 = vsub.f32 0.0, %v3121_v55  ;;  %v3953_v62 = vmul.f32 1.442695, %v3651_v21 }
 0x471   :  { %v6238_v48 = vpop.eup %6237  ;;  %4742 = vst [vmem:[%s9716_s9 + $0x188] sm:$0xff] %v6236_v58  ;;  %6257 = vpow2.f32 %v3929_v14  ;;  %v3955_v14 = vmul.f32 1.442695, %v3652_v11  ;;  %v3658_v49 = vsub.f32 0.0, %v2930_v30  ;;  %v8498_v32 = vpop.f32.mrb[172].mxu1  ;;  %v3660_v34 = vsub.f32 0.0, %v3123_v2 }
 0x472   :  { %v6240_v45 = vpop.eup %6239  ;;  %4744 = vst [vmem:[%s9716_s9 + $0x198] sm:$0xff] %v6238_v48  ;;  %6259 = vpow2.f32 %v3937_v16  ;;  %v8500_v16 = vpop.f32.mrb[204].mxu0  ;;  %v3965_v58 = vmul.f32 1.442695, %v3657_v42  ;;  %v3969_v48 = vmul.f32 1.442695, %v3659_v36 }
 0x473   :  { %v6242_v19 = vpop.eup %6241  ;;  %4743 = vst [vmem:[%s9716_s9 + $0x190] sm:$0xff] %v6240_v45  ;;  %6261 = vpow2.f32 %v3941_v22  ;;  %v3957_v45 = vmul.f32 1.442695, %v3653_v38  ;;  %v8505_v22 = vpop.f32.mrb[173].mxu1 }
 0x474   :  { %v6244_v33 = vpop.eup %6243  ;;  %4745 = vst [vmem:[%s9716_s9 + $0x1a0] sm:$0xff] %v6242_v19  ;;  %6263 = vpow2.f32 %v3939_v26  ;;  %v8507_v11 = vpop.f32.mrb[205].mxu0  ;;  %v3971_v19 = vmul.f32 1.442695, %v3660_v34 }
 0x475   :  { %v6246_v20 = vpop.eup %6245  ;;  %4749 = vst [vmem:[%s9716_s9 + $0x1c0] sm:$0xff] %v6244_v33  ;;  %6265 = vpow2.f32 %v3943_v50  ;;  %v8512_v26 = vpop.f32.mrb[174].mxu1  ;;  %v2932_v33 = vadd.f32 %v8325_v61, %v8179_v40 }
 0x476   :  { %v6248_v55 = vpop.eup %6247  ;;  %4751 = vst [vmem:[%s9716_s9 + $0x1d0] sm:$0xff] %v6246_v20  ;;  %6267 = vpow2.f32 %v3951_v43  ;;  %v8514_v21 = vpop.f32.mrb[206].mxu0  ;;  %v3967_v43 = vmul.f32 1.442695, %v3658_v49  ;;  %v3125_v20 = vadd.f32 %v8327_v15, %v8181_v27 }
 0x477   :  { %v6250_v30 = vpop.eup %6249  ;;  %4750 = vst [vmem:[%s9716_s9 + $0x1c8] sm:$0xff] %v6248_v55  ;;  %6269 = vpow2.f32 %v3955_v14  ;;  %v8519_v50 = vpop.f32.mrb[175].mxu1 }
 0x478   :  { %v8521_v38 = vpop.f32.mrb[207].mxu0  ;;  %v6252_v2 = vpop.eup %6251  ;;  %4752 = vst [vmem:[%s9716_s9 + $0x1d8] sm:$0xff] %v6250_v30  ;;  %6271 = vpow2.f32 %v3953_v62 }
 0x479   :  { %v6254_v42 = vpop.eup %6253  ;;  %4756 = vst [vmem:[%s9716_s9 + $0x1f8] sm:$0xff] %v6252_v2  ;;  %6273 = vpow2.f32 %v3957_v45  ;;  %v8539_v45 = vpop.f32.mrb[176].mxu1 }
 0x47a   :  { %v6256_v14 = vpop.eup %6255  ;;  %4758 = vst [vmem:[%s9716_s9 + $0x208] sm:$0xff] %v6254_v42  ;;  %6275 = vpow2.f32 %v3965_v58  ;;  %9720 = vst [vmem:[#allocation3_spill] sm:$0xff] %v8539_v45  ;;  %v8541_v34 = vpop.f32.mrb[208].mxu0 }
 0x47b   :  { %v6258_v36 = vpop.eup %6257  ;;  %4757 = vst [vmem:[%s9716_s9 + $0x200] sm:$0xff] %v6256_v14  ;;  %6277 = vpow2.f32 %v3969_v48  ;;  %9721 = vst [vmem:[#allocation4_spill] sm:$0xff] %v8541_v34  ;;  %v8543_v30 = vpop.f32.mrb[177].mxu1 }
 0x47c   :  { %v6260_v62 = vpop.eup %6259  ;;  %v4311_v49 = vadd.f32 1.0, %v6258_v36  ;;  %6279 = vpow2.f32 %v3967_v43  ;;  %9722 = vst [vmem:[#allocation5_spill] sm:$0xff] %v8543_v30  ;;  %v8545_v2 = vpop.f32.mrb[209].mxu0  ;;  %v3664_v36 = vsub.f32 0.0, %v2932_v33  ;;  %v3666_v30 = vsub.f32 0.0, %v3125_v20 }
 0x47d   :  { %v6262_v55 = vpop.eup %6261  ;;  %v4315_v58 = vadd.f32 1.0, %v6260_v62  ;;  %6281 = vpow2.f32 %v3971_v19  ;;  %9723 = vst [vmem:[#allocation6_spill] sm:$0xff] %v8545_v2  ;;  %v8547_v42 = vpop.f32.mrb[178].mxu1  ;;  %v3127_v33 = vadd.f32 %v8333_v28, %v8185_v0 }
 0x47e   :  { %v6264_v48 = vpop.eup %6263  ;;  %6283 = vrcp.f32 %v4311_v49  ;;  %v4317_v61 = vadd.f32 1.0, %v6262_v55  ;;  %9724 = vst [vmem:[#allocation7_spill] sm:$0xff] %v8547_v42  ;;  %v8549_v43 = vpop.f32.mrb[210].mxu0  ;;  %v2934_v55 = vadd.f32 %v8331_v56, %v8183_v41  ;;  %v3131_v56 = vadd.f32 %v8347_v59, %v8181_v27 }
 0x47f   :  { %9725 = vst [vmem:[#allocation8_spill] sm:$0xff] %v8549_v43  ;;  %v6266_v14 = vpop.eup %6265  ;;  %6285 = vrcp.f32 %v4315_v58  ;;  %v4316_v15 = vadd.f32 1.0, %v6264_v48  ;;  %v8551_v45 = vpop.f32.mrb[179].mxu1  ;;  %v3133_v59 = vadd.f32 %v8356_v31, %v8185_v0  ;;  %v3135_v31 = vadd.f32 %v8365_v51, %v8181_v27 }
 0x480   :  { %v8553_v34 = vpop.f32.mrb[211].mxu0  ;;  %v6268_v19 = vpop.eup %6267  ;;  %6287 = vrcp.f32 %v4317_v61  ;;  %v4318_v62 = vadd.f32 1.0, %v6266_v14  ;;  %v2938_v61 = vadd.f32 %v8345_v47, %v8179_v40  ;;  %v3137_v51 = vadd.f32 %v8377_v53, %v8185_v0 }
 0x481   :  { %9726 = vst [vmem:[#allocation9_spill] sm:$0xff] %v8553_v34  ;;  %v6270_v2 = vpop.eup %6269  ;;  %6289 = vrcp.f32 %v4316_v15  ;;  %v4322_v49 = vadd.f32 1.0, %v6268_v19  ;;  %v3979_v34 = vmul.f32 1.442695, %v3664_v36  ;;  %v3983_v15 = vmul.f32 1.442695, %v3666_v30 }
 0x482   :  { %v6272_v42 = vpop.eup %6271  ;;  %6291 = vrcp.f32 %v4318_v62  ;;  %v4324_v43 = vadd.f32 1.0, %v6270_v2  ;;  %v8563_v19 = vpop.f32.mrb[180].mxu1 }
 0x483   :  { %v6274_v58 = vpop.eup %6273  ;;  %6293 = vrcp.f32 %v4322_v49  ;;  %v4323_v48 = vadd.f32 1.0, %v6272_v42  ;;  %9727 = vst [vmem:[#allocation10_spill] sm:$0xff] %v8563_v19  ;;  %v8565_v2 = vpop.f32.mrb[212].mxu0  ;;  %v3665_v49 = vsub.f32 0.0, %v2934_v55  ;;  %v2940_v42 = vadd.f32 %v8354_v6, %v8183_v41 }
 0x484   :  { %v6276_v20 = vpop.eup %6275  ;;  %6295 = vrcp.f32 %v4324_v43  ;;  %v4325_v14 = vadd.f32 1.0, %v6274_v58  ;;  %9728 = vst [vmem:[#allocation11_spill] sm:$0xff] %v8565_v2  ;;  %v8569_v36 = vpop.f32.mrb[181].mxu1  ;;  %v3667_v58 = vsub.f32 0.0, %v3127_v33  ;;  %v2942_v6 = vadd.f32 %v8363_v8, %v8179_v40 }
 0x485   :  { %v6278_v62 = vpop.eup %6277  ;;  %6297 = vrcp.f32 %v4323_v48  ;;  %v4329_v28 = vadd.f32 1.0, %v6276_v20  ;;  %9729 = vst [vmem:[#allocation12_spill] sm:$0xff] %v8569_v36  ;;  %v8571_v47 = vpop.f32.mrb[213].mxu0  ;;  %v3671_v20 = vsub.f32 0.0, %v2938_v61  ;;  %v3981_v61 = vmul.f32 1.442695, %v3665_v49 }
 0x486   :  { %9730 = vst [vmem:[#allocation13_spill] sm:$0xff] %v8571_v47  ;;  %v6280_v43 = vpop.eup %6279  ;;  %6299 = vrcp.f32 %v4325_v14  ;;  %v4331_v30 = vadd.f32 1.0, %v6278_v62  ;;  %v8575_v19 = vpop.f32.mrb[182].mxu1  ;;  %v3673_v62 = vsub.f32 0.0, %v3131_v56  ;;  %v2944_v8 = vadd.f32 %v8372_v37, %v8183_v41 }
 0x487   :  { %9731 = vst [vmem:[#allocation14_spill] sm:$0xff] %v8575_v19  ;;  %v8577_v2 = vpop.f32.mrb[214].mxu0  ;;  %v6282_v48 = vpop.eup %6281  ;;  %6301 = vrcp.f32 %v4329_v28  ;;  %v4330_v55 = vadd.f32 1.0, %v6280_v43  ;;  %v3672_v28 = vsub.f32 0.0, %v2940_v42  ;;  %v3985_v56 = vmul.f32 1.442695, %v3667_v58 }
 0x488   :  { %v8581_v36 = vpop.f32.mrb[183].mxu1  ;;  %v8583_v47 = vpop.f32.mrb[215].mxu0  ;;  %6303 = vrcp.f32 %v4331_v30  ;;  %v4332_v33 = vadd.f32 1.0, %v6282_v48  ;;  %v3674_v30 = vsub.f32 0.0, %v3133_v59  ;;  %v3993_v49 = vmul.f32 1.442695, %v3671_v20 }
 0x489   :  { %v6284_v14 = vpop.eup %6283  ;;  %6305 = vrcp.f32 %v4330_v55  ;;  %v3678_v42 = vsub.f32 0.0, %v2942_v6  ;;  %v2948_v37 = vadd.f32 %v8391_v7, %v8179_v40  ;;  %v3680_v58 = vsub.f32 0.0, %v3135_v31  ;;  %v8605_v53 = vpop.f32.mrb[184].mxu1 }
 0x48a   :  { %v6286_v19 = vpop.eup %6285  ;;  %4759 = vst [vmem:[%s9716_s9 + $0x210] sm:$0xff] %v6284_v14  ;;  %6307 = vrcp.f32 %v4332_v33  ;;  %v8607_v59 = vpop.f32.mrb[216].mxu0  ;;  %v3679_v7 = vsub.f32 0.0, %v2944_v8 }
 0x48b   :  { %v6288_v43 = vpop.eup %6287  ;;  %4763 = vst [vmem:[%s9716_s9 + $0x230] sm:$0xff] %v6286_v19  ;;  %6309 = vpow2.f32 %v3979_v34  ;;  %v3997_v19 = vmul.f32 1.442695, %v3673_v62  ;;  %v3995_v34 = vmul.f32 1.442695, %v3672_v28  ;;  %v8612_v20 = vpop.f32.mrb[185].mxu1 }
 0x48c   :  { %v6290_v48 = vpop.eup %6289  ;;  %4765 = vst [vmem:[%s9716_s9 + $0x240] sm:$0xff] %v6288_v43  ;;  %6311 = vpow2.f32 %v3983_v15  ;;  %v8614_v6 = vpop.f32.mrb[217].mxu0  ;;  %v3999_v15 = vmul.f32 1.442695, %v3674_v30  ;;  %v3681_v62 = vsub.f32 0.0, %v3137_v51  ;;  %v3685_v28 = vsub.f32 0.0, %v2948_v37 }
 0x48d   :  { %v6292_v55 = vpop.eup %6291  ;;  %4764 = vst [vmem:[%s9716_s9 + $0x238] sm:$0xff] %v6290_v48  ;;  %6313 = vpow2.f32 %v3981_v61  ;;  %v8619_v31 = vpop.f32.mrb[186].mxu1  ;;  %v4007_v61 = vmul.f32 1.442695, %v3678_v42  ;;  %v4009_v51 = vmul.f32 1.442695, %v3679_v7 }
 0x48e   :  { %v6294_v14 = vpop.eup %6293  ;;  %4766 = vst [vmem:[%s9716_s9 + $0x248] sm:$0xff] %v6292_v55  ;;  %6315 = vpow2.f32 %v3985_v56  ;;  %v8621_v43 = vpop.f32.mrb[218].mxu0  ;;  %v4011_v56 = vmul.f32 1.442695, %v3680_v58  ;;  %v4013_v42 = vmul.f32 1.442695, %v3681_v62 }
 0x48f   :  { %v6296_v33 = vpop.eup %6295  ;;  %4770 = vst [vmem:[%s9716_s9 + $0x268] sm:$0xff] %v6294_v14  ;;  %6317 = vpow2.f32 %v3993_v49  ;;  %v8626_v8 = vpop.f32.mrb[187].mxu1 }
 0x490   :  { %v6298_v48 = vpop.eup %6297  ;;  %4772 = vst [vmem:[%s9716_s9 + $0x278] sm:$0xff] %v6296_v33  ;;  %v8628_v55 = vpop.f32.mrb[219].mxu0  ;;  %6319 = vpow2.f32 %v3997_v19  ;;  %v4021_v19 = vmul.f32 1.442695, %v3685_v28  ;;  %v3141_v28 = vadd.f32 %v8393_v13, %v8181_v27 }
 0x491   :  { %v6300_v14 = vpop.eup %6299  ;;  %4771 = vst [vmem:[%s9716_s9 + $0x270] sm:$0xff] %v6298_v48  ;;  %6321 = vpow2.f32 %v3995_v34  ;;  %v8645_v34 = vpop.f32.mrb[188].mxu1 }
 0x492   :  { %v6302_v30 = vpop.eup %6301  ;;  %4773 = vst [vmem:[%s9716_s9 + $0x280] sm:$0xff] %v6300_v14  ;;  %6323 = vpow2.f32 %v3999_v15  ;;  %v8647_v7 = vpop.f32.mrb[220].mxu0 }
 0x493   :  { %v6304_v49 = vpop.eup %6303  ;;  %4777 = vst [vmem:[%s9716_s9 + $0x2a0] sm:$0xff] %v6302_v30  ;;  %6325 = vpow2.f32 %v4007_v61  ;;  %9732 = vst [vmem:[#allocation15_spill] sm:$0xff] %v8647_v7  ;;  %v8652_v15 = vpop.f32.mrb[189].mxu1 }
 0x494   :  { %v6306_v37 = vpop.eup %6305  ;;  %4779 = vst [vmem:[%s9716_s9 + $0x2b0] sm:$0xff] %v6304_v49  ;;  %6327 = vpow2.f32 %v4011_v56  ;;  %9733 = vst [vmem:[#allocation16_spill] sm:$0xff] %v8652_v15  ;;  %v8654_v62 = vpop.f32.mrb[221].mxu0 }
 0x495   :  { %v6308_v58 = vpop.eup %6307  ;;  %4778 = vst [vmem:[%s9716_s9 + $0x2a8] sm:$0xff] %v6306_v37  ;;  %6329 = vpow2.f32 %v4009_v51  ;;  %9734 = vst [vmem:[#allocation17_spill] sm:$0xff] %v8654_v62  ;;  %v8658_v14 = vpop.f32.mrb[190].mxu1  ;;  %v2950_v51 = vadd.f32 %v8398_v29, %v8183_v41 }
 0x496   :  { %v6310_v33 = vpop.eup %6309  ;;  %4780 = vst [vmem:[%s9716_s9 + $0x2b8] sm:$0xff] %v6308_v58  ;;  %6331 = vpow2.f32 %v4013_v42  ;;  %9735 = vst [vmem:[#allocation18_spill] sm:$0xff] %v8658_v14  ;;  %v8660_v56 = vpop.f32.mrb[222].mxu0  ;;  %v3143_v14 = vadd.f32 %v8403_v63, %v8185_v0 }
 0x497   :  { %v6312_v48 = vpop.eup %6311  ;;  %v4336_v61 = vadd.f32 1.0, %v6310_v33  ;;  %9736 = vst [vmem:[#allocation19_spill] sm:$0xff] %v8660_v56  ;;  %6333 = vpow2.f32 %v4021_v19  ;;  %v8664_v37 = vpop.f32.mrb[191].mxu1  ;;  %v3687_v19 = vsub.f32 0.0, %v3141_v28  ;;  %v3686_v7 = vsub.f32 0.0, %v2950_v51 }
 0x498   :  { %v6314_v30 = vpop.eup %6313  ;;  %v4338_v49 = vadd.f32 1.0, %v6312_v48  ;;  %9737 = vst [vmem:[#allocation20_spill] sm:$0xff] %v8664_v37  ;;  %v8666_v58 = vpop.f32.mrb[223].mxu0  ;;  %v3145_v28 = vadd.f32 %v8410_v9, %v8181_v27 }
 0x499   :  { %9738 = vst [vmem:[#allocation21_spill] sm:$0xff] %v8666_v58  ;;  %v6316_v62 = vpop.eup %6315  ;;  %6335 = vrcp.f32 %v4336_v61  ;;  %v4337_v42 = vadd.f32 1.0, %v6314_v30  ;;  %v2952_v61 = vadd.f32 %v8405_v44, %v8179_v40  ;;  %v8672_v30 = vpop.f32.mrb[192].mxu1  ;;  %v2954_v44 = vadd.f32 %v8412_v10, %v8183_v41 }
 0x49a   :  { %v6318_v33 = vpop.eup %6317  ;;  %6337 = vrcp.f32 %v4338_v49  ;;  %v4339_v13 = vadd.f32 1.0, %v6316_v62  ;;  %v8674_v62 = vpop.f32.mrb[224].mxu0  ;;  %v3694_v10 = vsub.f32 0.0, %v3145_v28 }
 0x49b   :  { %v6320_v56 = vpop.eup %6319  ;;  %6339 = vrcp.f32 %v4337_v42  ;;  %v4343_v48 = vadd.f32 1.0, %v6318_v33  ;;  %9739 = vst [vmem:[#allocation22_spill] sm:$0xff] %v8674_v62  ;;  %v3688_v42 = vsub.f32 0.0, %v3143_v14  ;;  %v8678_v33 = vpop.f32.mrb[193].mxu1  ;;  %v4023_v62 = vmul.f32 1.442695, %v3686_v7 }
 0x49c   :  { %v6322_v15 = vpop.eup %6321  ;;  %6341 = vrcp.f32 %v4339_v13  ;;  %v4345_v29 = vadd.f32 1.0, %v6320_v56  ;;  %9740 = vst [vmem:[#allocation23_spill] sm:$0xff] %v8678_v33  ;;  %v3692_v9 = vsub.f32 0.0, %v2952_v61  ;;  %v2958_v33 = vadd.f32 %v8424_v24, %v8179_v40  ;;  %v8692_v61 = vpop.f32.mrb[194].mxu1 }
 0x49d   :  { %v6324_v37 = vpop.eup %6323  ;;  %6343 = vrcp.f32 %v4343_v48  ;;  %v4344_v58 = vadd.f32 1.0, %v6322_v15  ;;  %v4025_v15 = vmul.f32 1.442695, %v3687_v19  ;;  %v4027_v28 = vmul.f32 1.442695, %v3688_v42 }
 0x49e   :  { %v6326_v49 = vpop.eup %6325  ;;  %6345 = vrcp.f32 %v4345_v29  ;;  %v4346_v63 = vadd.f32 1.0, %v6324_v37  ;;  %v3147_v37 = vadd.f32 %v8417_v54, %v8185_v0  ;;  %v3693_v54 = vsub.f32 0.0, %v2954_v44 }
 0x49f   :  { %v6328_v56 = vpop.eup %6327  ;;  %6347 = vrcp.f32 %v4344_v58  ;;  %v4350_v51 = vadd.f32 1.0, %v6326_v49  ;;  %v8686_v58 = vpop.f32.mrb[225].mxu0  ;;  %v3699_v44 = vsub.f32 0.0, %v2958_v33 }
 0x4a0   :  { %v6330_v13 = vpop.eup %6329  ;;  %6349 = vrcp.f32 %v4346_v63  ;;  %v4352_v48 = vadd.f32 1.0, %v6328_v56  ;;  %v3151_v63 = vadd.f32 %v8426_v17, %v8181_v27  ;;  %v3153_v17 = vadd.f32 %v8432_v23, %v8185_v0 }
 0x4a1   :  { %v6332_v14 = vpop.eup %6331  ;;  %6351 = vrcp.f32 %v4350_v51  ;;  %v4351_v29 = vadd.f32 1.0, %v6330_v13  ;;  %v2960_v51 = vadd.f32 %v8430_v46, %v8183_v41  ;;  %v8694_v13 = vpop.f32.mrb[226].mxu0  ;;  %v4035_v46 = vmul.f32 1.442695, %v3692_v9 }
 0x4a2   :  { %v6334_v19 = vpop.eup %6333  ;;  %6353 = vrcp.f32 %v4352_v48  ;;  %v4353_v49 = vadd.f32 1.0, %v6332_v14  ;;  %v3695_v48 = vsub.f32 0.0, %v3147_v37  ;;  %v4039_v23 = vmul.f32 1.442695, %v3694_v10 }
 0x4a3   :  { %v6336_v7 = vpop.eup %6335  ;;  %6355 = vrcp.f32 %v4351_v29  ;;  %v4357_v56 = vadd.f32 1.0, %v6334_v19  ;;  %v2962_v29 = vadd.f32 %v8436_v12, %v8179_v40  ;;  %v8706_v19 = vpop.f32.mrb[195].mxu1  ;;  %v3701_v37 = vsub.f32 0.0, %v3151_v63 }
 0x4a4   :  { %v6338_v24 = vpop.eup %6337  ;;  %4784 = vst [vmem:[%s9716_s9 + $0x2d8] sm:$0xff] %v6336_v7  ;;  %6357 = vrcp.f32 %v4353_v49  ;;  %v8708_v7 = vpop.f32.mrb[227].mxu0  ;;  %v3155_v49 = vadd.f32 %v8438_v39, %v8181_v27  ;;  %v4037_v12 = vmul.f32 1.442695, %v3693_v54  ;;  %v3700_v33 = vsub.f32 0.0, %v2960_v51 }
 0x4a5   :  { %v6340_v14 = vpop.eup %6339  ;;  %4786 = vst [vmem:[%s9716_s9 + $0x2e8] sm:$0xff] %v6338_v24  ;;  %6359 = vrcp.f32 %v4357_v56  ;;  %v3702_v10 = vsub.f32 0.0, %v3153_v17  ;;  %v4049_v39 = vmul.f32 1.442695, %v3699_v44  ;;  %v3706_v24 = vsub.f32 0.0, %v2962_v29  ;;  %v8732_v17 = vpop.f32.mrb[228].mxu0 }
 0x4a6   :  { %v6342_v42 = vpop.eup %6341  ;;  %4785 = vst [vmem:[%s9716_s9 + $0x2e0] sm:$0xff] %v6340_v14  ;;  %6361 = vpow2.f32 %v4025_v15  ;;  %v4041_v15 = vmul.f32 1.442695, %v3695_v48  ;;  %v3708_v54 = vsub.f32 0.0, %v3155_v49  ;;  %v8730_v48 = vpop.f32.mrb[196].mxu1 }
 0x4a7   :  { %v6344_v9 = vpop.eup %6343  ;;  %4787 = vst [vmem:[%s9716_s9 + $0x2f0] sm:$0xff] %v6342_v42  ;;  %6363 = vpow2.f32 %v4023_v62  ;;  %v4053_v62 = vmul.f32 1.442695, %v3701_v37  ;;  %v4055_v44 = vmul.f32 1.442695, %v3702_v10  ;;  %v8737_v29 = vpop.f32.mrb[197].mxu1 }
 0x4a8   :  { %v6346_v56 = vpop.eup %6345  ;;  %4791 = vst [vmem:[%s9716_s9 + $0x310] sm:$0xff] %v6344_v9  ;;  %6365 = vpow2.f32 %v4027_v28  ;;  %v4051_v28 = vmul.f32 1.442695, %v3700_v33  ;;  %v8739_v42 = vpop.f32.mrb[229].mxu0  ;;  %v4063_v37 = vmul.f32 1.442695, %v3706_v24 }
 0x4a9   :  { %v6348_v63 = vpop.eup %6347  ;;  %4793 = vst [vmem:[%s9716_s9 + $0x320] sm:$0xff] %v6346_v56  ;;  %6367 = vpow2.f32 %v4035_v46  ;;  %v8744_v49 = vpop.f32.mrb[198].mxu1  ;;  %v4067_v33 = vmul.f32 1.442695, %v3708_v54 }
 0x4aa   :  { %v6350_v14 = vpop.eup %6349  ;;  %4792 = vst [vmem:[%s9716_s9 + $0x318] sm:$0xff] %v6348_v63  ;;  %6369 = vpow2.f32 %v4039_v23  ;;  %v8746_v9 = vpop.f32.mrb[230].mxu0 }
 0x4ab   :  { %v6352_v51 = vpop.eup %6351  ;;  %4794 = vst [vmem:[%s9716_s9 + $0x328] sm:$0xff] %v6350_v14  ;;  %6371 = vpow2.f32 %v4037_v12  ;;  %v8751_v56 = vpop.f32.mrb[199].mxu1 }
 0x4ac   :  { %v6354_v46 = vpop.eup %6353  ;;  %4798 = vst [vmem:[%s9716_s9 + $0x348] sm:$0xff] %v6352_v51  ;;  %6373 = vpow2.f32 %v4041_v15  ;;  %9741 = vst [vmem:[#allocation24_spill] sm:$0xff] %v8751_v56  ;;  %v8753_v15 = vpop.f32.mrb[231].mxu0 }
 0x4ad   :  { %v6356_v23 = vpop.eup %6355  ;;  %4800 = vst [vmem:[%s9716_s9 + $0x358] sm:$0xff] %v6354_v46  ;;  %6375 = vpow2.f32 %v4049_v39  ;;  %9742 = vst [vmem:[#allocation25_spill] sm:$0xff] %v8753_v15  ;;  %v2964_v39 = vadd.f32 %v8442_v57, %v8183_v41 }
 0x4ae   :  { %v6358_v12 = vpop.eup %6357  ;;  %4799 = vst [vmem:[%s9716_s9 + $0x350] sm:$0xff] %v6356_v23  ;;  %6377 = vpow2.f32 %v4053_v62  ;;  %v3157_v62 = vadd.f32 %v8444_v5, %v8185_v0  ;;  %v2968_v5 = vadd.f32 %v8454_v18, %v8179_v40  ;;  %v3163_v18 = vadd.f32 %v8462_v4, %v8185_v0 }
 0x4af   :  { %v6360_v10 = vpop.eup %6359  ;;  %4801 = vst [vmem:[%s9716_s9 + $0x360] sm:$0xff] %v6358_v12  ;;  %6379 = vpow2.f32 %v4051_v28  ;;  %v2974_v4 = vadd.f32 %v8475_v35, %v8183_v41 }
 0x4b0   :  { %v6362_v63 = vpop.eup %6361  ;;  %4805 = vst [vmem:[%s9716_s9 + $0x380] sm:$0xff] %v6360_v10  ;;  %6381 = vpow2.f32 %v4055_v44  ;;  %v3707_v10 = vsub.f32 0.0, %v2964_v39  ;;  %v3709_v57 = vsub.f32 0.0, %v3157_v62 }
 0x4b1   :  { %v6364_v24 = vpop.eup %6363  ;;  %v4359_v14 = vadd.f32 1.0, %v6362_v63  ;;  %6383 = vpow2.f32 %v4063_v37 }
 0x4b2   :  { %v6366_v54 = vpop.eup %6365  ;;  %v4358_v51 = vadd.f32 1.0, %v6364_v24  ;;  %6385 = vpow2.f32 %v4067_v33  ;;  %v3161_v24 = vadd.f32 %v8456_v3, %v8181_v27  ;;  %v4065_v39 = vmul.f32 1.442695, %v3707_v10 }
 0x4b3   :  { %v6368_v46 = vpop.eup %6367  ;;  %6387 = vrcp.f32 %v4359_v14  ;;  %v4360_v28 = vadd.f32 1.0, %v6366_v54  ;;  %v2972_v3 = vadd.f32 %v8466_v1, %v8179_v40  ;;  %v3167_v1 = vadd.f32 %v8477_v52, %v8185_v0 }
 0x4b4   :  { %v6370_v23 = vpop.eup %6369  ;;  %6389 = vrcp.f32 %v4358_v51  ;;  %v4364_v12 = vadd.f32 1.0, %v6368_v46  ;;  %v2970_v51 = vadd.f32 %v8460_v60, %v8183_v41  ;;  %v3165_v60 = vadd.f32 %v8468_v25, %v8181_v27 }
 0x4b5   :  { %v6372_v44 = vpop.eup %6371  ;;  %6391 = vrcp.f32 %v4360_v28  ;;  %v4366_v15 = vadd.f32 1.0, %v6370_v23  ;;  %v4069_v28 = vmul.f32 1.442695, %v3709_v57  ;;  %v3171_v52 = vadd.f32 %v8500_v16, %v8181_v27 }
 0x4b6   :  { %v6374_v56 = vpop.eup %6373  ;;  %6393 = vrcp.f32 %v4364_v12  ;;  %v4365_v37 = vadd.f32 1.0, %v6372_v44  ;;  %v3715_v44 = vsub.f32 0.0, %v3161_v24  ;;  %v3720_v24 = vsub.f32 0.0, %v2972_v3  ;;  %v8798_v3 = vpop.f32.mrb[232].mxu0 }
 0x4b7   :  { %v6376_v63 = vpop.eup %6375  ;;  %6395 = vrcp.f32 %v4366_v15  ;;  %v4367_v33 = vadd.f32 1.0, %v6374_v56  ;;  %v3713_v15 = vsub.f32 0.0, %v2968_v5 }
 0x4b8   :  { %v6378_v14 = vpop.eup %6377  ;;  %6397 = vrcp.f32 %v4365_v37  ;;  %v4371_v54 = vadd.f32 1.0, %v6376_v63  ;;  %v3714_v63 = vsub.f32 0.0, %v2970_v51  ;;  %v2978_v51 = vadd.f32 %v8498_v32, %v8179_v40 }
 0x4b9   :  { %v6380_v62 = vpop.eup %6379  ;;  %6399 = vrcp.f32 %v4367_v33  ;;  %v4373_v46 = vadd.f32 1.0, %v6378_v14  ;;  %v3716_v14 = vsub.f32 0.0, %v3163_v18  ;;  %v4077_v25 = vmul.f32 1.442695, %v3713_v15  ;;  %v8796_v15 = vpop.f32.mrb[200].mxu1 }
 0x4ba   :  { %v6382_v23 = vpop.eup %6381  ;;  %6401 = vrcp.f32 %v4371_v54  ;;  %v4372_v56 = vadd.f32 1.0, %v6380_v62  ;;  %v4081_v35 = vmul.f32 1.442695, %v3715_v44  ;;  %v2980_v32 = vadd.f32 %v8505_v22, %v8183_v41  ;;  %v8803_v44 = vpop.f32.mrb[201].mxu1 }
 0x4bb   :  { %v6384_v12 = vpop.eup %6383  ;;  %6403 = vrcp.f32 %v4373_v46  ;;  %v4374_v10 = vadd.f32 1.0, %v6382_v23  ;;  %v3722_v46 = vsub.f32 0.0, %v3165_v60  ;;  %v4079_v23 = vmul.f32 1.442695, %v3714_v63 }
 0x4bc   :  { %v6386_v37 = vpop.eup %6385  ;;  %6405 = vrcp.f32 %v4372_v56  ;;  %v4378_v57 = vadd.f32 1.0, %v6384_v12  ;;  %v3721_v56 = vsub.f32 0.0, %v2974_v4  ;;  %v4083_v16 = vmul.f32 1.442695, %v3716_v14 }
 0x4bd   :  { %v6388_v33 = vpop.eup %6387  ;;  %6407 = vrcp.f32 %v4374_v10  ;;  %v4380_v5 = vadd.f32 1.0, %v6386_v37  ;;  %v3723_v10 = vsub.f32 0.0, %v3167_v1  ;;  %v4091_v22 = vmul.f32 1.442695, %v3720_v24 }
 0x4be   :  { %v6390_v54 = vpop.eup %6389  ;;  %4807 = vst [vmem:[%s9716_s9 + $0x390] sm:$0xff] %v6388_v33  ;;  %6409 = vrcp.f32 %v4378_v57  ;;  %v3727_v37 = vsub.f32 0.0, %v2978_v51  ;;  %v8810_v57 = vpop.f32.mrb[202].mxu1  ;;  %v3729_v33 = vsub.f32 0.0, %v3171_v52 }
 0x4bf   :  { %v6392_v62 = vpop.eup %6391  ;;  %4806 = vst [vmem:[%s9716_s9 + $0x388] sm:$0xff] %v6390_v54  ;;  %6411 = vrcp.f32 %v4380_v5  ;;  %v8817_v5 = vpop.f32.mrb[203].mxu1  ;;  %v4093_v54 = vmul.f32 1.442695, %v3721_v56  ;;  %v4097_v51 = vmul.f32 1.442695, %v3723_v10 }
 0x4c0   :  { %v6394_v18 = vpop.eup %6393  ;;  %4808 = vst [vmem:[%s9716_s9 + $0x398] sm:$0xff] %v6392_v62  ;;  %6413 = vpow2.f32 %v4065_v39  ;;  %v8805_v39 = vpop.f32.mrb[233].mxu0  ;;  %v4109_v52 = vmul.f32 1.442695, %v3729_v33 }
 0x4c1   :  { %v6396_v12 = vpop.eup %6395  ;;  %4812 = vst [vmem:[%s9716_s9 + $0x3b8] sm:$0xff] %v6394_v18  ;;  %6415 = vpow2.f32 %v4069_v28  ;;  %v8812_v63 = vpop.f32.mrb[234].mxu0  ;;  %v4095_v28 = vmul.f32 1.442695, %v3722_v46 }
 0x4c2   :  { %v6398_v60 = vpop.eup %6397  ;;  %4814 = vst [vmem:[%s9716_s9 + $0x3c8] sm:$0xff] %v6396_v12  ;;  %6417 = vpow2.f32 %v4077_v25  ;;  %v8819_v14 = vpop.f32.mrb[235].mxu0  ;;  %v3728_v25 = vsub.f32 0.0, %v2980_v32 }
 0x4c3   :  { %v6400_v4 = vpop.eup %6399  ;;  %4813 = vst [vmem:[%s9716_s9 + $0x3c0] sm:$0xff] %v6398_v60  ;;  %6419 = vpow2.f32 %v4081_v35  ;;  %v4105_v35 = vmul.f32 1.442695, %v3727_v37  ;;  %v8836_v56 = vpop.f32.mrb[204].mxu1 }
 0x4c4   :  { %v6402_v1 = vpop.eup %6401  ;;  %4815 = vst [vmem:[%s9716_s9 + $0x3d0] sm:$0xff] %v6400_v4  ;;  %6421 = vpow2.f32 %v4079_v23  ;;  %v4107_v23 = vmul.f32 1.442695, %v3728_v25  ;;  %v8838_v32 = vpop.f32.mrb[236].mxu0 }
 0x4c5   :  { %v6404_v24 = vpop.eup %6403  ;;  %4819 = vst [vmem:[%s9716_s9 + $0x3f0] sm:$0xff] %v6402_v1  ;;  %6423 = vpow2.f32 %v4083_v16  ;;  %v8843_v16 = vpop.f32.mrb[205].mxu1 }
 0x4c6   :  { %v6406_v62 = vpop.eup %6405  ;;  %4821 = vst [vmem:[%s9716_s9 + $0x400] sm:$0xff] %v6404_v24  ;;  %6425 = vpow2.f32 %v4091_v22  ;;  %9743 = vst [vmem:[#allocation26_spill] sm:$0xff] %v8843_v16  ;;  %v8845_v10 = vpop.f32.mrb[237].mxu0 }
 0x4c7   :  { %v6408_v46 = vpop.eup %6407  ;;  %4820 = vst [vmem:[%s9716_s9 + $0x3f8] sm:$0xff] %v6406_v62  ;;  %6427 = vpow2.f32 %v4095_v28  ;;  %9744 = vst [vmem:[#allocation27_spill] sm:$0xff] %v8845_v10  ;;  %v8850_v22 = vpop.f32.mrb[206].mxu1  ;;  %v3173_v28 = vadd.f32 %v8507_v11, %v8185_v0 }
 0x4c8   :  { %v6410_v18 = vpop.eup %6409  ;;  %4822 = vst [vmem:[%s9716_s9 + $0x408] sm:$0xff] %v6408_v46  ;;  %6429 = vpow2.f32 %v4093_v54  ;;  %9745 = vst [vmem:[#allocation28_spill] sm:$0xff] %v8850_v22  ;;  %v2982_v54 = vadd.f32 %v8512_v26, %v8179_v40 }
 0x4c9   :  { %v6412_v12 = vpop.eup %6411  ;;  %4826 = vst [vmem:[%s9716_s9 + $0x428] sm:$0xff] %v6410_v18  ;;  %6431 = vpow2.f32 %v4097_v51  ;;  %v3730_v18 = vsub.f32 0.0, %v3173_v28 }
 0x4ca   :  { %v6414_v60 = vpop.eup %6413  ;;  %4828 = vst [vmem:[%s9716_s9 + $0x438] sm:$0xff] %v6412_v12  ;;  %6433 = vpow2.f32 %v4105_v35  ;;  %v3175_v35 = vadd.f32 %v8514_v21, %v8181_v27  ;;  %v3177_v21 = vadd.f32 %v8521_v38, %v8185_v0  ;;  %v9748_v38 = vld [vmem:[#allocation5_spill] sm:$0xff] }
 0x4cb   :  { %v6416_v37 = vpop.eup %6415  ;;  %v4379_v4 = vadd.f32 1.0, %v6414_v60  ;;  %6435 = vpow2.f32 %v4109_v52  ;;  %v2990_v22 = vadd.f32 %v9748_v38, %v8183_v41 }
 0x4cc   :  { %v6418_v33 = vpop.eup %6417  ;;  %v4381_v1 = vadd.f32 1.0, %v6416_v37  ;;  %6437 = vpow2.f32 %v4107_v23  ;;  %v3734_v23 = vsub.f32 0.0, %v2982_v54  ;;  %v2984_v37 = vadd.f32 %v8519_v50, %v8183_v41  ;;  %v9747_v50 = vld [vmem:[#allocation4_spill] sm:$0xff] }
 0x4cd   :  { %v6420_v25 = vpop.eup %6419  ;;  %6439 = vrcp.f32 %v4379_v4  ;;  %v4385_v24 = vadd.f32 1.0, %v6418_v33 }
 0x4ce   :  { %v6422_v51 = vpop.eup %6421  ;;  %6441 = vrcp.f32 %v4381_v1  ;;  %v4387_v62 = vadd.f32 1.0, %v6420_v25  ;;  %v3736_v1 = vsub.f32 0.0, %v3175_v35 }
 0x4cf   :  { %v6424_v46 = vpop.eup %6423  ;;  %6443 = vrcp.f32 %v4385_v24  ;;  %v4386_v52 = vadd.f32 1.0, %v6422_v51  ;;  %v4111_v24 = vmul.f32 1.442695, %v3730_v18  ;;  %v9746_v51 = vld [vmem:[#allocation3_spill] sm:$0xff] }
 0x4d0   :  { %v6426_v11 = vpop.eup %6425  ;;  %6445 = vrcp.f32 %v4387_v62  ;;  %v4388_v12 = vadd.f32 1.0, %v6424_v46  ;;  %v2988_v54 = vadd.f32 %v9746_v51, %v8179_v40  ;;  %v3737_v51 = vsub.f32 0.0, %v3177_v21 }
 0x4d1   :  { %v6428_v60 = vpop.eup %6427  ;;  %6447 = vrcp.f32 %v4386_v52  ;;  %v4392_v26 = vadd.f32 1.0, %v6426_v11  ;;  %v4119_v52 = vmul.f32 1.442695, %v3734_v23  ;;  %v3181_v11 = vadd.f32 %v9747_v50, %v8181_v27 }
 0x4d2   :  { %v6430_v4 = vpop.eup %6429  ;;  %6449 = vrcp.f32 %v4388_v12  ;;  %v4394_v33 = vadd.f32 1.0, %v6428_v60  ;;  %v3735_v60 = vsub.f32 0.0, %v2984_v37  ;;  %v3741_v50 = vsub.f32 0.0, %v2988_v54  ;;  %v8874_v37 = vpop.f32.mrb[207].mxu1 }
 0x4d3   :  { %v6432_v25 = vpop.eup %6431  ;;  %6451 = vrcp.f32 %v4392_v26  ;;  %v4393_v28 = vadd.f32 1.0, %v6430_v4  ;;  %v8868_v26 = vpop.f32.mrb[238].mxu0  ;;  %v4123_v21 = vmul.f32 1.442695, %v3736_v1  ;;  %v4125_v1 = vmul.f32 1.442695, %v3737_v51 }
 0x4d4   :  { %v6434_v62 = vpop.eup %6433  ;;  %6453 = vrcp.f32 %v4394_v33  ;;  %v4395_v46 = vadd.f32 1.0, %v6432_v25  ;;  %v9749_v33 = vld [vmem:[#allocation6_spill] sm:$0xff]  ;;  %v8876_v16 = vpop.f32.mrb[239].mxu0  ;;  %v4121_v54 = vmul.f32 1.442695, %v3735_v60 }
 0x4d5   :  { %v6436_v12 = vpop.eup %6435  ;;  %6455 = vrcp.f32 %v4393_v28  ;;  %v4399_v35 = vadd.f32 1.0, %v6434_v62  ;;  %v3183_v25 = vadd.f32 %v9749_v33, %v8185_v0  ;;  %v9750_v28 = vld [vmem:[#allocation7_spill] sm:$0xff]  ;;  %9751 = vst [vmem:[#allocation3_spill] sm:$0xff] %v8876_v16  ;;  %v3742_v33 = vsub.f32 0.0, %v2990_v22 }
 0x4d6   :  { %v6438_v18 = vpop.eup %6437  ;;  %6457 = vrcp.f32 %v4395_v46  ;;  %v4401_v4 = vadd.f32 1.0, %v6436_v12  ;;  %v2992_v62 = vadd.f32 %v9750_v28, %v8179_v40  ;;  %v3743_v46 = vsub.f32 0.0, %v3181_v11  ;;  %v9752_v12 = vld [vmem:[#allocation8_spill] sm:$0xff] }
 0x4d7   :  { %v6440_v23 = vpop.eup %6439  ;;  %6459 = vrcp.f32 %v4399_v35  ;;  %v4400_v10 = vadd.f32 1.0, %v6438_v18  ;;  %v3185_v35 = vadd.f32 %v9752_v12, %v8181_v27  ;;  %v2994_v28 = vadd.f32 %v8551_v45, %v8183_v41 }
 0x4d8   :  { %v6442_v38 = vpop.eup %6441  ;;  %4827 = vst [vmem:[%s9716_s9 + $0x430] sm:$0xff] %v6440_v23  ;;  %6461 = vrcp.f32 %v4401_v4  ;;  %v3744_v11 = vsub.f32 0.0, %v3183_v25  ;;  %v9753_v4 = vld [vmem:[#allocation9_spill] sm:$0xff]  ;;  %v3748_v22 = vsub.f32 0.0, %v2992_v62  ;;  %v4135_v25 = vmul.f32 1.442695, %v3742_v33 }
 0x4d9   :  { %v6444_v18 = vpop.eup %6443  ;;  %4829 = vst [vmem:[%s9716_s9 + $0x440] sm:$0xff] %v6442_v38  ;;  %6463 = vrcp.f32 %v4400_v10  ;;  %v3187_v23 = vadd.f32 %v9753_v4, %v8185_v0  ;;  %v4133_v10 = vmul.f32 1.442695, %v3741_v50  ;;  %v3750_v60 = vsub.f32 0.0, %v3185_v35 }
 0x4da   :  { %v6446_v16 = vpop.eup %6445  ;;  %4833 = vst [vmem:[%s9716_s9 + $0x460] sm:$0xff] %v6444_v18  ;;  %6465 = vpow2.f32 %v4111_v24  ;;  %v4137_v24 = vmul.f32 1.442695, %v3743_v46  ;;  %v3749_v38 = vsub.f32 0.0, %v2994_v28  ;;  %v4139_v62 = vmul.f32 1.442695, %v3744_v11 }
 0x4db   :  { %v6448_v12 = vpop.eup %6447  ;;  %4835 = vst [vmem:[%s9716_s9 + $0x470] sm:$0xff] %v6446_v16  ;;  %6467 = vpow2.f32 %v4119_v52  ;;  %v8902_v16 = vpop.f32.mrb[208].mxu1 }
 0x4dc   :  { %v6450_v45 = vpop.eup %6449  ;;  %4834 = vst [vmem:[%s9716_s9 + $0x468] sm:$0xff] %v6448_v12  ;;  %6469 = vpow2.f32 %v4123_v21  ;;  %v8904_v52 = vpop.f32.mrb[240].mxu0  ;;  %v3751_v21 = vsub.f32 0.0, %v3187_v23 }
 0x4dd   :  { %v6452_v51 = vpop.eup %6451  ;;  %4836 = vst [vmem:[%s9716_s9 + $0x478] sm:$0xff] %v6450_v45  ;;  %6471 = vpow2.f32 %v4121_v54  ;;  %v8909_v46 = vpop.f32.mrb[209].mxu1  ;;  %v4147_v54 = vmul.f32 1.442695, %v3748_v22 }
 0x4de   :  { %v6454_v50 = vpop.eup %6453  ;;  %4840 = vst [vmem:[%s9716_s9 + $0x498] sm:$0xff] %v6452_v51  ;;  %6473 = vpow2.f32 %v4125_v1  ;;  %v8911_v35 = vpop.f32.mrb[241].mxu0  ;;  %v4151_v1 = vmul.f32 1.442695, %v3750_v60  ;;  %v4153_v45 = vmul.f32 1.442695, %v3751_v21 }
 0x4df   :  { %9754 = vst [vmem:[#allocation4_spill] sm:$0xff] %v8911_v35  ;;  %v6456_v18 = vpop.eup %6455  ;;  %4842 = vst [vmem:[%s9716_s9 + $0x4a8] sm:$0xff] %v6454_v50  ;;  %6475 = vpow2.f32 %v4133_v10  ;;  %v8916_v33 = vpop.f32.mrb[210].mxu1  ;;  %v4149_v10 = vmul.f32 1.442695, %v3749_v38  ;;  %v9759_v51 = vld [vmem:[#allocation10_spill] sm:$0xff] }
 0x4e0   :  { %9755 = vst [vmem:[#allocation5_spill] sm:$0xff] %v8916_v33  ;;  %v8918_v28 = vpop.f32.mrb[242].mxu0  ;;  %v6458_v4 = vpop.eup %6457  ;;  %4841 = vst [vmem:[%s9716_s9 + $0x4a0] sm:$0xff] %v6456_v18  ;;  %6477 = vpow2.f32 %v4137_v24 }
 0x4e1   :  { %9756 = vst [vmem:[#allocation6_spill] sm:$0xff] %v8918_v28  ;;  %v8923_v11 = vpop.f32.mrb[211].mxu1  ;;  %v8925_v23 = vpop.f32.mrb[243].mxu0  ;;  %4843 = vst [vmem:[%s9716_s9 + $0x4b0] sm:$0xff] %v6458_v4  ;;  %6479 = vpow2.f32 %v4135_v25  ;;  %v2998_v25 = vadd.f32 %v9759_v51, %v8179_v40 }
 0x4e2   :  { %9757 = vst [vmem:[#allocation7_spill] sm:$0xff] %v8923_v11  ;;  %9758 = vst [vmem:[#allocation8_spill] sm:$0xff] %v8925_v23  ;;  %v6460_v12 = vpop.eup %6459  ;;  %6481 = vpow2.f32 %v4139_v62  ;;  %v8941_v62 = vpop.f32.mrb[212].mxu1 }
 0x4e3   :  { %v6462_v22 = vpop.eup %6461  ;;  %4847 = vst [vmem:[%s9716_s9 + $0x4d0] sm:$0xff] %v6460_v12  ;;  %6483 = vpow2.f32 %v4147_v54  ;;  %9760 = vst [vmem:[#allocation9_spill] sm:$0xff] %v8941_v62  ;;  %v8943_v21 = vpop.f32.mrb[244].mxu0  ;;  %v9762_v54 = vld [vmem:[#allocation11_spill] sm:$0xff]  ;;  %v3755_v51 = vsub.f32 0.0, %v2998_v25 }
 0x4e4   :  { %v6464_v24 = vpop.eup %6463  ;;  %4849 = vst [vmem:[%s9716_s9 + $0x4e0] sm:$0xff] %v6462_v22  ;;  %6485 = vpow2.f32 %v4151_v1  ;;  %9761 = vst [vmem:[#allocation10_spill] sm:$0xff] %v8943_v21  ;;  %v3191_v12 = vadd.f32 %v9762_v54, %v8181_v27 }
 0x4e5   :  { %v6466_v60 = vpop.eup %6465  ;;  %4848 = vst [vmem:[%s9716_s9 + $0x4d8] sm:$0xff] %v6464_v24  ;;  %6487 = vpow2.f32 %v4149_v10  ;;  %v4161_v25 = vmul.f32 1.442695, %v3755_v51 }
 0x4e6   :  { %v6468_v38 = vpop.eup %6467  ;;  %v4402_v50 = vadd.f32 1.0, %v6466_v60  ;;  %6489 = vpow2.f32 %v4153_v45  ;;  %v9763_v60 = vld [vmem:[#allocation12_spill] sm:$0xff]  ;;  %v3757_v45 = vsub.f32 0.0, %v3191_v12 }
 0x4e7   :  { %v6470_v18 = vpop.eup %6469  ;;  %v4406_v4 = vadd.f32 1.0, %v6468_v38  ;;  %v3000_v62 = vadd.f32 %v9763_v60, %v8183_v41 }
 0x4e8   :  { %v6472_v22 = vpop.eup %6471  ;;  %6491 = vrcp.f32 %v4402_v50  ;;  %v4408_v24 = vadd.f32 1.0, %v6470_v18  ;;  %v9764_v50 = vld [vmem:[#allocation13_spill] sm:$0xff]  ;;  %v4165_v12 = vmul.f32 1.442695, %v3757_v45  ;;  %v8963_v45 = vpop.f32.mrb[245].mxu0 }
 0x4e9   :  { %v6474_v1 = vpop.eup %6473  ;;  %6493 = vrcp.f32 %v4406_v4  ;;  %v4407_v23 = vadd.f32 1.0, %v6472_v22  ;;  %v3193_v18 = vadd.f32 %v9764_v50, %v8185_v0  ;;  %v9765_v22 = vld [vmem:[#allocation14_spill] sm:$0xff]  ;;  %v3756_v35 = vsub.f32 0.0, %v3000_v62 }
 0x4ea   :  { %v6476_v11 = vpop.eup %6475  ;;  %6495 = vrcp.f32 %v4408_v24  ;;  %v4409_v10 = vadd.f32 1.0, %v6474_v1  ;;  %v3002_v24 = vadd.f32 %v9765_v22, %v8179_v40  ;;  %v3197_v50 = vadd.f32 %v8583_v47, %v8185_v0 }
 0x4eb   :  { %v6478_v21 = vpop.eup %6477  ;;  %6497 = vrcp.f32 %v4407_v23  ;;  %v4413_v38 = vadd.f32 1.0, %v6476_v11  ;;  %v3195_v11 = vadd.f32 %v8577_v2, %v8181_v27  ;;  %v3758_v51 = vsub.f32 0.0, %v3193_v18 }
 0x4ec   :  { %v6480_v28 = vpop.eup %6479  ;;  %6499 = vrcp.f32 %v4409_v10  ;;  %v4415_v54 = vadd.f32 1.0, %v6478_v21  ;;  %v3004_v10 = vadd.f32 %v8581_v36, %v8183_v41  ;;  %v3762_v62 = vsub.f32 0.0, %v3002_v24 }
 0x4ed   :  { %v6482_v33 = vpop.eup %6481  ;;  %6501 = vrcp.f32 %v4413_v38  ;;  %v4414_v4 = vadd.f32 1.0, %v6480_v28  ;;  %v3008_v2 = vadd.f32 %v8605_v53, %v8179_v40  ;;  %v3201_v18 = vadd.f32 %v8607_v59, %v8181_v27 }
 0x4ee   :  { %v6484_v1 = vpop.eup %6483  ;;  %6503 = vrcp.f32 %v4415_v54  ;;  %v4416_v60 = vadd.f32 1.0, %v6482_v33  ;;  %v4163_v47 = vmul.f32 1.442695, %v3756_v35  ;;  %v3763_v24 = vsub.f32 0.0, %v3004_v10 }
 0x4ef   :  { %v6486_v23 = vpop.eup %6485  ;;  %6505 = vrcp.f32 %v4414_v4  ;;  %v4420_v21 = vadd.f32 1.0, %v6484_v1  ;;  %v8961_v4 = vpop.f32.mrb[213].mxu1  ;;  %v3764_v1 = vsub.f32 0.0, %v3195_v11  ;;  %v3010_v53 = vadd.f32 %v8612_v20, %v8183_v41 }
 0x4f0   :  { %v6488_v38 = vpop.eup %6487  ;;  %6507 = vrcp.f32 %v4416_v60  ;;  %v4422_v28 = vadd.f32 1.0, %v6486_v23  ;;  %v8972_v23 = vpop.f32.mrb[214].mxu1  ;;  %v4167_v59 = vmul.f32 1.442695, %v3758_v51  ;;  %v3765_v11 = vsub.f32 0.0, %v3197_v50 }
 0x4f1   :  { %v6490_v54 = vpop.eup %6489  ;;  %6509 = vrcp.f32 %v4420_v21  ;;  %v4421_v33 = vadd.f32 1.0, %v6488_v38  ;;  %v8974_v21 = vpop.f32.mrb[246].mxu0  ;;  %v4175_v20 = vmul.f32 1.442695, %v3762_v62  ;;  %v3769_v10 = vsub.f32 0.0, %v3008_v2 }
 0x4f2   :  { %v6492_v22 = vpop.eup %6491  ;;  %6511 = vrcp.f32 %v4422_v28  ;;  %v4423_v36 = vadd.f32 1.0, %v6490_v54  ;;  %v3203_v28 = vadd.f32 %v8614_v6, %v8185_v0  ;;  %v3012_v54 = vadd.f32 %v8619_v31, %v8179_v40 }
 0x4f3   :  { %v6494_v60 = vpop.eup %6493  ;;  %4850 = vst [vmem:[%s9716_s9 + $0x4e8] sm:$0xff] %v6492_v22  ;;  %6513 = vrcp.f32 %v4421_v33  ;;  %v8986_v33 = vpop.f32.mrb[215].mxu1  ;;  %v4179_v6 = vmul.f32 1.442695, %v3764_v1  ;;  %v3771_v50 = vsub.f32 0.0, %v3201_v18  ;;  %v3770_v31 = vsub.f32 0.0, %v3010_v53 }
 0x4f4   :  { %v6496_v38 = vpop.eup %6495  ;;  %4854 = vst [vmem:[%s9716_s9 + $0x508] sm:$0xff] %v6494_v60  ;;  %6515 = vrcp.f32 %v4423_v36  ;;  %v8988_v22 = vpop.f32.mrb[247].mxu0  ;;  %v4181_v2 = vmul.f32 1.442695, %v3765_v11  ;;  %v3772_v60 = vsub.f32 0.0, %v3203_v28  ;;  %v3776_v1 = vsub.f32 0.0, %v3012_v54 }
 0x4f5   :  { %v6498_v35 = vpop.eup %6497  ;;  %4856 = vst [vmem:[%s9716_s9 + $0x518] sm:$0xff] %v6496_v38  ;;  %6517 = vpow2.f32 %v4161_v25  ;;  %v4177_v25 = vmul.f32 1.442695, %v3763_v24  ;;  %v4191_v53 = vmul.f32 1.442695, %v3770_v31  ;;  %v9010_v11 = vpop.f32.mrb[248].mxu0 }
 0x4f6   :  { %v6500_v51 = vpop.eup %6499  ;;  %4855 = vst [vmem:[%s9716_s9 + $0x510] sm:$0xff] %v6498_v35  ;;  %6519 = vpow2.f32 %v4165_v12  ;;  %v4189_v12 = vmul.f32 1.442695, %v3769_v10  ;;  %9766 = vst [vmem:[#allocation11_spill] sm:$0xff] %v9010_v11  ;;  %v4195_v35 = vmul.f32 1.442695, %v3772_v60 }
 0x4f7   :  { %v6502_v36 = vpop.eup %6501  ;;  %4857 = vst [vmem:[%s9716_s9 + $0x520] sm:$0xff] %v6500_v51  ;;  %6521 = vpow2.f32 %v4163_v47  ;;  %v4193_v47 = vmul.f32 1.442695, %v3771_v50  ;;  %v9017_v10 = vpop.f32.mrb[249].mxu0  ;;  %v4203_v51 = vmul.f32 1.442695, %v3776_v1 }
 0x4f8   :  { %v6504_v62 = vpop.eup %6503  ;;  %4861 = vst [vmem:[%s9716_s9 + $0x540] sm:$0xff] %v6502_v36  ;;  %6523 = vpow2.f32 %v4167_v59  ;;  %v9008_v59 = vpop.f32.mrb[216].mxu1  ;;  %9768 = vst [vmem:[#allocation13_spill] sm:$0xff] %v9017_v10 }
 0x4f9   :  { %v6506_v38 = vpop.eup %6505  ;;  %4863 = vst [vmem:[%s9716_s9 + $0x550] sm:$0xff] %v6504_v62  ;;  %6525 = vpow2.f32 %v4175_v20  ;;  %v9015_v20 = vpop.f32.mrb[217].mxu1 }
 0x4fa   :  { %v6508_v18 = vpop.eup %6507  ;;  %4862 = vst [vmem:[%s9716_s9 + $0x548] sm:$0xff] %v6506_v38  ;;  %6527 = vpow2.f32 %v4179_v6  ;;  %9767 = vst [vmem:[#allocation12_spill] sm:$0xff] %v9015_v20  ;;  %v3205_v6 = vadd.f32 %v8621_v43, %v8181_v27  ;;  %v9024_v50 = vpop.f32.mrb[218].mxu1  ;;  %v3014_v43 = vadd.f32 %v8626_v8, %v8183_v41 }
 0x4fb   :  { %v6510_v24 = vpop.eup %6509  ;;  %4864 = vst [vmem:[%s9716_s9 + $0x558] sm:$0xff] %v6508_v18  ;;  %6529 = vpow2.f32 %v4177_v25  ;;  %9769 = vst [vmem:[#allocation14_spill] sm:$0xff] %v9024_v50  ;;  %v9026_v36 = vpop.f32.mrb[250].mxu0 }
 0x4fc   :  { %v6512_v28 = vpop.eup %6511  ;;  %4868 = vst [vmem:[%s9716_s9 + $0x578] sm:$0xff] %v6510_v24  ;;  %6531 = vpow2.f32 %v4181_v2  ;;  %9770 = vst [vmem:[#allocation29_spill] sm:$0xff] %v9026_v36  ;;  %v9031_v31 = vpop.f32.mrb[219].mxu1  ;;  %v3778_v1 = vsub.f32 0.0, %v3205_v6  ;;  %v3207_v24 = vadd.f32 %v8628_v55, %v8185_v0 }
 0x4fd   :  { %v6514_v54 = vpop.eup %6513  ;;  %4870 = vst [vmem:[%s9716_s9 + $0x588] sm:$0xff] %v6512_v28  ;;  %6533 = vpow2.f32 %v4189_v12  ;;  %9771 = vst [vmem:[#allocation30_spill] sm:$0xff] %v9031_v31 }
 0x4fe   :  { %v6516_v25 = vpop.eup %6515  ;;  %4869 = vst [vmem:[%s9716_s9 + $0x580] sm:$0xff] %v6514_v54  ;;  %6535 = vpow2.f32 %v4193_v47  ;;  %v4207_v6 = vmul.f32 1.442695, %v3778_v1  ;;  %v3779_v31 = vsub.f32 0.0, %v3207_v24  ;;  %v9774_v1 = vld [vmem:[#allocation16_spill] sm:$0xff]  ;;  %v9775_v24 = vld [vmem:[#allocation17_spill] sm:$0xff] }
 0x4ff   :  { %v6518_v62 = vpop.eup %6517  ;;  %4871 = vst [vmem:[%s9716_s9 + $0x590] sm:$0xff] %v6516_v25  ;;  %6537 = vpow2.f32 %v4191_v53  ;;  %v3777_v53 = vsub.f32 0.0, %v3014_v43  ;;  %v3020_v50 = vadd.f32 %v9774_v1, %v8183_v41  ;;  %v3213_v10 = vadd.f32 %v9775_v24, %v8185_v0 }
 0x500   :  { %v6520_v2 = vpop.eup %6519  ;;  %v4427_v60 = vadd.f32 1.0, %v6518_v62  ;;  %6539 = vpow2.f32 %v4195_v35  ;;  %v3018_v35 = vadd.f32 %v8645_v34, %v8179_v40 }
 0x501   :  { %v6522_v38 = vpop.eup %6521  ;;  %v4429_v12 = vadd.f32 1.0, %v6520_v2  ;;  %6541 = vpow2.f32 %v4203_v51  ;;  %v9772_v2 = vld [vmem:[#allocation15_spill] sm:$0xff]  ;;  %v3784_v24 = vsub.f32 0.0, %v3020_v50 }
 0x502   :  { %v6524_v18 = vpop.eup %6523  ;;  %6543 = vrcp.f32 %v4427_v60  ;;  %v4428_v47 = vadd.f32 1.0, %v6522_v38  ;;  %v3211_v60 = vadd.f32 %v9772_v2, %v8181_v27 }
 0x503   :  { %v6526_v28 = vpop.eup %6525  ;;  %6545 = vrcp.f32 %v4429_v12  ;;  %v4430_v54 = vadd.f32 1.0, %v6524_v18  ;;  %v9773_v12 = vld [vmem:[#allocation2_spill] sm:$0xff] }
 0x504   :  { %v6528_v25 = vpop.eup %6527  ;;  %6547 = vrcp.f32 %v4428_v47  ;;  %v4434_v8 = vadd.f32 1.0, %v6526_v28  ;;  %v2528_v18 = vsub.s32 4, %v9773_v12  ;;  %v4205_v28 = vmul.f32 1.442695, %v3777_v53  ;;  %v9776_v53 = vld [vmem:[#allocation18_spill] sm:$0xff] }
 0x505   :  { %v6530_v62 = vpop.eup %6529  ;;  %6549 = vrcp.f32 %v4430_v54  ;;  %v4436_v51 = vadd.f32 1.0, %v6528_v25  ;;  %v2536_v36 = vsub.s32 6, %v9773_v12  ;;  %v3783_v25 = vsub.f32 0.0, %v3018_v35  ;;  %v9055_v35 = vld [vmem:[%s9715_s8] sm:$0xff] }
 0x506   :  { %v6532_v38 = vpop.eup %6531  ;;  %6551 = vrcp.f32 %v4434_v8  ;;  %v4435_v55 = vadd.f32 1.0, %v6530_v62  ;;  %v3785_v62 = vsub.f32 0.0, %v3211_v60 }
 0x507   :  { %v6534_v43 = vpop.eup %6533  ;;  %6553 = vrcp.f32 %v4436_v51  ;;  %v4437_v47 = vadd.f32 1.0, %v6532_v38  ;;  %v3022_v38 = vadd.f32 %v9776_v53, %v8179_v40  ;;  %v9065_v1 = vrot.slane %v9055_v35, %v2536_v36  ;;  %v9778_v53 = vld [vmem:[#allocation20_spill] sm:$0xff] }
 0x508   :  { %v6536_v34 = vpop.eup %6535  ;;  %6555 = vrcp.f32 %v4435_v55  ;;  %v4441_v54 = vadd.f32 1.0, %v6534_v43  ;;  %v9058_v55 = vrot.slane %v9055_v35, %v2528_v18  ;;  %v9060_v43 = vpop.f32.mrb[251].mxu0  ;;  %v3024_v11 = vadd.f32 %v9778_v53, %v8183_v41 }
 0x509   :  { %v6538_v2 = vpop.eup %6537  ;;  %6557 = vrcp.f32 %v4437_v47  ;;  %v4443_v8 = vadd.f32 1.0, %v6536_v34  ;;  %v9777_v34 = vld [vmem:[#allocation19_spill] sm:$0xff]  ;;  %v4217_v50 = vmul.f32 1.442695, %v3783_v25  ;;  %v4219_v25 = vmul.f32 1.442695, %v3784_v24 }
 0x50a   :  { %v6540_v20 = vpop.eup %6539  ;;  %6559 = vrcp.f32 %v4441_v54  ;;  %v4442_v51 = vadd.f32 1.0, %v6538_v2  ;;  %v3215_v54 = vadd.f32 %v9777_v34, %v8181_v27  ;;  %v9779_v27 = vld [vmem:[#allocation21_spill] sm:$0xff]  ;;  %v3254_v41 = vadd.f32 %v8672_v30, %v9058_v55  ;;  %v9087_v30 = vpop.f32.mrb[220].mxu1 }
 0x50b   :  { %v6542_v60 = vpop.eup %6541  ;;  %6561 = vrcp.f32 %v4443_v8  ;;  %v4444_v47 = vadd.f32 1.0, %v6540_v20  ;;  %v4209_v20 = vmul.f32 1.442695, %v3779_v31  ;;  %v3786_v8 = vsub.f32 0.0, %v3213_v10 }
 0x50c   :  { %v6544_v40 = vpop.eup %6543  ;;  %6563 = vrcp.f32 %v4442_v51  ;;  %v4448_v2 = vadd.f32 1.0, %v6542_v60  ;;  %v3217_v34 = vadd.f32 %v9779_v27, %v8185_v0  ;;  %v3790_v51 = vsub.f32 0.0, %v3022_v38  ;;  %v9780_v0 = vld [vmem:[#allocation22_spill] sm:$0xff] }
 0x50d   :  { %v6546_v18 = vpop.eup %6545  ;;  %4875 = vst [vmem:[%s9716_s9 + $0x5b0] sm:$0xff] %v6544_v40  ;;  %6565 = vrcp.f32 %v4444_v47  ;;  %v4221_v10 = vmul.f32 1.442695, %v3785_v62  ;;  %v3792_v31 = vsub.f32 0.0, %v3215_v54  ;;  %v3455_v47 = vadd.f32 %v9780_v0, %v9065_v1  ;;  %v9094_v54 = vpop.f32.mrb[221].mxu1 }
 0x50e   :  { %v6548_v36 = vpop.eup %6547  ;;  %4877 = vst [vmem:[%s9716_s9 + $0x5c0] sm:$0xff] %v6546_v18  ;;  %6567 = vrcp.f32 %v4448_v2  ;;  %v3791_v38 = vsub.f32 0.0, %v3024_v11  ;;  %v9089_v2 = vpop.f32.mrb[252].mxu0  ;;  %v3793_v62 = vsub.f32 0.0, %v3217_v34  ;;  %v4231_v11 = vmul.f32 1.442695, %v3790_v51 }
 0x50f   :  { %v6550_v60 = vpop.eup %6549  ;;  %4876 = vst [vmem:[%s9716_s9 + $0x5b8] sm:$0xff] %v6548_v36  ;;  %6569 = vpow2.f32 %v4207_v6  ;;  %v4223_v6 = vmul.f32 1.442695, %v3786_v8  ;;  %v9096_v18 = vpop.f32.mrb[253].mxu0  ;;  %v3593_v8 = vsub.f32 0.0, %v3455_v47  ;;  %v2532_v34 = vsub.s32 5, %v9773_v12 }
 0x510   :  { %v6552_v40 = vpop.eup %6551  ;;  %4878 = vst [vmem:[%s9716_s9 + $0x5c8] sm:$0xff] %v6550_v60  ;;  %6571 = vpow2.f32 %v4205_v28  ;;  %v3577_v28 = vsub.f32 0.0, %v3254_v41  ;;  %v9101_v24 = vpop.f32.mrb[222].mxu1  ;;  %v4233_v51 = vmul.f32 1.442695, %v3791_v38 }
 0x511   :  { %v6554_v53 = vpop.eup %6553  ;;  %4882 = vst [vmem:[%s9716_s9 + $0x5e8] sm:$0xff] %v6552_v40  ;;  %6573 = vpow2.f32 %v4209_v20  ;;  %v9103_v36 = vpop.f32.mrb[254].mxu0  ;;  %v4235_v20 = vmul.f32 1.442695, %v3792_v31  ;;  %v9126_v38 = vrot.slane %v9055_v35, %v2532_v34  ;;  %v9782_v34 = vld [vmem:[#allocation23_spill] sm:$0xff] }
 0x512   :  { %v6556_v27 = vpop.eup %6555  ;;  %4884 = vst [vmem:[%s9716_s9 + $0x5f8] sm:$0xff] %v6554_v53  ;;  %6575 = vpow2.f32 %v4217_v50  ;;  %v9109_v0 = vpop.f32.mrb[223].mxu1  ;;  %v3805_v12 = vmul.f32 1.442695, %v3577_v28 }
 0x513   :  { %v6558_v60 = vpop.eup %6557  ;;  %4883 = vst [vmem:[%s9716_s9 + $0x5f0] sm:$0xff] %v6556_v27  ;;  %6577 = vpow2.f32 %v4221_v10  ;;  %v9111_v40 = vpop.f32.mrb[255].mxu0  ;;  %v4237_v10 = vmul.f32 1.442695, %v3793_v62  ;;  %v3447_v27 = vadd.f32 %v8686_v58, %v9065_v1 }
 0x514   :  { %v6560_v50 = vpop.eup %6559  ;;  %4885 = vst [vmem:[%s9716_s9 + $0x600] sm:$0xff] %v6558_v60  ;;  %6579 = vpow2.f32 %v4219_v25  ;;  %v3837_v25 = vmul.f32 1.442695, %v3593_v8 }
 0x515   :  { %v6562_v41 = vpop.eup %6561  ;;  %4889 = vst [vmem:[%s9716_s9 + $0x620] sm:$0xff] %v6560_v50  ;;  %6581 = vpow2.f32 %v4223_v6  ;;  %v9131_v6 = vpop.f32.mrb[224].mxu1  ;;  %v3256_v50 = vadd.f32 %v9782_v34, %v9126_v38 }
 0x516   :  { %v6564_v31 = vpop.eup %6563  ;;  %4891 = vst [vmem:[%s9716_s9 + $0x630] sm:$0xff] %v6562_v41  ;;  %6583 = vpow2.f32 %v4231_v11  ;;  %v9138_v11 = vpop.f32.mrb[225].mxu1 }
 0x517   :  { %v6566_v47 = vpop.eup %6565  ;;  %4890 = vst [vmem:[%s9716_s9 + $0x628] sm:$0xff] %v6564_v31  ;;  %6585 = vpow2.f32 %v4235_v20  ;;  %v9140_v60 = vpop.f32.mrb[226].mxu1 }
 0x518   :  { %v6568_v53 = vpop.eup %6567  ;;  %4892 = vst [vmem:[%s9716_s9 + $0x638] sm:$0xff] %v6566_v47  ;;  %6587 = vpow2.f32 %v4233_v51  ;;  %9781 = vst [vmem:[#allocation15_spill] sm:$0xff] %v9140_v60  ;;  %v9144_v51 = vpop.f32.mrb[227].mxu1  ;;  %v3579_v47 = vsub.f32 0.0, %v3447_v27  ;;  %v3578_v60 = vsub.f32 0.0, %v3256_v50  ;;  %v3450_v50 = vadd.f32 %v8708_v7, %v9065_v1 }
 0x519   :  { %v6570_v62 = vpop.eup %6569  ;;  %4896 = vst [vmem:[%s9716_s9 + $0x658] sm:$0xff] %v6568_v53  ;;  %6589 = vpow2.f32 %v4237_v10  ;;  %9783 = vst [vmem:[#allocation2_spill] sm:$0xff] %v9144_v51  ;;  %v3266_v7 = vadd.f32 %v8737_v29, %v9126_v38 }
 0x51a   :  { %v6572_v35 = vpop.eup %6571  ;;  %v4450_v28 = vadd.f32 1.0, %v6570_v62  ;;  %6591 = vpow2.f32 %v3805_v12  ;;  %v3258_v62 = vadd.f32 %v8692_v61, %v9058_v55  ;;  %v3809_v27 = vmul.f32 1.442695, %v3579_v47 }
 0x51b   :  { %v6574_v20 = vpop.eup %6573  ;;  %v4449_v8 = vadd.f32 1.0, %v6572_v35  ;;  %6593 = vpow2.f32 %v3837_v25 }
 0x51c   :  { %v6576_v41 = vpop.eup %6575  ;;  %6595 = vrcp.f32 %v4450_v28  ;;  %v4451_v10 = vadd.f32 1.0, %v6574_v20  ;;  %v3458_v28 = vadd.f32 %v8694_v13, %v9065_v1  ;;  %v3264_v13 = vadd.f32 %v8730_v48, %v9058_v55 }
 0x51d   :  { %v6578_v31 = vpop.eup %6577  ;;  %6597 = vrcp.f32 %v4449_v8  ;;  %v4455_v58 = vadd.f32 1.0, %v6576_v41  ;;  %v3260_v41 = vadd.f32 %v8706_v19, %v9126_v38  ;;  %v3471_v19 = vadd.f32 %v8732_v17, %v9065_v1 }
 0x51e   :  { %v6580_v53 = vpop.eup %6579  ;;  %6599 = vrcp.f32 %v4451_v10  ;;  %v4457_v12 = vadd.f32 1.0, %v6578_v31  ;;  %v3584_v31 = vsub.f32 0.0, %v3258_v62  ;;  %v3463_v48 = vadd.f32 %v8739_v42, %v9065_v1 }
 0x51f   :  { %v6582_v35 = vpop.eup %6581  ;;  %6601 = vrcp.f32 %v4455_v58  ;;  %v4456_v25 = vadd.f32 1.0, %v6580_v53  ;;  %v3474_v42 = vadd.f32 %v8746_v9, %v9065_v1 }
 0x520   :  { %v6584_v34 = vpop.eup %6583  ;;  %6603 = vrcp.f32 %v4457_v12  ;;  %v4458_v51 = vadd.f32 1.0, %v6582_v35  ;;  %v3807_v12 = vmul.f32 1.442695, %v3578_v60  ;;  %v3819_v17 = vmul.f32 1.442695, %v3584_v31 }
 0x521   :  { %v6586_v20 = vpop.eup %6585  ;;  %6605 = vrcp.f32 %v4456_v25  ;;  %v4462_v8 = vadd.f32 1.0, %v6584_v34  ;;  %v3600_v25 = vsub.f32 0.0, %v3458_v28  ;;  %v3585_v34 = vsub.f32 0.0, %v3260_v41 }
 0x522   :  { %v6588_v10 = vpop.eup %6587  ;;  %6607 = vrcp.f32 %v4458_v51  ;;  %v4464_v61 = vadd.f32 1.0, %v6586_v20  ;;  %v3591_v28 = vsub.f32 0.0, %v3264_v13  ;;  %v3268_v41 = vadd.f32 %v8744_v49, %v9058_v55  ;;  %v9784_v49 = vld [vmem:[#allocation24_spill] sm:$0xff] }
 0x523   :  { %v6590_v58 = vpop.eup %6589  ;;  %6609 = vrcp.f32 %v4462_v8  ;;  %v4463_v53 = vadd.f32 1.0, %v6588_v10  ;;  %v3586_v8 = vsub.f32 0.0, %v3450_v50  ;;  %v3851_v29 = vmul.f32 1.442695, %v3600_v25 }
 0x524   :  { %v6592_v35 = vpop.eup %6591  ;;  %6611 = vrcp.f32 %v4464_v61  ;;  %v4465_v47 = vadd.f32 1.0, %v6590_v58  ;;  %v3621_v50 = vsub.f32 0.0, %v3471_v19  ;;  %v3821_v31 = vmul.f32 1.442695, %v3585_v34 }
 0x525   :  { %v6594_v51 = vpop.eup %6593  ;;  %6613 = vrcp.f32 %v4463_v53  ;;  %v4249_v62 = vadd.f32 1.0, %v6592_v35  ;;  %v3592_v53 = vsub.f32 0.0, %v3266_v7  ;;  %v3270_v13 = vadd.f32 %v9784_v49, %v9126_v38  ;;  %v9177_v35 = vpop.f32.mrb[228].mxu1 }
 0x526   :  { %v6596_v20 = vpop.eup %6595  ;;  %6615 = vrcp.f32 %v4465_v47  ;;  %v4265_v60 = vadd.f32 1.0, %v6594_v51  ;;  %v3823_v9 = vmul.f32 1.442695, %v3586_v8  ;;  %v3607_v25 = vsub.f32 0.0, %v3463_v48  ;;  %v9182_v19 = vpop.f32.mrb[229].mxu1 }
 0x527   :  { %v6598_v10 = vpop.eup %6597  ;;  %4898 = vst [vmem:[%s9716_s9 + $0x668] sm:$0xff] %v6596_v20  ;;  %6617 = vrcp.f32 %v4249_v62  ;;  %v3598_v62 = vsub.f32 0.0, %v3268_v41  ;;  %v9187_v34 = vpop.f32.mrb[230].mxu1  ;;  %v3628_v20 = vsub.f32 0.0, %v3474_v42  ;;  %v3835_v48 = vmul.f32 1.442695, %v3592_v53 }
 0x528   :  { %v6600_v61 = vpop.eup %6599  ;;  %4897 = vst [vmem:[%s9716_s9 + $0x660] sm:$0xff] %v6598_v10  ;;  %6619 = vrcp.f32 %v4265_v60  ;;  %v9192_v60 = vpop.f32.mrb[231].mxu1  ;;  %v3599_v10 = vsub.f32 0.0, %v3270_v13 }
 0x529   :  { %v6602_v58 = vpop.eup %6601  ;;  %4899 = vst [vmem:[%s9716_s9 + $0x670] sm:$0xff] %v6600_v61  ;;  %6621 = vpow2.f32 %v3807_v12  ;;  %v3833_v12 = vmul.f32 1.442695, %v3591_v28  ;;  %v3865_v28 = vmul.f32 1.442695, %v3607_v25 }
 0x52a   :  { %v6604_v47 = vpop.eup %6603  ;;  %4903 = vst [vmem:[%s9716_s9 + $0x690] sm:$0xff] %v6602_v58  ;;  %6623 = vpow2.f32 %v3809_v27  ;;  %v3893_v27 = vmul.f32 1.442695, %v3621_v50  ;;  %v3847_v61 = vmul.f32 1.442695, %v3598_v62 }
 0x52b   :  { %v6606_v51 = vpop.eup %6605  ;;  %4905 = vst [vmem:[%s9716_s9 + $0x6a0] sm:$0xff] %v6604_v47  ;;  %6625 = vpow2.f32 %v3819_v17  ;;  %v3907_v50 = vmul.f32 1.442695, %v3628_v20  ;;  %v3849_v58 = vmul.f32 1.442695, %v3599_v10  ;;  %v9785_v47 = vld [vmem:[#allocation25_spill] sm:$0xff]  ;;  %v3274_v20 = vadd.f32 %v8796_v15, %v9058_v55 }
 0x52c   :  { %v6608_v7 = vpop.eup %6607  ;;  %4904 = vst [vmem:[%s9716_s9 + $0x698] sm:$0xff] %v6606_v51  ;;  %6627 = vpow2.f32 %v3851_v29 }
 0x52d   :  { %v6610_v8 = vpop.eup %6609  ;;  %4906 = vst [vmem:[%s9716_s9 + $0x6a8] sm:$0xff] %v6608_v7  ;;  %6629 = vpow2.f32 %v3821_v31  ;;  %v9209_v31 = vpop.f32.mrb[232].mxu1 }
 0x52e   :  { %v6612_v17 = vpop.eup %6611  ;;  %4910 = vst [vmem:[%s9716_s9 + $0x6c8] sm:$0xff] %v6610_v8  ;;  %6631 = vpow2.f32 %v3823_v9  ;;  %v9214_v49 = vpop.f32.mrb[233].mxu1  ;;  %v3466_v9 = vadd.f32 %v9785_v47, %v9065_v1  ;;  %v3276_v47 = vadd.f32 %v8803_v44, %v9126_v38 }
 0x52f   :  { %v6614_v41 = vpop.eup %6613  ;;  %4912 = vst [vmem:[%s9716_s9 + $0x6d8] sm:$0xff] %v6612_v17  ;;  %6633 = vpow2.f32 %v3833_v12  ;;  %v9221_v25 = vpop.f32.mrb[234].mxu1 }
 0x530   :  { %v6616_v29 = vpop.eup %6615  ;;  %4911 = vst [vmem:[%s9716_s9 + $0x6d0] sm:$0xff] %v6614_v41  ;;  %6635 = vpow2.f32 %v3893_v27  ;;  %v9223_v62 = vpop.f32.mrb[235].mxu1 }
 0x531   :  { %v6618_v42 = vpop.eup %6617  ;;  %4913 = vst [vmem:[%s9716_s9 + $0x6e0] sm:$0xff] %v6616_v29  ;;  %6637 = vpow2.f32 %v3835_v48  ;;  %v3487_v29 = vadd.f32 %v8798_v3, %v9065_v1  ;;  %v3479_v3 = vadd.f32 %v8805_v39, %v9065_v1 }
 0x532   :  { %v6620_v53 = vpop.eup %6619  ;;  %4697 = vst [vmem:[%s9716_s9 + $0x20] sm:$0xff] %v6618_v42  ;;  %6639 = vpow2.f32 %v3865_v28  ;;  %v3614_v28 = vsub.f32 0.0, %v3466_v9 }
 0x533   :  { %v6622_v13 = vpop.eup %6621  ;;  %4713 = vst [vmem:[%s9716_s9 + $0xa0] sm:$0xff] %v6620_v53  ;;  %6641 = vpow2.f32 %v3847_v61  ;;  %v9229_v53 = vpop.f32.mrb[236].mxu1 }
 0x534   :  { %v6624_v51 = vpop.eup %6623  ;;  %v4250_v12 = vadd.f32 1.0, %v6622_v13  ;;  %6643 = vpow2.f32 %v3907_v50 }
 0x535   :  { %v6626_v7 = vpop.eup %6625  ;;  %v4251_v27 = vadd.f32 1.0, %v6624_v51  ;;  %6645 = vpow2.f32 %v3849_v58  ;;  %v3605_v58 = vsub.f32 0.0, %v3274_v20  ;;  %v9233_v51 = vpop.f32.mrb[237].mxu1 }
 0x536   :  { %v6628_v8 = vpop.eup %6627  ;;  %6647 = vrcp.f32 %v4250_v12  ;;  %v4256_v48 = vadd.f32 1.0, %v6626_v7  ;;  %v3879_v7 = vmul.f32 1.442695, %v3614_v28  ;;  %v3490_v28 = vadd.f32 %v8812_v63, %v9065_v1 }
 0x537   :  { %v6630_v10 = vpop.eup %6629  ;;  %6649 = vrcp.f32 %v4251_v27  ;;  %v4272_v17 = vadd.f32 1.0, %v6628_v8  ;;  %v9237_v27 = vpop.f32.mrb[238].mxu1  ;;  %v3284_v63 = vadd.f32 %v8836_v56, %v9058_v55 }
 0x538   :  { %v6632_v41 = vpop.eup %6631  ;;  %6651 = vrcp.f32 %v4256_v48  ;;  %v4257_v61 = vadd.f32 1.0, %v6630_v10  ;;  %v3649_v48 = vsub.f32 0.0, %v3487_v29  ;;  %v3278_v10 = vadd.f32 %v8810_v57, %v9058_v55 }
 0x539   :  { %v6634_v50 = vpop.eup %6633  ;;  %6653 = vrcp.f32 %v4272_v17  ;;  %v4258_v42 = vadd.f32 1.0, %v6632_v41  ;;  %v9241_v17 = vpop.f32.mrb[239].mxu1  ;;  %v3635_v57 = vsub.f32 0.0, %v3479_v3  ;;  %v3503_v3 = vadd.f32 %v8838_v32, %v9065_v1 }
 0x53a   :  { %v6636_v15 = vpop.eup %6635  ;;  %6655 = vrcp.f32 %v4257_v61  ;;  %v4263_v13 = vadd.f32 1.0, %v6634_v50  ;;  %v3861_v61 = vmul.f32 1.442695, %v3605_v58 }
 0x53b   :  { %v6638_v9 = vpop.eup %6637  ;;  %6657 = vrcp.f32 %v4258_v42  ;;  %v4293_v12 = vadd.f32 1.0, %v6636_v15  ;;  %v3606_v42 = vsub.f32 0.0, %v3276_v47  ;;  %v3280_v15 = vadd.f32 %v8817_v5, %v9126_v38 }
 0x53c   :  { %v6640_v20 = vpop.eup %6639  ;;  %6659 = vrcp.f32 %v4263_v13  ;;  %v4264_v8 = vadd.f32 1.0, %v6638_v9  ;;  %v3482_v9 = vadd.f32 %v8819_v14, %v9065_v1  ;;  %v3949_v5 = vmul.f32 1.442695, %v3649_v48 }
 0x53d   :  { %v6642_v44 = vpop.eup %6641  ;;  %6661 = vrcp.f32 %v4293_v12  ;;  %v4279_v41 = vadd.f32 1.0, %v6640_v20  ;;  %v3612_v20 = vsub.f32 0.0, %v3278_v10  ;;  %v3656_v47 = vsub.f32 0.0, %v3490_v28 }
 0x53e   :  { %v6644_v50 = vpop.eup %6643  ;;  %6663 = vrcp.f32 %v4264_v8  ;;  %v4270_v39 = vadd.f32 1.0, %v6642_v44  ;;  %v9256_v44 = vpop.f32.mrb[240].mxu1  ;;  %v3863_v56 = vmul.f32 1.442695, %v3606_v42  ;;  %v3613_v10 = vsub.f32 0.0, %v3280_v15 }
 0x53f   :  { %v6646_v29 = vpop.eup %6645  ;;  %6665 = vrcp.f32 %v4279_v41  ;;  %v4300_v13 = vadd.f32 1.0, %v6644_v50  ;;  %v9786_v41 = vld [vmem:[#allocation26_spill] sm:$0xff]  ;;  %v3921_v32 = vmul.f32 1.442695, %v3635_v57  ;;  %v3642_v28 = vsub.f32 0.0, %v3482_v9 }
 0x540   :  { %v6648_v12 = vpop.eup %6647  ;;  %6667 = vrcp.f32 %v4270_v39  ;;  %v4271_v58 = vadd.f32 1.0, %v6646_v29  ;;  %v3286_v50 = vadd.f32 %v9786_v41, %v9126_v38  ;;  %v9263_v39 = vpop.f32.mrb[241].mxu1  ;;  %v9787_v29 = vld [vmem:[#allocation27_spill] sm:$0xff]  ;;  %v3875_v15 = vmul.f32 1.442695, %v3612_v20 }
 0x541   :  { %v6650_v8 = vpop.eup %6649  ;;  %4698 = vst [vmem:[%s9716_s9 + $0x28] sm:$0xff] %v6648_v12  ;;  %6669 = vrcp.f32 %v4300_v13  ;;  %v3495_v13 = vadd.f32 %v9787_v29, %v9065_v1  ;;  %v9270_v12 = vpop.f32.mrb[242].mxu1  ;;  %v3677_v57 = vsub.f32 0.0, %v3503_v3 }
 0x542   :  { %v6652_v14 = vpop.eup %6651  ;;  %4699 = vst [vmem:[%s9716_s9 + $0x30] sm:$0xff] %v6650_v8  ;;  %6671 = vrcp.f32 %v4271_v58  ;;  %v3619_v58 = vsub.f32 0.0, %v3284_v63  ;;  %v9275_v8 = vpop.f32.mrb[243].mxu1  ;;  %v3935_v63 = vmul.f32 1.442695, %v3642_v28 }
 0x543   :  { %v6654_v48 = vpop.eup %6653  ;;  %4704 = vst [vmem:[%s9716_s9 + $0x58] sm:$0xff] %v6652_v14  ;;  %6673 = vpow2.f32 %v3879_v7  ;;  %v3963_v7 = vmul.f32 1.442695, %v3656_v47  ;;  %v3877_v14 = vmul.f32 1.442695, %v3613_v10 }
 0x544   :  { %v6656_v42 = vpop.eup %6655  ;;  %4720 = vst [vmem:[%s9716_s9 + $0xd8] sm:$0xff] %v6654_v48  ;;  %6675 = vpow2.f32 %v3861_v61  ;;  %v3620_v61 = vsub.f32 0.0, %v3286_v50  ;;  %v3663_v48 = vsub.f32 0.0, %v3495_v13  ;;  %v4005_v3 = vmul.f32 1.442695, %v3677_v57 }
 0x545   :  { %v6658_v41 = vpop.eup %6657  ;;  %4705 = vst [vmem:[%s9716_s9 + $0x60] sm:$0xff] %v6656_v42  ;;  %6677 = vpow2.f32 %v3949_v5  ;;  %v3889_v5 = vmul.f32 1.442695, %v3619_v58 }
 0x546   :  { %v6660_v9 = vpop.eup %6659  ;;  %4706 = vst [vmem:[%s9716_s9 + $0x68] sm:$0xff] %v6658_v41  ;;  %6679 = vpow2.f32 %v3863_v56  ;;  %v9292_v56 = vpop.f32.mrb[244].mxu1  ;;  %v3891_v50 = vmul.f32 1.442695, %v3620_v61  ;;  %v3977_v13 = vmul.f32 1.442695, %v3663_v48 }
 0x547   :  { %v6662_v20 = vpop.eup %6661  ;;  %4711 = vst [vmem:[%s9716_s9 + $0x90] sm:$0xff] %v6660_v9  ;;  %6681 = vpow2.f32 %v3921_v32  ;;  %v9297_v32 = vpop.f32.mrb[245].mxu1 }
 0x548   :  { %v6664_v29 = vpop.eup %6663  ;;  %4741 = vst [vmem:[%s9716_s9 + $0x180] sm:$0xff] %v6662_v20  ;;  %6683 = vpow2.f32 %v3875_v15  ;;  %v9302_v42 = vpop.f32.mrb[246].mxu1 }
 0x549   :  { %v6666_v47 = vpop.eup %6665  ;;  %4712 = vst [vmem:[%s9716_s9 + $0x98] sm:$0xff] %v6664_v29  ;;  %6685 = vpow2.f32 %v3963_v7  ;;  %9788 = vst [vmem:[#allocation16_spill] sm:$0xff] %v9302_v42  ;;  %v9307_v58 = vpop.f32.mrb[247].mxu1  ;;  %v9790_v7 = vld [vmem:[#allocation28_spill] sm:$0xff] }
 0x54a   :  { %v6668_v10 = vpop.eup %6667  ;;  %4727 = vst [vmem:[%s9716_s9 + $0x110] sm:$0xff] %v6666_v47  ;;  %6687 = vpow2.f32 %v3877_v14  ;;  %9789 = vst [vmem:[#allocation17_spill] sm:$0xff] %v9307_v58  ;;  %v3288_v57 = vadd.f32 %v9790_v7, %v9058_v55 }
 0x54b   :  { %v6670_v28 = vpop.eup %6669  ;;  %4718 = vst [vmem:[%s9716_s9 + $0xc8] sm:$0xff] %v6668_v10  ;;  %6689 = vpow2.f32 %v3935_v63  ;;  %v3506_v63 = vadd.f32 %v8868_v26, %v9065_v1 }
 0x54c   :  { %v6672_v15 = vpop.eup %6671  ;;  %4748 = vst [vmem:[%s9716_s9 + $0x1b8] sm:$0xff] %v6670_v28  ;;  %6691 = vpow2.f32 %v3889_v5  ;;  %v3626_v10 = vsub.f32 0.0, %v3288_v57  ;;  %v9794_v57 = vld [vmem:[#allocation3_spill] sm:$0xff] }
 0x54d   :  { %v6674_v41 = vpop.eup %6673  ;;  %4719 = vst [vmem:[%s9716_s9 + $0xd0] sm:$0xff] %v6672_v15  ;;  %6693 = vpow2.f32 %v4005_v3  ;;  %v9316_v3 = vpop.f32.mrb[248].mxu1  ;;  %v3684_v7 = vsub.f32 0.0, %v3506_v63 }
 0x54e   :  { %v6676_v9 = vpop.eup %6675  ;;  %v4286_v14 = vadd.f32 1.0, %v6674_v41  ;;  %6695 = vpow2.f32 %v3891_v50  ;;  %9791 = vst [vmem:[#allocation18_spill] sm:$0xff] %v9316_v3  ;;  %v3290_v50 = vadd.f32 %v8874_v37, %v9126_v38  ;;  %v9320_v41 = vpop.f32.mrb[249].mxu1  ;;  %v3903_v37 = vmul.f32 1.442695, %v3626_v10 }
 0x54f   :  { %v6678_v61 = vpop.eup %6677  ;;  %v4277_v20 = vadd.f32 1.0, %v6676_v9  ;;  %6697 = vpow2.f32 %v3977_v13  ;;  %9792 = vst [vmem:[#allocation19_spill] sm:$0xff] %v9320_v41  ;;  %v9322_v9 = vpop.f32.mrb[250].mxu1  ;;  %v3294_v41 = vadd.f32 %v8902_v16, %v9058_v55  ;;  %v9796_v16 = vld [vmem:[#allocation4_spill] sm:$0xff] }
 0x550   :  { %v6680_v48 = vpop.eup %6679  ;;  %6699 = vrcp.f32 %v4286_v14  ;;  %v4321_v29 = vadd.f32 1.0, %v6678_v61  ;;  %9793 = vst [vmem:[#allocation20_spill] sm:$0xff] %v9322_v9  ;;  %v3511_v3 = vadd.f32 %v9796_v16, %v9065_v1 }
 0x551   :  { %v6682_v5 = vpop.eup %6681  ;;  %6701 = vrcp.f32 %v4277_v20  ;;  %v4278_v47 = vadd.f32 1.0, %v6680_v48  ;;  %v3498_v20 = vadd.f32 %v9794_v57, %v9065_v1  ;;  %v9326_v48 = vpop.f32.mrb[251].mxu1  ;;  %v4019_v57 = vmul.f32 1.442695, %v3684_v7 }
 0x552   :  { %v6684_v28 = vpop.eup %6683  ;;  %6703 = vrcp.f32 %v4321_v29  ;;  %v4307_v15 = vadd.f32 1.0, %v6682_v5  ;;  %9795 = vst [vmem:[#allocation21_spill] sm:$0xff] %v9326_v48  ;;  %v3296_v48 = vadd.f32 %v8909_v46, %v9126_v38 }
 0x553   :  { %v6686_v13 = vpop.eup %6685  ;;  %6705 = vrcp.f32 %v4278_v47  ;;  %v4284_v26 = vadd.f32 1.0, %v6684_v28  ;;  %v3627_v28 = vsub.f32 0.0, %v3290_v50 }
 0x554   :  { %v6688_v14 = vpop.eup %6687  ;;  %6707 = vrcp.f32 %v4307_v15  ;;  %v4328_v61 = vadd.f32 1.0, %v6686_v13  ;;  %v3519_v15 = vadd.f32 %v8904_v52, %v9065_v1  ;;  %v9797_v52 = vld [vmem:[#allocation5_spill] sm:$0xff] }
 0x555   :  { %v6690_v29 = vpop.eup %6689  ;;  %6709 = vrcp.f32 %v4284_v26  ;;  %v4285_v5 = vadd.f32 1.0, %v6688_v14  ;;  %v3670_v14 = vsub.f32 0.0, %v3498_v20  ;;  %v3298_v58 = vadd.f32 %v9797_v52, %v9058_v55 }
 0x556   :  { %v6692_v47 = vpop.eup %6691  ;;  %6711 = vrcp.f32 %v4328_v61  ;;  %v4314_v63 = vadd.f32 1.0, %v6690_v29  ;;  %v3633_v29 = vsub.f32 0.0, %v3294_v41  ;;  %v3705_v46 = vsub.f32 0.0, %v3519_v15 }
 0x557   :  { %v6694_v13 = vpop.eup %6693  ;;  %6713 = vrcp.f32 %v4285_v5  ;;  %v4291_v9 = vadd.f32 1.0, %v6692_v47  ;;  %v9338_v5 = vpop.f32.mrb[252].mxu1  ;;  %v3905_v41 = vmul.f32 1.442695, %v3627_v28  ;;  %v3991_v15 = vmul.f32 1.442695, %v3670_v14 }
 0x558   :  { %v6696_v26 = vpop.eup %6695  ;;  %6715 = vrcp.f32 %v4314_v63  ;;  %v4349_v10 = vadd.f32 1.0, %v6694_v13  ;;  %v9798_v63 = vld [vmem:[#allocation6_spill] sm:$0xff]  ;;  %v9342_v20 = vpop.f32.mrb[253].mxu1 }
 0x559   :  { %v6698_v61 = vpop.eup %6697  ;;  %6717 = vrcp.f32 %v4291_v9  ;;  %v4292_v50 = vadd.f32 1.0, %v6696_v26  ;;  %v3522_v13 = vadd.f32 %v9798_v63, %v9065_v1  ;;  %9799 = vst [vmem:[#allocation22_spill] sm:$0xff] %v9342_v20  ;;  %v3634_v9 = vsub.f32 0.0, %v3296_v48  ;;  %v9800_v26 = vld [vmem:[#allocation7_spill] sm:$0xff]  ;;  %v9349_v52 = vpop.f32.mrb[254].mxu1  ;;  %v9802_v63 = vld [vmem:[#allocation8_spill] sm:$0xff] }
 0x55a   :  { %v6700_v7 = vpop.eup %6699  ;;  %6719 = vrcp.f32 %v4349_v10  ;;  %v4335_v47 = vadd.f32 1.0, %v6698_v61  ;;  %v3300_v16 = vadd.f32 %v9800_v26, %v9126_v38  ;;  %9801 = vst [vmem:[#allocation23_spill] sm:$0xff] %v9349_v52  ;;  %v3691_v61 = vsub.f32 0.0, %v3511_v3  ;;  %v9803_v26 = vld [vmem:[#allocation9_spill] sm:$0xff] }
 0x55b   :  { %v6702_v42 = vpop.eup %6701  ;;  %4734 = vst [vmem:[%s9716_s9 + $0x148] sm:$0xff] %v6700_v7  ;;  %6721 = vrcp.f32 %v4292_v50  ;;  %v3514_v20 = vadd.f32 %v9802_v63, %v9065_v1  ;;  %v9356_v7 = vpop.f32.mrb[255].mxu1  ;;  %v3917_v48 = vmul.f32 1.442695, %v3633_v29  ;;  %v3640_v50 = vsub.f32 0.0, %v3298_v58 }
 0x55c   :  { %v6704_v10 = vpop.eup %6703  ;;  %4725 = vst [vmem:[%s9716_s9 + $0x100] sm:$0xff] %v6702_v42  ;;  %6723 = vrcp.f32 %v4335_v47  ;;  %v3304_v52 = vadd.f32 %v9803_v26, %v9058_v55  ;;  %v4061_v3 = vmul.f32 1.442695, %v3705_v46  ;;  %v3712_v14 = vsub.f32 0.0, %v3522_v13  ;;  %v9804_v26 = vld [vmem:[#allocation10_spill] sm:$0xff] }
 0x55d   :  { %v6706_v28 = vpop.eup %6705  ;;  %4769 = vst [vmem:[%s9716_s9 + $0x260] sm:$0xff] %v6704_v10  ;;  %6725 = vpow2.f32 %v3903_v37  ;;  %v3919_v37 = vmul.f32 1.442695, %v3634_v9  ;;  %v3641_v29 = vsub.f32 0.0, %v3300_v16  ;;  %v4033_v10 = vmul.f32 1.442695, %v3691_v61 }
 0x55e   :  { %v6708_v42 = vpop.eup %6707  ;;  %4726 = vst [vmem:[%s9716_s9 + $0x108] sm:$0xff] %v6706_v28  ;;  %6727 = vpow2.f32 %v4019_v57  ;;  %v3698_v63 = vsub.f32 0.0, %v3514_v20  ;;  %v3931_v57 = vmul.f32 1.442695, %v3640_v50  ;;  %v3647_v46 = vsub.f32 0.0, %v3304_v52 }
 0x55f   :  { %v6710_v47 = vpop.eup %6709  ;;  %4755 = vst [vmem:[%s9716_s9 + $0x1f0] sm:$0xff] %v6708_v42  ;;  %6729 = vpow2.f32 %v3905_v41  ;;  %v4075_v41 = vmul.f32 1.442695, %v3712_v14  ;;  %v3933_v20 = vmul.f32 1.442695, %v3641_v29  ;;  %v3535_v42 = vadd.f32 %v9804_v26, %v9065_v1 }
 0x560   :  { %v6712_v58 = vpop.eup %6711  ;;  %4732 = vst [vmem:[%s9716_s9 + $0x138] sm:$0xff] %v6710_v47  ;;  %6731 = vpow2.f32 %v3991_v15  ;;  %v4047_v52 = vmul.f32 1.442695, %v3698_v63  ;;  %v3945_v61 = vmul.f32 1.442695, %v3647_v46  ;;  %v3306_v29 = vadd.f32 %v8961_v4, %v9126_v38 }
 0x561   :  { %v6714_v28 = vpop.eup %6713  ;;  %4776 = vst [vmem:[%s9716_s9 + $0x298] sm:$0xff] %v6712_v58  ;;  %6733 = vpow2.f32 %v3917_v48  ;;  %v3538_v26 = vadd.f32 %v8974_v21, %v9065_v1  ;;  %v3314_v21 = vadd.f32 %v9008_v59, %v9058_v55 }
 0x562   :  { %v6716_v13 = vpop.eup %6715  ;;  %4733 = vst [vmem:[%s9716_s9 + $0x140] sm:$0xff] %v6714_v28  ;;  %6735 = vpow2.f32 %v4061_v3 }
 0x563   :  { %v6718_v9 = vpop.eup %6717  ;;  %4762 = vst [vmem:[%s9716_s9 + $0x228] sm:$0xff] %v6716_v13  ;;  %6737 = vpow2.f32 %v3919_v37 }
 0x564   :  { %v6720_v16 = vpop.eup %6719  ;;  %4739 = vst [vmem:[%s9716_s9 + $0x170] sm:$0xff] %v6718_v9  ;;  %6739 = vpow2.f32 %v4033_v10 }
 0x565   :  { %v6722_v15 = vpop.eup %6721  ;;  %4797 = vst [vmem:[%s9716_s9 + $0x340] sm:$0xff] %v6720_v16  ;;  %6741 = vpow2.f32 %v3931_v57  ;;  %v3733_v57 = vsub.f32 0.0, %v3535_v42  ;;  %v3648_v16 = vsub.f32 0.0, %v3306_v29 }
 0x566   :  { %v6724_v48 = vpop.eup %6723  ;;  %4740 = vst [vmem:[%s9716_s9 + $0x178] sm:$0xff] %v6722_v15  ;;  %6743 = vpow2.f32 %v4075_v41  ;;  %v3527_v41 = vadd.f32 %v8963_v45, %v9065_v1  ;;  %v3308_v15 = vadd.f32 %v8972_v23, %v9058_v55  ;;  %v3530_v23 = vadd.f32 %v8988_v22, %v9065_v1  ;;  %v9806_v22 = vld [vmem:[#allocation12_spill] sm:$0xff] }
 0x567   :  { %v6726_v50 = vpop.eup %6725  ;;  %4783 = vst [vmem:[%s9716_s9 + $0x2d0] sm:$0xff] %v6724_v48  ;;  %6745 = vpow2.f32 %v3933_v20  ;;  %v3947_v29 = vmul.f32 1.442695, %v3648_v16  ;;  %v3316_v16 = vadd.f32 %v9806_v22, %v9126_v38 }
 0x568   :  { %v6728_v3 = vpop.eup %6727  ;;  %v4298_v14 = vadd.f32 1.0, %v6726_v50  ;;  %6747 = vpow2.f32 %v4047_v52  ;;  %v4117_v50 = vmul.f32 1.442695, %v3733_v57 }
 0x569   :  { %v6730_v47 = vpop.eup %6729  ;;  %v4356_v37 = vadd.f32 1.0, %v6728_v3  ;;  %6749 = vpow2.f32 %v3945_v61  ;;  %v3719_v3 = vsub.f32 0.0, %v3527_v41 }
 0x56a   :  { %v6732_v58 = vpop.eup %6731  ;;  %6751 = vrcp.f32 %v4298_v14  ;;  %v4299_v10 = vadd.f32 1.0, %v6730_v47  ;;  %v3310_v14 = vadd.f32 %v8986_v33, %v9126_v38  ;;  %v9805_v33 = vld [vmem:[#allocation11_spill] sm:$0xff] }
 0x56b   :  { %v6734_v63 = vpop.eup %6733  ;;  %6753 = vrcp.f32 %v4356_v37  ;;  %v4342_v28 = vadd.f32 1.0, %v6732_v58  ;;  %v4089_v59 = vmul.f32 1.442695, %v3719_v3 }
 0x56c   :  { %v6736_v46 = vpop.eup %6735  ;;  %6755 = vrcp.f32 %v4299_v10  ;;  %v4305_v13 = vadd.f32 1.0, %v6734_v63  ;;  %v3654_v63 = vsub.f32 0.0, %v3308_v15  ;;  %v9807_v15 = vld [vmem:[#allocation13_spill] sm:$0xff] }
 0x56d   :  { %v6738_v9 = vpop.eup %6737  ;;  %6757 = vrcp.f32 %v4342_v28  ;;  %v4377_v20 = vadd.f32 1.0, %v6736_v46  ;;  %v3740_v46 = vsub.f32 0.0, %v3538_v26 }
 0x56e   :  { %v6740_v52 = vpop.eup %6739  ;;  %6759 = vrcp.f32 %v4305_v13  ;;  %v4306_v4 = vadd.f32 1.0, %v6738_v9  ;;  %v3551_v13 = vadd.f32 %v9805_v33, %v9065_v1  ;;  %v3959_v26 = vmul.f32 1.442695, %v3654_v63 }
 0x56f   :  { %v6742_v61 = vpop.eup %6741  ;;  %6761 = vrcp.f32 %v4377_v20  ;;  %v4363_v48 = vadd.f32 1.0, %v6740_v52  ;;  %v3655_v20 = vsub.f32 0.0, %v3310_v14  ;;  %v4131_v3 = vmul.f32 1.442695, %v3740_v46 }
 0x570   :  { %v6744_v42 = vpop.eup %6743  ;;  %6763 = vrcp.f32 %v4306_v4  ;;  %v4312_v45 = vadd.f32 1.0, %v6742_v61  ;;  %v3726_v4 = vsub.f32 0.0, %v3530_v23  ;;  %v3543_v61 = vadd.f32 %v9807_v15, %v9065_v1  ;;  %v9809_v23 = vld [vmem:[#allocation29_spill] sm:$0xff] }
 0x571   :  { %v6746_v47 = vpop.eup %6745  ;;  %6765 = vrcp.f32 %v4363_v48  ;;  %v4384_v37 = vadd.f32 1.0, %v6744_v42  ;;  %v3661_v42 = vsub.f32 0.0, %v3314_v21  ;;  %v3961_v63 = vmul.f32 1.442695, %v3655_v20 }
 0x572   :  { %v6748_v58 = vpop.eup %6747  ;;  %6767 = vrcp.f32 %v4312_v45  ;;  %v4313_v10 = vadd.f32 1.0, %v6746_v47  ;;  %v9808_v45 = vld [vmem:[#allocation14_spill] sm:$0xff]  ;;  %v3662_v21 = vsub.f32 0.0, %v3316_v16 }
 0x573   :  { %v6750_v28 = vpop.eup %6749  ;;  %6769 = vrcp.f32 %v4384_v37  ;;  %v4370_v57 = vadd.f32 1.0, %v6748_v58  ;;  %v3318_v14 = vadd.f32 %v9808_v45, %v9058_v55  ;;  %v3761_v37 = vsub.f32 0.0, %v3551_v13 }
 0x574   :  { %v6752_v41 = vpop.eup %6751  ;;  %6771 = vrcp.f32 %v4313_v10  ;;  %v4319_v9 = vadd.f32 1.0, %v6750_v28  ;;  %v3554_v58 = vadd.f32 %v9809_v23, %v9065_v1  ;;  %v3973_v33 = vmul.f32 1.442695, %v3661_v42  ;;  %v9810_v42 = vld [vmem:[#allocation30_spill] sm:$0xff] }
 0x575   :  { %v6754_v52 = vpop.eup %6753  ;;  %4746 = vst [vmem:[%s9716_s9 + $0x1a8] sm:$0xff] %v6752_v41  ;;  %6773 = vrcp.f32 %v4370_v57  ;;  %v3747_v57 = vsub.f32 0.0, %v3543_v61  ;;  %v3668_v13 = vsub.f32 0.0, %v3318_v14  ;;  %v3975_v22 = vmul.f32 1.442695, %v3662_v21 }
 0x576   :  { %v6756_v48 = vpop.eup %6755  ;;  %4804 = vst [vmem:[%s9716_s9 + $0x378] sm:$0xff] %v6754_v52  ;;  %6775 = vrcp.f32 %v4319_v9  ;;  %v3768_v9 = vsub.f32 0.0, %v3554_v58  ;;  %v3320_v45 = vadd.f32 %v9810_v42, %v9126_v38 }
 0x577   :  { %v6758_v47 = vpop.eup %6757  ;;  %4747 = vst [vmem:[%s9716_s9 + $0x1b0] sm:$0xff] %v6756_v48  ;;  %6777 = vpow2.f32 %v4117_v50  ;;  %v4103_v50 = vmul.f32 1.442695, %v3726_v4  ;;  %v4145_v52 = vmul.f32 1.442695, %v3747_v57 }
 0x578   :  { %v6760_v10 = vpop.eup %6759  ;;  %4790 = vst [vmem:[%s9716_s9 + $0x308] sm:$0xff] %v6758_v47  ;;  %6779 = vpow2.f32 %v3947_v29  ;;  %v4173_v29 = vmul.f32 1.442695, %v3761_v37  ;;  %v3987_v4 = vmul.f32 1.442695, %v3668_v13 }
 0x579   :  { %v6762_v28 = vpop.eup %6761  ;;  %4753 = vst [vmem:[%s9716_s9 + $0x1e0] sm:$0xff] %v6760_v10  ;;  %6781 = vpow2.f32 %v4089_v59  ;;  %v4187_v61 = vmul.f32 1.442695, %v3768_v9  ;;  %v3567_v9 = vadd.f32 %v9089_v2, %v9065_v1  ;;  %v3328_v2 = vadd.f32 %v9101_v24, %v9058_v55 }
 0x57a   :  { %v6764_v46 = vpop.eup %6763  ;;  %4825 = vst [vmem:[%s9716_s9 + $0x420] sm:$0xff] %v6762_v28  ;;  %6783 = vpow2.f32 %v3959_v26  ;;  %v3669_v28 = vsub.f32 0.0, %v3320_v45  ;;  %v3562_v24 = vadd.f32 %v9111_v40, %v9065_v1 }
 0x57b   :  { %v6766_v41 = vpop.eup %6765  ;;  %4754 = vst [vmem:[%s9716_s9 + $0x1e8] sm:$0xff] %v6764_v46  ;;  %6785 = vpow2.f32 %v4131_v3  ;;  %v3546_v3 = vadd.f32 %v9060_v43, %v9065_v1  ;;  %v3324_v43 = vadd.f32 %v9087_v30, %v9058_v55  ;;  %v3559_v30 = vadd.f32 %v9096_v18, %v9065_v1 }
 0x57c   :  { %v6768_v20 = vpop.eup %6767  ;;  %4811 = vst [vmem:[%s9716_s9 + $0x3b0] sm:$0xff] %v6766_v41  ;;  %6787 = vpow2.f32 %v3961_v63  ;;  %v3330_v18 = vadd.f32 %v9109_v0, %v9126_v38 }
 0x57d   :  { %v6770_v16 = vpop.eup %6769  ;;  %4760 = vst [vmem:[%s9716_s9 + $0x218] sm:$0xff] %v6768_v20  ;;  %6789 = vpow2.f32 %v4103_v50  ;;  %v3754_v46 = vsub.f32 0.0, %v3546_v3 }
 0x57e   :  { %v6772_v59 = vpop.eup %6771  ;;  %4832 = vst [vmem:[%s9716_s9 + $0x458] sm:$0xff] %v6770_v16  ;;  %6791 = vpow2.f32 %v3973_v33  ;;  %v3989_v16 = vmul.f32 1.442695, %v3669_v28  ;;  %v3334_v28 = vadd.f32 %v9131_v6, %v9058_v55  ;;  %v9811_v6 = vld [vmem:[#allocation15_spill] sm:$0xff] }
 0x57f   :  { %v6774_v15 = vpop.eup %6773  ;;  %4761 = vst [vmem:[%s9716_s9 + $0x220] sm:$0xff] %v6772_v59  ;;  %6793 = vpow2.f32 %v4173_v29 }
 0x580   :  { %v6776_v48 = vpop.eup %6775  ;;  %4818 = vst [vmem:[%s9716_s9 + $0x3e8] sm:$0xff] %v6774_v15  ;;  %6795 = vpow2.f32 %v3975_v22  ;;  %v4159_v15 = vmul.f32 1.442695, %v3754_v46 }
 0x581   :  { %v6778_v26 = vpop.eup %6777  ;;  %4767 = vst [vmem:[%s9716_s9 + $0x250] sm:$0xff] %v6776_v48  ;;  %6797 = vpow2.f32 %v4145_v52  ;;  %v3326_v52 = vadd.f32 %v9094_v54, %v9126_v38  ;;  %v3570_v54 = vadd.f32 %v9103_v36, %v9065_v1  ;;  %v3336_v1 = vadd.f32 %v9138_v11, %v9126_v38 }
 0x582   :  { %v6780_v14 = vpop.eup %6779  ;;  %v4405_v47 = vadd.f32 1.0, %v6778_v26  ;;  %6799 = vpow2.f32 %v3987_v4  ;;  %v3675_v26 = vsub.f32 0.0, %v3324_v43 }
 0x583   :  { %v6782_v37 = vpop.eup %6781  ;;  %v4320_v23 = vadd.f32 1.0, %v6780_v14  ;;  %6801 = vpow2.f32 %v4187_v61  ;;  %v3789_v14 = vsub.f32 0.0, %v3567_v9 }
 0x584   :  { %v6784_v58 = vpop.eup %6783  ;;  %6803 = vrcp.f32 %v4405_v47  ;;  %v4391_v10 = vadd.f32 1.0, %v6782_v37  ;;  %v3676_v37 = vsub.f32 0.0, %v3326_v52  ;;  %v4001_v36 = vmul.f32 1.442695, %v3675_v26 }
 0x585   :  { %v6786_v63 = vpop.eup %6785  ;;  %6805 = vrcp.f32 %v4320_v23  ;;  %v4326_v21 = vadd.f32 1.0, %v6784_v58  ;;  %v4229_v0 = vmul.f32 1.442695, %v3789_v14  ;;  %v3690_v52 = vsub.f32 0.0, %v3336_v1 }
 0x586   :  { %v6788_v50 = vpop.eup %6787  ;;  %6807 = vrcp.f32 %v4391_v10  ;;  %v4412_v57 = vadd.f32 1.0, %v6786_v63  ;;  %v3775_v10 = vsub.f32 0.0, %v3559_v30  ;;  %v4003_v46 = vmul.f32 1.442695, %v3676_v37 }
 0x587   :  { %v6790_v33 = vpop.eup %6789  ;;  %6809 = vrcp.f32 %v4326_v21  ;;  %v4327_v13 = vadd.f32 1.0, %v6788_v50  ;;  %v3682_v21 = vsub.f32 0.0, %v3328_v2  ;;  %v3346_v1 = vadd.f32 %v9182_v19, %v9126_v38 }
 0x588   :  { %v6792_v41 = vpop.eup %6791  ;;  %6811 = vrcp.f32 %v4412_v57  ;;  %v4398_v29 = vadd.f32 1.0, %v6790_v33  ;;  %v3796_v57 = vsub.f32 0.0, %v3570_v54  ;;  %v3683_v33 = vsub.f32 0.0, %v3330_v18 }
 0x589   :  { %v6794_v20 = vpop.eup %6793  ;;  %6813 = vrcp.f32 %v4327_v13  ;;  %v4333_v22 = vadd.f32 1.0, %v6792_v41  ;;  %v3338_v13 = vadd.f32 %v9811_v6, %v9058_v55  ;;  %v4201_v41 = vmul.f32 1.442695, %v3775_v10 }
 0x58a   :  { %v6796_v59 = vpop.eup %6795  ;;  %6815 = vrcp.f32 %v4398_v29  ;;  %v4433_v4 = vadd.f32 1.0, %v6794_v20  ;;  %v3782_v29 = vsub.f32 0.0, %v3562_v24  ;;  %v4015_v9 = vmul.f32 1.442695, %v3682_v21 }
 0x58b   :  { %v6798_v61 = vpop.eup %6797  ;;  %6817 = vrcp.f32 %v4333_v22  ;;  %v4334_v48 = vadd.f32 1.0, %v6796_v59  ;;  %v3689_v20 = vsub.f32 0.0, %v3334_v28  ;;  %v3344_v24 = vadd.f32 %v9177_v35, %v9058_v55 }
 0x58c   :  { %v6800_v42 = vpop.eup %6799  ;;  %6819 = vrcp.f32 %v4433_v4  ;;  %v4419_v45 = vadd.f32 1.0, %v6798_v61  ;;  %v4017_v4 = vmul.f32 1.442695, %v3683_v33  ;;  %v4215_v61 = vmul.f32 1.442695, %v3782_v29 }
 0x58d   :  { %v6802_v47 = vpop.eup %6801  ;;  %6821 = vrcp.f32 %v4334_v48  ;;  %v4340_v3 = vadd.f32 1.0, %v6800_v42  ;;  %v4029_v26 = vmul.f32 1.442695, %v3689_v20  ;;  %v4031_v42 = vmul.f32 1.442695, %v3690_v52 }
 0x58e   :  { %v6804_v23 = vpop.eup %6803  ;;  %6823 = vrcp.f32 %v4419_v45  ;;  %v4440_v58 = vadd.f32 1.0, %v6802_v47  ;;  %v3703_v33 = vsub.f32 0.0, %v3344_v24  ;;  %v3704_v20 = vsub.f32 0.0, %v3346_v1 }
 0x58f   :  { %v6806_v63 = vpop.eup %6805  ;;  %4853 = vst [vmem:[%s9716_s9 + $0x500] sm:$0xff] %v6804_v23  ;;  %6825 = vrcp.f32 %v4340_v3  ;;  %v9812_v3 = vld [vmem:[#allocation2_spill] sm:$0xff] }
 0x590   :  { %v6808_v50 = vpop.eup %6807  ;;  %4768 = vst [vmem:[%s9716_s9 + $0x258] sm:$0xff] %v6806_v63  ;;  %6827 = vrcp.f32 %v4440_v58  ;;  %v3340_v37 = vadd.f32 %v9812_v3, %v9126_v38 }
 0x591   :  { %v6810_v40 = vpop.eup %6809  ;;  %4839 = vst [vmem:[%s9716_s9 + $0x490] sm:$0xff] %v6808_v50  ;;  %6829 = vpow2.f32 %v3989_v16  ;;  %v4243_v16 = vmul.f32 1.442695, %v3796_v57 }
 0x592   :  { %v6812_v43 = vpop.eup %6811  ;;  %4774 = vst [vmem:[%s9716_s9 + $0x288] sm:$0xff] %v6810_v40  ;;  %6831 = vpow2.f32 %v4159_v15  ;;  %v3696_v15 = vsub.f32 0.0, %v3338_v13  ;;  %v3697_v50 = vsub.f32 0.0, %v3340_v37  ;;  %v3348_v13 = vadd.f32 %v9187_v34, %v9058_v55 }
 0x593   :  { %v6814_v11 = vpop.eup %6813  ;;  %4860 = vst [vmem:[%s9716_s9 + $0x538] sm:$0xff] %v6812_v43  ;;  %6833 = vpow2.f32 %v4001_v36  ;;  %v3356_v34 = vadd.f32 %v9214_v49, %v9126_v38  ;;  %v3364_v49 = vadd.f32 %v9229_v53, %v9058_v55  ;;  %v3368_v53 = vadd.f32 %v9237_v27, %v9058_v55 }
 0x594   :  { %v6816_v22 = vpop.eup %6815  ;;  %4775 = vst [vmem:[%s9716_s9 + $0x290] sm:$0xff] %v6814_v11  ;;  %6835 = vpow2.f32 %v4229_v0  ;;  %v4043_v14 = vmul.f32 1.442695, %v3696_v15  ;;  %v4045_v29 = vmul.f32 1.442695, %v3697_v50  ;;  %v3350_v11 = vadd.f32 %v9192_v60, %v9126_v38 }
 0x595   :  { %v6818_v59 = vpop.eup %6817  ;;  %4846 = vst [vmem:[%s9716_s9 + $0x4c8] sm:$0xff] %v6816_v22  ;;  %6837 = vpow2.f32 %v4003_v46  ;;  %v3354_v22 = vadd.f32 %v9209_v31, %v9058_v55  ;;  %v3358_v60 = vadd.f32 %v9221_v25, %v9058_v55  ;;  %v3360_v31 = vadd.f32 %v9223_v62, %v9126_v38 }
 0x596   :  { %v6820_v30 = vpop.eup %6819  ;;  %4781 = vst [vmem:[%s9716_s9 + $0x2c0] sm:$0xff] %v6818_v59  ;;  %6839 = vpow2.f32 %v4201_v41  ;;  %v4057_v59 = vmul.f32 1.442695, %v3703_v33  ;;  %v4059_v25 = vmul.f32 1.442695, %v3704_v20  ;;  %v3738_v50 = vsub.f32 0.0, %v3368_v53 }
 0x597   :  { %v6822_v48 = vpop.eup %6821  ;;  %4881 = vst [vmem:[%s9716_s9 + $0x5e0] sm:$0xff] %v6820_v30  ;;  %6841 = vpow2.f32 %v4015_v9  ;;  %v3710_v30 = vsub.f32 0.0, %v3348_v13  ;;  %v3724_v37 = vsub.f32 0.0, %v3358_v60 }
 0x598   :  { %v6824_v2 = vpop.eup %6823  ;;  %4782 = vst [vmem:[%s9716_s9 + $0x2c8] sm:$0xff] %v6822_v48  ;;  %6843 = vpow2.f32 %v4243_v16  ;;  %v4127_v13 = vmul.f32 1.442695, %v3738_v50  ;;  %v9816_v50 = vld [vmem:[#allocation19_spill] sm:$0xff] }
 0x599   :  { %v6826_v45 = vpop.eup %6825  ;;  %4867 = vst [vmem:[%s9716_s9 + $0x570] sm:$0xff] %v6824_v2  ;;  %6845 = vpow2.f32 %v4017_v4  ;;  %v4071_v62 = vmul.f32 1.442695, %v3710_v30 }
 0x59a   :  { %v6828_v54 = vpop.eup %6827  ;;  %4788 = vst [vmem:[%s9716_s9 + $0x2f8] sm:$0xff] %v6826_v45  ;;  %6847 = vpow2.f32 %v4215_v61  ;;  %v3717_v45 = vsub.f32 0.0, %v3354_v22 }
 0x59b   :  { %v6830_v47 = vpop.eup %6829  ;;  %4888 = vst [vmem:[%s9716_s9 + $0x618] sm:$0xff] %v6828_v54  ;;  %6849 = vpow2.f32 %v4029_v26  ;;  %v3711_v26 = vsub.f32 0.0, %v3350_v11  ;;  %v3718_v54 = vsub.f32 0.0, %v3356_v34 }
 0x59c   :  { %v6832_v18 = vpop.eup %6831  ;;  %v4341_v23 = vadd.f32 1.0, %v6830_v47  ;;  %6851 = vpow2.f32 %v4031_v42  ;;  %v3366_v47 = vadd.f32 %v9233_v51, %v9126_v38  ;;  %v3370_v51 = vadd.f32 %v9241_v17, %v9126_v38 }
 0x59d   :  { %v6834_v58 = vpop.eup %6833  ;;  %v4426_v10 = vadd.f32 1.0, %v6832_v18  ;;  %6853 = vpow2.f32 %v4043_v14  ;;  %v4085_v24 = vmul.f32 1.442695, %v3717_v45  ;;  %v4099_v17 = vmul.f32 1.442695, %v3724_v37 }
 0x59e   :  { %v6836_v63 = vpop.eup %6835  ;;  %6855 = vrcp.f32 %v4341_v23  ;;  %v4347_v36 = vadd.f32 1.0, %v6834_v58  ;;  %v4073_v23 = vmul.f32 1.442695, %v3711_v26  ;;  %v3725_v58 = vsub.f32 0.0, %v3360_v31 }
 0x59f   :  { %v6838_v21 = vpop.eup %6837  ;;  %6857 = vrcp.f32 %v4426_v10  ;;  %v4461_v28 = vadd.f32 1.0, %v6836_v63  ;;  %v3731_v63 = vsub.f32 0.0, %v3364_v49  ;;  %v3739_v1 = vsub.f32 0.0, %v3370_v51 }
 0x5a0   :  { %v6840_v0 = vpop.eup %6839  ;;  %6859 = vrcp.f32 %v4347_v36  ;;  %v4348_v57 = vadd.f32 1.0, %v6838_v21  ;;  %v4087_v36 = vmul.f32 1.442695, %v3718_v54  ;;  %v3732_v21 = vsub.f32 0.0, %v3366_v47 }
 0x5a1   :  { %v6842_v40 = vpop.eup %6841  ;;  %6861 = vrcp.f32 %v4461_v28  ;;  %v4447_v46 = vadd.f32 1.0, %v6840_v0 }
 0x5a2   :  { %v6844_v6 = vpop.eup %6843  ;;  %6863 = vrcp.f32 %v4348_v57  ;;  %v4354_v35 = vadd.f32 1.0, %v6842_v40  ;;  %v4101_v57 = vmul.f32 1.442695, %v3725_v58 }
 0x5a3   :  { %v6846_v43 = vpop.eup %6845  ;;  %6865 = vrcp.f32 %v4447_v46  ;;  %v4468_v41 = vadd.f32 1.0, %v6844_v6  ;;  %v4113_v46 = vmul.f32 1.442695, %v3731_v63  ;;  %v4115_v6 = vmul.f32 1.442695, %v3732_v21 }
 0x5a4   :  { %v6848_v9 = vpop.eup %6847  ;;  %6867 = vrcp.f32 %v4354_v35  ;;  %v4355_v19 = vadd.f32 1.0, %v6846_v43 }
 0x5a5   :  { %v6850_v16 = vpop.eup %6849  ;;  %6869 = vrcp.f32 %v4468_v41  ;;  %v4454_v52 = vadd.f32 1.0, %v6848_v9  ;;  %v4129_v41 = vmul.f32 1.442695, %v3739_v1  ;;  %v3374_v9 = vadd.f32 %v9256_v44, %v9058_v55 }
 0x5a6   :  { %v6852_v4 = vpop.eup %6851  ;;  %6871 = vrcp.f32 %v4355_v19  ;;  %v4361_v15 = vadd.f32 1.0, %v6850_v16  ;;  %v3378_v44 = vadd.f32 %v9270_v12, %v9058_v55 }
 0x5a7   :  { %v6854_v61 = vpop.eup %6853  ;;  %6873 = vrcp.f32 %v4454_v52  ;;  %v4362_v48 = vadd.f32 1.0, %v6852_v4  ;;  %v3376_v52 = vadd.f32 %v9263_v39, %v9126_v38  ;;  %v3745_v30 = vsub.f32 0.0, %v3374_v9 }
 0x5a8   :  { %v6856_v2 = vpop.eup %6855  ;;  %6875 = vrcp.f32 %v4361_v15  ;;  %v4368_v42 = vadd.f32 1.0, %v6854_v61  ;;  %v3752_v47 = vsub.f32 0.0, %v3378_v44 }
 0x5a9   :  { %v6858_v14 = vpop.eup %6857  ;;  %4789 = vst [vmem:[%s9716_s9 + $0x300] sm:$0xff] %v6856_v2  ;;  %6877 = vrcp.f32 %v4362_v48  ;;  %v3746_v31 = vsub.f32 0.0, %v3376_v52 }
 0x5aa   :  { %v6860_v3 = vpop.eup %6859  ;;  %4874 = vst [vmem:[%s9716_s9 + $0x5a8] sm:$0xff] %v6858_v14  ;;  %6879 = vrcp.f32 %v4368_v42  ;;  %v3380_v42 = vadd.f32 %v9275_v8, %v9126_v38  ;;  %v4141_v14 = vmul.f32 1.442695, %v3745_v30  ;;  %v9813_v8 = vld [vmem:[#allocation16_spill] sm:$0xff]  ;;  %v4155_v1 = vmul.f32 1.442695, %v3752_v47 }
 0x5ab   :  { %v6862_v18 = vpop.eup %6861  ;;  %4795 = vst [vmem:[%s9716_s9 + $0x330] sm:$0xff] %v6860_v3  ;;  %6881 = vpow2.f32 %v4045_v29  ;;  %v3386_v3 = vadd.f32 %v9297_v32, %v9126_v38  ;;  %v4143_v53 = vmul.f32 1.442695, %v3746_v31  ;;  %v9815_v32 = vld [vmem:[#allocation18_spill] sm:$0xff] }
 0x5ac   :  { %v6864_v10 = vpop.eup %6863  ;;  %4909 = vst [vmem:[%s9716_s9 + $0x6c0] sm:$0xff] %v6862_v18  ;;  %6883 = vpow2.f32 %v4057_v59  ;;  %v3388_v18 = vadd.f32 %v9813_v8, %v9058_v55  ;;  %v3753_v51 = vsub.f32 0.0, %v3380_v42  ;;  %v9819_v8 = vld [vmem:[#allocation22_spill] sm:$0xff] }
 0x5ad   :  { %v6866_v27 = vpop.eup %6865  ;;  %4796 = vst [vmem:[%s9716_s9 + $0x338] sm:$0xff] %v6864_v10  ;;  %6885 = vpow2.f32 %v4059_v25  ;;  %v3384_v25 = vadd.f32 %v9292_v56, %v9058_v55  ;;  %v9814_v56 = vld [vmem:[#allocation17_spill] sm:$0xff] }
 0x5ae   :  { %v6868_v28 = vpop.eup %6867  ;;  %4895 = vst [vmem:[%s9716_s9 + $0x650] sm:$0xff] %v6866_v27  ;;  %6887 = vpow2.f32 %v4071_v62  ;;  %v3390_v10 = vadd.f32 %v9814_v56, %v9126_v38 }
 0x5af   :  { %v6870_v0 = vpop.eup %6869  ;;  %4802 = vst [vmem:[%s9716_s9 + $0x368] sm:$0xff] %v6868_v28  ;;  %6889 = vpow2.f32 %v4073_v23  ;;  %v3759_v27 = vsub.f32 0.0, %v3384_v25 }
 0x5b0   :  { %v6872_v40 = vpop.eup %6871  ;;  %4916 = vst [vmem:[%s9716_s9 + $0x6f8] sm:$0xff] %v6870_v0  ;;  %6891 = vpow2.f32 %v4085_v24  ;;  %v3396_v0 = vadd.f32 %v9816_v50, %v9126_v38 }
 0x5b1   :  { %v6874_v33 = vpop.eup %6873  ;;  %4803 = vst [vmem:[%s9716_s9 + $0x370] sm:$0xff] %v6872_v40  ;;  %6893 = vpow2.f32 %v4087_v36  ;;  %v3394_v36 = vadd.f32 %v9815_v32, %v9058_v55  ;;  %v3766_v40 = vsub.f32 0.0, %v3388_v18  ;;  %v3406_v18 = vadd.f32 %v9819_v8, %v9126_v38 }
 0x5b2   :  { %v6876_v35 = vpop.eup %6875  ;;  %4902 = vst [vmem:[%s9716_s9 + $0x688] sm:$0xff] %v6874_v33  ;;  %6895 = vpow2.f32 %v4099_v17  ;;  %v3760_v17 = vsub.f32 0.0, %v3386_v3 }
 0x5b3   :  { %v6878_v43 = vpop.eup %6877  ;;  %4809 = vst [vmem:[%s9716_s9 + $0x3a0] sm:$0xff] %v6876_v35  ;;  %6897 = vpow2.f32 %v4101_v57  ;;  %v4157_v35 = vmul.f32 1.442695, %v3753_v51  ;;  %v3773_v9 = vsub.f32 0.0, %v3394_v36  ;;  %v9820_v51 = vld [vmem:[#allocation23_spill] sm:$0xff] }
 0x5b4   :  { %v6880_v29 = vpop.eup %6879  ;;  %4810 = vst [vmem:[%s9716_s9 + $0x3a8] sm:$0xff] %v6878_v43  ;;  %6899 = vpow2.f32 %v4113_v46  ;;  %v9817_v46 = vld [vmem:[#allocation20_spill] sm:$0xff]  ;;  %v9818_v43 = vld [vmem:[#allocation21_spill] sm:$0xff]  ;;  %v3408_v56 = vadd.f32 %v9820_v51, %v9058_v55 }
 0x5b5   :  { %v6882_v11 = vpop.eup %6881  ;;  %4816 = vst [vmem:[%s9716_s9 + $0x3d8] sm:$0xff] %v6880_v29  ;;  %6901 = vpow2.f32 %v4115_v6  ;;  %v3398_v33 = vadd.f32 %v9817_v46, %v9058_v55 }
 0x5b6   :  { %v6884_v19 = vpop.eup %6883  ;;  %v4369_v20 = vadd.f32 1.0, %v6882_v11  ;;  %6903 = vpow2.f32 %v4127_v13  ;;  %v3767_v13 = vsub.f32 0.0, %v3390_v10  ;;  %v4169_v11 = vmul.f32 1.442695, %v3759_v27 }
 0x5b7   :  { %v6886_v22 = vpop.eup %6885  ;;  %v4375_v16 = vadd.f32 1.0, %v6884_v19  ;;  %6905 = vpow2.f32 %v4129_v41  ;;  %v3400_v41 = vadd.f32 %v9818_v43, %v9126_v38  ;;  %v3404_v19 = vadd.f32 %v9338_v5, %v9058_v55 }
 0x5b8   :  { %v6888_v59 = vpop.eup %6887  ;;  %6907 = vrcp.f32 %v4369_v20  ;;  %v4376_v34 = vadd.f32 1.0, %v6886_v22  ;;  %v4171_v22 = vmul.f32 1.442695, %v3760_v17  ;;  %v4185_v5 = vmul.f32 1.442695, %v3767_v13 }
 0x5b9   :  { %v6890_v4 = vpop.eup %6889  ;;  %6909 = vrcp.f32 %v4375_v16  ;;  %v4382_v15 = vadd.f32 1.0, %v6888_v59  ;;  %v3774_v16 = vsub.f32 0.0, %v3396_v0  ;;  %v4183_v59 = vmul.f32 1.442695, %v3766_v40 }
 0x5ba   :  { %v6892_v60 = vpop.eup %6891  ;;  %6911 = vrcp.f32 %v4376_v34  ;;  %v4383_v61 = vadd.f32 1.0, %v6890_v4  ;;  %v3780_v34 = vsub.f32 0.0, %v3398_v33  ;;  %v3794_v0 = vsub.f32 0.0, %v3408_v56 }
 0x5bb   :  { %v6894_v48 = vpop.eup %6893  ;;  %6913 = vrcp.f32 %v4382_v15  ;;  %v4389_v26 = vadd.f32 1.0, %v6892_v60  ;;  %v3781_v15 = vsub.f32 0.0, %v3400_v41  ;;  %v4197_v60 = vmul.f32 1.442695, %v3773_v9 }
 0x5bc   :  { %v6896_v2 = vpop.eup %6895  ;;  %6915 = vrcp.f32 %v4383_v61  ;;  %v4390_v39 = vadd.f32 1.0, %v6894_v48  ;;  %v3787_v61 = vsub.f32 0.0, %v3404_v19  ;;  %v4199_v48 = vmul.f32 1.442695, %v3774_v16 }
 0x5bd   :  { %v6898_v45 = vpop.eup %6897  ;;  %6917 = vrcp.f32 %v4389_v26  ;;  %v4396_v49 = vadd.f32 1.0, %v6896_v2  ;;  %v4211_v31 = vmul.f32 1.442695, %v3780_v34  ;;  %v4239_v13 = vmul.f32 1.442695, %v3794_v0 }
 0x5be   :  { %v6900_v54 = vpop.eup %6899  ;;  %6919 = vrcp.f32 %v4390_v39  ;;  %v4397_v12 = vadd.f32 1.0, %v6898_v45  ;;  %v4213_v39 = vmul.f32 1.442695, %v3781_v15  ;;  %v4225_v45 = vmul.f32 1.442695, %v3787_v61 }
 0x5bf   :  { %v6902_v62 = vpop.eup %6901  ;;  %6921 = vrcp.f32 %v4396_v49  ;;  %v4403_v37 = vadd.f32 1.0, %v6900_v54 }
 0x5c0   :  { %v6904_v23 = vpop.eup %6903  ;;  %6923 = vrcp.f32 %v4397_v12  ;;  %v4404_v58 = vadd.f32 1.0, %v6902_v62 }
 0x5c1   :  { %v6906_v24 = vpop.eup %6905  ;;  %6925 = vrcp.f32 %v4403_v37  ;;  %v4410_v63 = vadd.f32 1.0, %v6904_v23 }
 0x5c2   :  { %v6908_v21 = vpop.eup %6907  ;;  %6927 = vrcp.f32 %v4404_v58  ;;  %v4411_v28 = vadd.f32 1.0, %v6906_v24 }
 0x5c3   :  { %v6910_v57 = vpop.eup %6909  ;;  %4817 = vst [vmem:[%s9716_s9 + $0x3e0] sm:$0xff] %v6908_v21  ;;  %6929 = vrcp.f32 %v4410_v63  ;;  %v3410_v63 = vadd.f32 %v9356_v7, %v9126_v38 }
 0x5c4   :  { %v6912_v6 = vpop.eup %6911  ;;  %4823 = vst [vmem:[%s9716_s9 + $0x410] sm:$0xff] %v6910_v57  ;;  %6931 = vrcp.f32 %v4411_v28  ;;  %v3788_v28 = vsub.f32 0.0, %v3406_v18 }
 0x5c5   :  { %v6914_v29 = vpop.eup %6913  ;;  %4824 = vst [vmem:[%s9716_s9 + $0x418] sm:$0xff] %v6912_v6  ;;  %6933 = vpow2.f32 %v4141_v14 }
 0x5c6   :  { %v6916_v20 = vpop.eup %6915  ;;  %4830 = vst [vmem:[%s9716_s9 + $0x448] sm:$0xff] %v6914_v29  ;;  %6935 = vpow2.f32 %v4143_v53  ;;  %v4227_v7 = vmul.f32 1.442695, %v3788_v28 }
 0x5c7   :  { %v6918_v52 = vpop.eup %6917  ;;  %4831 = vst [vmem:[%s9716_s9 + $0x450] sm:$0xff] %v6916_v20  ;;  %6937 = vpow2.f32 %v4155_v1  ;;  %v3795_v1 = vsub.f32 0.0, %v3410_v63 }
 0x5c8   :  { %v6920_v4 = vpop.eup %6919  ;;  %4837 = vst [vmem:[%s9716_s9 + $0x480] sm:$0xff] %v6918_v52  ;;  %6939 = vpow2.f32 %v4157_v35 }
 0x5c9   :  { %v6922_v30 = vpop.eup %6921  ;;  %4838 = vst [vmem:[%s9716_s9 + $0x488] sm:$0xff] %v6920_v4  ;;  %6941 = vpow2.f32 %v4169_v11  ;;  %v4241_v41 = vmul.f32 1.442695, %v3795_v1 }
 0x5ca   :  { %v6924_v44 = vpop.eup %6923  ;;  %4844 = vst [vmem:[%s9716_s9 + $0x4b8] sm:$0xff] %v6922_v30  ;;  %6943 = vpow2.f32 %v4171_v22 }
 0x5cb   :  { %v6926_v26 = vpop.eup %6925  ;;  %4845 = vst [vmem:[%s9716_s9 + $0x4c0] sm:$0xff] %v6924_v44  ;;  %6945 = vpow2.f32 %v4183_v59 }
 0x5cc   :  { %v6928_v2 = vpop.eup %6927  ;;  %4851 = vst [vmem:[%s9716_s9 + $0x4f0] sm:$0xff] %v6926_v26  ;;  %6947 = vpow2.f32 %v4185_v5 }
 0x5cd   :  { %v6930_v42 = vpop.eup %6929  ;;  %4852 = vst [vmem:[%s9716_s9 + $0x4f8] sm:$0xff] %v6928_v2  ;;  %6949 = vpow2.f32 %v4197_v60 }
 0x5ce   :  { %v6932_v49 = vpop.eup %6931  ;;  %4858 = vst [vmem:[%s9716_s9 + $0x528] sm:$0xff] %v6930_v42  ;;  %6951 = vpow2.f32 %v4199_v48 }
 0x5cf   :  { %v6934_v14 = vpop.eup %6933  ;;  %4859 = vst [vmem:[%s9716_s9 + $0x530] sm:$0xff] %v6932_v49  ;;  %6953 = vpow2.f32 %v4211_v31 }
 0x5d0   :  { %v6936_v25 = vpop.eup %6935  ;;  %v4417_v54 = vadd.f32 1.0, %v6934_v14  ;;  %6955 = vpow2.f32 %v4213_v39 }
 0x5d1   :  { %v6938_v12 = vpop.eup %6937  ;;  %v4418_v47 = vadd.f32 1.0, %v6936_v25  ;;  %6957 = vpow2.f32 %v4225_v45 }
 0x5d2   :  { %v6940_v3 = vpop.eup %6939  ;;  %6959 = vrcp.f32 %v4417_v54  ;;  %v4424_v62 = vadd.f32 1.0, %v6938_v12 }
 0x5d3   :  { %v6942_v37 = vpop.eup %6941  ;;  %6961 = vrcp.f32 %v4418_v47  ;;  %v4425_v53 = vadd.f32 1.0, %v6940_v3 }
 0x5d4   :  { %v6944_v23 = vpop.eup %6943  ;;  %6963 = vrcp.f32 %v4424_v62  ;;  %v4431_v58 = vadd.f32 1.0, %v6942_v37 }
 0x5d5   :  { %v6946_v10 = vpop.eup %6945  ;;  %6965 = vrcp.f32 %v4425_v53  ;;  %v4432_v24 = vadd.f32 1.0, %v6944_v23 }
 0x5d6   :  { %v6948_v27 = vpop.eup %6947  ;;  %6967 = vrcp.f32 %v4431_v58  ;;  %v4438_v32 = vadd.f32 1.0, %v6946_v10 }
 0x5d7   :  { %v6950_v36 = vpop.eup %6949  ;;  %6969 = vrcp.f32 %v4432_v24  ;;  %v4439_v21 = vadd.f32 1.0, %v6948_v27 }
 0x5d8   :  { %v6952_v17 = vpop.eup %6951  ;;  %6971 = vrcp.f32 %v4438_v32  ;;  %v4445_v50 = vadd.f32 1.0, %v6950_v36 }
 0x5d9   :  { %v6954_v57 = vpop.eup %6953  ;;  %6973 = vrcp.f32 %v4439_v21  ;;  %v4446_v55 = vadd.f32 1.0, %v6952_v17 }
 0x5da   :  { %v6956_v40 = vpop.eup %6955  ;;  %6975 = vrcp.f32 %v4445_v50  ;;  %v4452_v46 = vadd.f32 1.0, %v6954_v57 }
 0x5db   :  { %v6958_v33 = vpop.eup %6957  ;;  %6977 = vrcp.f32 %v4446_v55  ;;  %v4453_v38 = vadd.f32 1.0, %v6956_v40 }
 0x5dc   :  { %v6960_v6 = vpop.eup %6959  ;;  %6979 = vrcp.f32 %v4452_v46  ;;  %v4459_v35 = vadd.f32 1.0, %v6958_v33 }
 0x5dd   :  { %v6962_v43 = vpop.eup %6961  ;;  %4865 = vst [vmem:[%s9716_s9 + $0x560] sm:$0xff] %v6960_v6  ;;  %6981 = vrcp.f32 %v4453_v38 }
 0x5de   :  { %v6964_v29 = vpop.eup %6963  ;;  %4866 = vst [vmem:[%s9716_s9 + $0x568] sm:$0xff] %v6962_v43  ;;  %6983 = vrcp.f32 %v4459_v35 }
 0x5df   :  { %v6966_v11 = vpop.eup %6965  ;;  %4872 = vst [vmem:[%s9716_s9 + $0x598] sm:$0xff] %v6964_v29  ;;  %6985 = vpow2.f32 %v4227_v7 }
 0x5e0   :  { %v6968_v9 = vpop.eup %6967  ;;  %4873 = vst [vmem:[%s9716_s9 + $0x5a0] sm:$0xff] %v6966_v11  ;;  %6987 = vpow2.f32 %v4239_v13 }
 0x5e1   :  { %v6970_v19 = vpop.eup %6969  ;;  %4879 = vst [vmem:[%s9716_s9 + $0x5d0] sm:$0xff] %v6968_v9  ;;  %6989 = vpow2.f32 %v4241_v41 }
 0x5e2   :  { %v6972_v20 = vpop.eup %6971  ;;  %4880 = vst [vmem:[%s9716_s9 + $0x5d8] sm:$0xff] %v6970_v19 }
 0x5e3   :  { %v6974_v22 = vpop.eup %6973  ;;  %4886 = vst [vmem:[%s9716_s9 + $0x608] sm:$0xff] %v6972_v20 }
 0x5e4   :  { %v6976_v16 = vpop.eup %6975  ;;  %4887 = vst [vmem:[%s9716_s9 + $0x610] sm:$0xff] %v6974_v22 }
 0x5e5   :  { %v6978_v52 = vpop.eup %6977  ;;  %4893 = vst [vmem:[%s9716_s9 + $0x640] sm:$0xff] %v6976_v16 }
 0x5e6   :  { %v6980_v59 = vpop.eup %6979  ;;  %4894 = vst [vmem:[%s9716_s9 + $0x648] sm:$0xff] %v6978_v52 }
 0x5e7   :  { %v6982_v34 = vpop.eup %6981  ;;  %4900 = vst [vmem:[%s9716_s9 + $0x678] sm:$0xff] %v6980_v59 }
 0x5e8   :  { %v6984_v4 = vpop.eup %6983  ;;  %4901 = vst [vmem:[%s9716_s9 + $0x680] sm:$0xff] %v6982_v34 }
 0x5e9   :  { %v6986_v5 = vpop.eup %6985  ;;  %4907 = vst [vmem:[%s9716_s9 + $0x6b0] sm:$0xff] %v6984_v4 }
 0x5ea   :  { %v6988_v15 = vpop.eup %6987  ;;  %v4460_v30 = vadd.f32 1.0, %v6986_v5 }
 0x5eb   :  { %v6990_v60 = vpop.eup %6989  ;;  %v4466_v61 = vadd.f32 1.0, %v6988_v15 }
 0x5ec   :  { %6991 = vrcp.f32 %v4460_v30  ;;  %v4467_v44 = vadd.f32 1.0, %v6990_v60 }
 0x5ed   :  { %6993 = vrcp.f32 %v4466_v61 }
 0x5ee   :  { %6995 = vrcp.f32 %v4467_v44 }
 0x5f6   :  { %v6992_v48 = vpop.eup %6991 }
 0x5f7   :  { %v6994_v26 = vpop.eup %6993  ;;  %4908 = vst [vmem:[%s9716_s9 + $0x6b8] sm:$0xff] %v6992_v48 }
 0x5f8   :  { %v6996_v31 = vpop.eup %6995  ;;  %4914 = vst [vmem:[%s9716_s9 + $0x6e8] sm:$0xff] %v6994_v26 }
 0x5f9   :  { %4915 = vst [vmem:[%s9716_s9 + $0x6f0] sm:$0xff] %v6996_v31 }

</bundles_post_ra>
